<compile_context>
chip_gen: v6e
topology: v6e:2x2x1
jax: 0.10.0
libtpu: 0.0.40
codegen_flags: <defaults>
</compile_context>

<pallas_src>
import functools
import math

import jax
import jax.numpy as jnp
from jax import lax
from jax.experimental import pallas as pl
from jax.experimental.pallas import tpu as pltpu


def _round_up(x, m):
    return (x + m - 1) // m * m


# ----------------------------------------------------------------------------
# Fused Pallas kernel: num_layers x LSTM  +  Linear
# ----------------------------------------------------------------------------
def _fused_kernel(*refs, num_layers, seq_len, b_blk, h_pad, e_pad):
    """Refs layout:
       x_ref,
       (wih_ref, whh_ref, bias_ref) * num_layers,     # W_ih^T (Din_pad,4Hp) bf16,
                                                       # W_hh^T (Hp,4Hp) bf16,
                                                       # b_ih+b_hh (1,4Hp) f32
       wlin_ref (Hp,Ep) bf16, blin_ref (1,Ep) f32,
       out_ref (T, b_blk, Ep) f32,
       gx_scr (T, b_blk, 4Hp) f32, seq_scr (T, b_blk, Hp) f32,
       h_scr (b_blk, Hp) f32, c_scr (b_blk, Hp) f32
    PyTorch gate order along 4H: [i, f, g, o]; each gate block is lane-aligned
    at offset g*Hp.  Padded hidden columns have zero weights/bias, so their
    h/c state stays exactly zero and never pollutes real columns.
    """
    T = seq_len
    H = h_pad

    x_ref = refs[0]
    layer_refs = refs[1:1 + 3 * num_layers]
    wlin_ref = refs[1 + 3 * num_layers]
    blin_ref = refs[2 + 3 * num_layers]
    out_ref = refs[3 + 3 * num_layers]
    gx_scr, seq_scr, h_scr, c_scr = refs[4 + 3 * num_layers:]

    for layer in range(num_layers):
        wih_ref = layer_refs[3 * layer + 0]
        whh_ref = layer_refs[3 * layer + 1]
        bias_ref = layer_refs[3 * layer + 2]

        # ---- hoisted input projection: one big MXU matmul per layer --------
        x_in = x_ref[...] if layer == 0 else seq_scr[...]      # (T, Bblk, Din)
        d_in = x_in.shape[-1]
        x2d = x_in.reshape(T * b_blk, d_in).astype(jnp.bfloat16)
        gx = jnp.dot(x2d, wih_ref[...],
                     preferred_element_type=jnp.float32) + bias_ref[...]
        gx_scr[...] = gx.reshape(T, b_blk, 4 * H)

        # ---- recurrence -----------------------------------------------------
        h_scr[...] = jnp.zeros_like(h_scr)
        c_scr[...] = jnp.zeros_like(c_scr)

        def step(t, carry, whh_ref=whh_ref):
            h = h_scr[...]
            gates = gx_scr[t] + jnp.dot(
                h.astype(jnp.bfloat16), whh_ref[...],
                preferred_element_type=jnp.float32)             # (Bblk, 4Hp)
            i_g = jax.nn.sigmoid(gates[:, 0 * H:1 * H])
            f_g = jax.nn.sigmoid(gates[:, 1 * H:2 * H])
            g_g = jnp.tanh(gates[:, 2 * H:3 * H])
            o_g = jax.nn.sigmoid(gates[:, 3 * H:4 * H])
            c_new = f_g * c_scr[...] + i_g * g_g
            h_new = o_g * jnp.tanh(c_new)
            c_scr[...] = c_new
            h_scr[...] = h_new
            seq_scr[t] = h_new                                  # lane-dense (8,128)
            return carry

        lax.fori_loop(0, T, step, 0, unroll=True)

    # ---- final Linear on the whole sequence (single MXU matmul) -------------
    h_all = seq_scr[...].reshape(T * b_blk, H).astype(jnp.bfloat16)
    y = jnp.dot(h_all, wlin_ref[...],
                preferred_element_type=jnp.float32) + blin_ref[...]
    out_ref[...] = y.reshape(T, b_blk, e_pad)


# ----------------------------------------------------------------------------
# One-time parameter preparation (transpose / pad / bias-sum / bf16 cast)
# ----------------------------------------------------------------------------
def prepare_params(params, embedding_size, hidden_size):
    """Convert PyTorch-layout params into padded, lane-aligned, pre-transposed
    TPU-friendly tensors.  Done ONCE, outside the forward path."""
    E, H = embedding_size, hidden_size
    Ep, Hp = _round_up(E, 128), _round_up(H, 128)

    prepared_layers = []
    d_in, d_in_pad = E, Ep
    for (w_ih, w_hh, b_ih, b_hh) in params["lstm"]:
        wih_t = jnp.zeros((d_in_pad, 4 * Hp), jnp.float32)
        whh_t = jnp.zeros((Hp, 4 * Hp), jnp.float32)
        bias = jnp.zeros((1, 4 * Hp), jnp.float32)
        # place each gate block [i,f,g,o] into its own lane-aligned Hp slot
        for g in range(4):
            wih_t = wih_t.at[:d_in, g * Hp:g * Hp + H].set(
                w_ih[g * H:(g + 1) * H, :].T)
            whh_t = whh_t.at[:H, g * Hp:g * Hp + H].set(
                w_hh[g * H:(g + 1) * H, :].T)
            bias = bias.at[0, g * Hp:g * Hp + H].set(
                b_ih[g * H:(g + 1) * H] + b_hh[g * H:(g + 1) * H])
        prepared_layers.append(
            (wih_t.astype(jnp.bfloat16), whh_t.astype(jnp.bfloat16), bias))
        d_in, d_in_pad = H, Hp

    w_lin, b_lin = params["linear"]
    wlin_t = (jnp.zeros((Hp, Ep), jnp.float32)
              .at[:H, :E].set(w_lin.T)).astype(jnp.bfloat16)
    blin = jnp.zeros((1, Ep), jnp.float32).at[0, :E].set(b_lin)

    return {"lstm": prepared_layers, "linear": (wlin_t, blin),
            "dims": (E, H, Ep, Hp)}


# ----------------------------------------------------------------------------
# Forward wrapper: single fused pallas_call, batch-blocked grid
# ----------------------------------------------------------------------------
def history_summarizer_forward(history, prepared, b_blk=8):
    """history: (T, B, E) float32.  Returns (T, B, E) float32."""
    T, B, E = history.shape
    E_, H, Ep, Hp = prepared["dims"]
    assert E == E_
    num_layers = len(prepared["lstm"])

    Bp = _round_up(max(B, b_blk), b_blk)          # pad batch to sublane multiple
    x = jnp.zeros((T, Bp, Ep), jnp.float32).at[:, :B, :E].set(
        history.astype(jnp.float32))

    wlin, blin = prepared["linear"]

    in_specs = [pl.BlockSpec((T, b_blk, Ep), lambda b: (0, b, 0))]
    weight_args = []
    for (wih, whh, bias) in prepared["lstm"]:
        in_specs.append(pl.BlockSpec(wih.shape, lambda b: (0, 0)))
        in_specs.append(pl.BlockSpec(whh.shape, lambda b: (0, 0)))
        in_specs.append(pl.BlockSpec(bias.shape, lambda b: (0, 0)))
        weight_args += [wih, whh, bias]
    in_specs.append(pl.BlockSpec(wlin.shape, lambda b: (0, 0)))
    in_specs.append(pl.BlockSpec(blin.shape, lambda b: (0, 0)))

    kernel = functools.partial(
        _fused_kernel, num_layers=num_layers, seq_len=T,
        b_blk=b_blk, h_pad=Hp, e_pad=Ep)

    out = pl.pallas_call(
        kernel,
        out_shape=jax.ShapeDtypeStruct((T, Bp, Ep), jnp.float32),
        grid_spec=pltpu.PrefetchScalarGridSpec(
            num_scalar_prefetch=0,
            grid=(Bp // b_blk,),
            in_specs=in_specs,
            out_specs=pl.BlockSpec((T, b_blk, Ep), lambda b: (0, b, 0)),
            scratch_shapes=[
                pltpu.VMEM((T, b_blk, 4 * Hp), jnp.float32),   # gates_x
                pltpu.VMEM((T, b_blk, Hp), jnp.float32),       # layer output seq
                pltpu.VMEM((b_blk, Hp), jnp.float32),          # h
                pltpu.VMEM((b_blk, Hp), jnp.float32),          # c
            ],
        ),
        compiler_params=pltpu.CompilerParams(
            dimension_semantics=("parallel",),
            vmem_limit_bytes=32 * 1024 * 1024,
        ),
    )(x, *weight_args, wlin, blin)

    return out[:, :B, :E]


# ----------------------------------------------------------------------------
# Deterministic parameter init (PyTorch-style uniform(-1/sqrt(H), 1/sqrt(H)))
# ----------------------------------------------------------------------------
def init_params(key, embedding_size, hidden_size, num_layers):
    k_lstm = 1.0 / math.sqrt(hidden_size)
    lstm_layers = []
    for layer in range(num_layers):
        d_in = embedding_size if layer == 0 else hidden_size
        key, k1, k2, k3, k4 = jax.random.split(key, 5)
        w_ih = jax.random.uniform(k1, (4 * hidden_size, d_in),
                                  minval=-k_lstm, maxval=k_lstm, dtype=jnp.float32)
        w_hh = jax.random.uniform(k2, (4 * hidden_size, hidden_size),
                                  minval=-k_lstm, maxval=k_lstm, dtype=jnp.float32)
        b_ih = jax.random.uniform(k3, (4 * hidden_size,),
                                  minval=-k_lstm, maxval=k_lstm, dtype=jnp.float32)
        b_hh = jax.random.uniform(k4, (4 * hidden_size,),
                                  minval=-k_lstm, maxval=k_lstm, dtype=jnp.float32)
        lstm_layers.append((w_ih, w_hh, b_ih, b_hh))
    key, k1, k2 = jax.random.split(key, 3)
    k_lin = 1.0 / math.sqrt(hidden_size)
    w_lin = jax.random.uniform(k1, (embedding_size, hidden_size),
                               minval=-k_lin, maxval=k_lin, dtype=jnp.float32)
    b_lin = jax.random.uniform(k2, (embedding_size,),
                               minval=-k_lin, maxval=k_lin, dtype=jnp.float32)
    return {"lstm": lstm_layers, "linear": (w_lin, b_lin)}


# ----------------------------------------------------------------------------
# Matched-precision pure-JAX reference (bf16 matmul inputs, f32 accumulate)
# ----------------------------------------------------------------------------
def reference_forward(history, params):
    x = history.astype(jnp.float32)
    for (w_ih, w_hh, b_ih, b_hh) in params["lstm"]:
        T, B, _ = x.shape
        H = w_hh.shape[1]
        wih_t = w_ih.T.astype(jnp.bfloat16)
        whh_t = w_hh.T.astype(jnp.bfloat16)
        bias = (b_ih + b_hh)[None, :].astype(jnp.float32)
        h = jnp.zeros((B, H), jnp.float32)
        c = jnp.zeros((B, H), jnp.float32)
        outs = []
        for t in range(T):
            gates = (jnp.dot(x[t].astype(jnp.bfloat16), wih_t,
                             preferred_element_type=jnp.float32)
                     + bias
                     + jnp.dot(h.astype(jnp.bfloat16), whh_t,
                               preferred_element_type=jnp.float32))
            i_g = jax.nn.sigmoid(gates[:, 0 * H:1 * H])
            f_g = jax.nn.sigmoid(gates[:, 1 * H:2 * H])
            g_g = jnp.tanh(gates[:, 2 * H:3 * H])
            o_g = jax.nn.sigmoid(gates[:, 3 * H:4 * H])
            c = f_g * c + i_g * g_g
            h = o_g * jnp.tanh(c)
            outs.append(h)
        x = jnp.stack(outs, axis=0)
    w, b = params["linear"]
    T, B, H = x.shape
    y = jnp.dot(x.astype(jnp.bfloat16).reshape(T * B, H),
                w.T.astype(jnp.bfloat16),
                preferred_element_type=jnp.float32)
    return y.reshape(T, B, -1) + b


if __name__ == "__main__":
    seq_len, batch, embedding_size, hidden_size, num_layers = 8, 4, 32, 32, 2

    key = jax.random.PRNGKey(0)
    key, k_in = jax.random.split(key)
    history = jax.random.normal(k_in, (seq_len, batch, embedding_size),
                                dtype=jnp.float32)
    params = init_params(key, embedding_size, hidden_size, num_layers)
    prepared = prepare_params(params, embedding_size, hidden_size)

    out = history_summarizer_forward(history, prepared)
    out = jax.block_until_ready(out)

    ref = reference_forward(history, params)
    assert out.shape == (seq_len, batch, embedding_size)
    assert jnp.allclose(out, ref, atol=2e-3, rtol=2e-3), \
        float(jnp.max(jnp.abs(out - ref)))

    print("KERNEL_OK")
</pallas_src>

<mosaic_0001>
module attributes {stable_mosaic.version = 11 : i64} {
  func.func @_fused_kernel(%arg0: i32, %arg1: memref<8x8x128xf32, #tpu.memory_space<vmem>>, %arg2: memref<128x512xbf16, #tpu.memory_space<vmem>>, %arg3: memref<128x512xbf16, #tpu.memory_space<vmem>>, %arg4: memref<1x512xf32, #tpu.memory_space<vmem>>, %arg5: memref<128x512xbf16, #tpu.memory_space<vmem>>, %arg6: memref<128x512xbf16, #tpu.memory_space<vmem>>, %arg7: memref<1x512xf32, #tpu.memory_space<vmem>>, %arg8: memref<128x128xbf16, #tpu.memory_space<vmem>>, %arg9: memref<1x128xf32, #tpu.memory_space<vmem>>, %arg10: memref<8x8x128xf32, #tpu.memory_space<vmem>>, %arg11: memref<8x8x512xf32, #tpu.memory_space<vmem>>, %arg12: memref<8x8x128xf32, #tpu.memory_space<vmem>>, %arg13: memref<8x128xf32, #tpu.memory_space<vmem>>, %arg14: memref<8x128xf32, #tpu.memory_space<vmem>>) attributes {dimension_semantics = [#tpu.dimension_semantics<parallel>], iteration_bounds = array<i64: 1>, scalar_prefetch = 0 : i64, scratch_operands = 4 : i64, tpu.core_type = #tpu.core_type<tc>, window_params = [{transform_indices = @transform_0, window_bounds = array<i64: 8, 8, 128>}, {pipeline_mode = #tpu.pipeline_mode<synchronous>, transform_indices = @transform_1, window_bounds = array<i64: 128, 512>}, {pipeline_mode = #tpu.pipeline_mode<synchronous>, transform_indices = @transform_2, window_bounds = array<i64: 128, 512>}, {pipeline_mode = #tpu.pipeline_mode<synchronous>, transform_indices = @transform_3, window_bounds = array<i64: 1, 512>}, {pipeline_mode = #tpu.pipeline_mode<synchronous>, transform_indices = @transform_4, window_bounds = array<i64: 128, 512>}, {pipeline_mode = #tpu.pipeline_mode<synchronous>, transform_indices = @transform_5, window_bounds = array<i64: 128, 512>}, {pipeline_mode = #tpu.pipeline_mode<synchronous>, transform_indices = @transform_6, window_bounds = array<i64: 1, 512>}, {pipeline_mode = #tpu.pipeline_mode<synchronous>, transform_indices = @transform_7, window_bounds = array<i64: 128, 128>}, {pipeline_mode = #tpu.pipeline_mode<synchronous>, transform_indices = @transform_8, window_bounds = array<i64: 1, 128>}, {transform_indices = @transform_9, window_bounds = array<i64: 8, 8, 128>}]} {
    %c0 = arith.constant 0 : index
    %c0_0 = arith.constant 0 : index
    %c0_1 = arith.constant 0 : index
    %0 = vector.load %arg1[%c0, %c0_0, %c0_1] : memref<8x8x128xf32, #tpu.memory_space<vmem>>, vector<8x8x128xf32>
    %1 = vector.shape_cast %0 : vector<8x8x128xf32> to vector<64x128xf32>
    %2 = arith.truncf %1 : vector<64x128xf32> to vector<64x128xbf16>
    %c0_2 = arith.constant 0 : index
    %c0_3 = arith.constant 0 : index
    %3 = vector.load %arg2[%c0_2, %c0_3] : memref<128x512xbf16, #tpu.memory_space<vmem>>, vector<128x512xbf16>
    %cst = arith.constant dense<0.000000e+00> : vector<64x512xf32>
    %4 = tpu.matmul %2, %3, %cst {dimension_numbers = #tpu.dot_dimension_numbers<[1], [0], [0], [1], [0, 0, 1, 1], [], []>} : vector<64x128xbf16>, vector<128x512xbf16>, vector<64x512xf32> -> vector<64x512xf32>
    %c0_4 = arith.constant 0 : index
    %c0_5 = arith.constant 0 : index
    %5 = vector.load %arg4[%c0_4, %c0_5] : memref<1x512xf32, #tpu.memory_space<vmem>>, vector<1x512xf32>
    %6 = vector.broadcast %5 : vector<1x512xf32> to vector<64x512xf32>
    %7 = arith.addf %4, %6 : vector<64x512xf32>
    %8 = vector.shape_cast %7 : vector<64x512xf32> to vector<8x8x512xf32>
    %c0_6 = arith.constant 0 : index
    %c0_7 = arith.constant 0 : index
    %c0_8 = arith.constant 0 : index
    %9 = vector.load %arg11[%c0_6, %c0_7, %c0_8] : memref<8x8x512xf32, #tpu.memory_space<vmem>>, vector<8x8x512xf32>
    tpu.vector_store %arg11[%c0_6, %c0_7, %c0_8], %8 {strides = array<i32>} : memref<8x8x512xf32, #tpu.memory_space<vmem>>, vector<8x8x512xf32>,
    %cst_9 = arith.constant 0.000000e+00 : f32
    %10 = vector.broadcast %cst_9 : f32 to vector<8x128xf32>
    %c0_10 = arith.constant 0 : index
    %c0_11 = arith.constant 0 : index
    %11 = vector.load %arg13[%c0_10, %c0_11] : memref<8x128xf32, #tpu.memory_space<vmem>>, vector<8x128xf32>
    tpu.vector_store %arg13[%c0_10, %c0_11], %10 {strides = array<i32>} : memref<8x128xf32, #tpu.memory_space<vmem>>, vector<8x128xf32>,
    %cst_12 = arith.constant 0.000000e+00 : f32
    %12 = vector.broadcast %cst_12 : f32 to vector<8x128xf32>
    %c0_13 = arith.constant 0 : index
    %c0_14 = arith.constant 0 : index
    %13 = vector.load %arg14[%c0_13, %c0_14] : memref<8x128xf32, #tpu.memory_space<vmem>>, vector<8x128xf32>
    tpu.vector_store %arg14[%c0_13, %c0_14], %12 {strides = array<i32>} : memref<8x128xf32, #tpu.memory_space<vmem>>, vector<8x128xf32>,
    %c0_i32 = arith.constant 0 : i32
    %c0_15 = arith.constant 0 : index
    %c0_16 = arith.constant 0 : index
    %14 = vector.load %arg13[%c0_15, %c0_16] : memref<8x128xf32, #tpu.memory_space<vmem>>, vector<8x128xf32>
    %15 = arith.index_cast %c0_i32 : i32 to index
    %c0_17 = arith.constant 0 : index
    %c0_18 = arith.constant 0 : index
    %16 = vector.load %arg11[%15, %c0_17, %c0_18] : memref<8x8x512xf32, #tpu.memory_space<vmem>>, vector<1x8x512xf32>
    %17 = vector.shape_cast %16 : vector<1x8x512xf32> to vector<8x512xf32>
    %18 = arith.truncf %14 : vector<8x128xf32> to vector<8x128xbf16>
    %c0_19 = arith.constant 0 : index
    %c0_20 = arith.constant 0 : index
    %19 = vector.load %arg3[%c0_19, %c0_20] : memref<128x512xbf16, #tpu.memory_space<vmem>>, vector<128x512xbf16>
    %cst_21 = arith.constant dense<0.000000e+00> : vector<8x512xf32>
    %20 = tpu.matmul %18, %19, %cst_21 {dimension_numbers = #tpu.dot_dimension_numbers<[1], [0], [0], [1], [0, 0, 1, 1], [], []>} : vector<8x128xbf16>, vector<128x512xbf16>, vector<8x512xf32> -> vector<8x512xf32>
    %21 = arith.addf %17, %20 : vector<8x512xf32>
    %22 = vector.extract_strided_slice %21 {offsets = [0, 0], sizes = [8, 128], strides = [1, 1]} : vector<8x512xf32> to vector<8x128xf32>
    %23 = arith.negf %22 : vector<8x128xf32>
    %24 = math.exp %23 : vector<8x128xf32>
    %cst_22 = arith.constant 1.000000e+00 : f32
    %25 = vector.broadcast %cst_22 : f32 to vector<8x128xf32>
    %26 = arith.addf %25, %24 : vector<8x128xf32>
    %27 = arith.divf %25, %26 : vector<8x128xf32>
    %28 = vector.extract_strided_slice %21 {offsets = [0, 128], sizes = [8, 128], strides = [1, 1]} : vector<8x512xf32> to vector<8x128xf32>
    %29 = arith.negf %28 : vector<8x128xf32>
    %30 = math.exp %29 : vector<8x128xf32>
    %cst_23 = arith.constant 1.000000e+00 : f32
    %31 = vector.broadcast %cst_23 : f32 to vector<8x128xf32>
    %32 = arith.addf %31, %30 : vector<8x128xf32>
    %33 = arith.divf %31, %32 : vector<8x128xf32>
    %34 = vector.extract_strided_slice %21 {offsets = [0, 256], sizes = [8, 128], strides = [1, 1]} : vector<8x512xf32> to vector<8x128xf32>
    %35 = math.tanh %34 : vector<8x128xf32>
    %36 = vector.extract_strided_slice %21 {offsets = [0, 384], sizes = [8, 128], strides = [1, 1]} : vector<8x512xf32> to vector<8x128xf32>
    %37 = arith.negf %36 : vector<8x128xf32>
    %38 = math.exp %37 : vector<8x128xf32>
    %cst_24 = arith.constant 1.000000e+00 : f32
    %39 = vector.broadcast %cst_24 : f32 to vector<8x128xf32>
    %40 = arith.addf %39, %38 : vector<8x128xf32>
    %41 = arith.divf %39, %40 : vector<8x128xf32>
    %c0_25 = arith.constant 0 : index
    %c0_26 = arith.constant 0 : index
    %42 = vector.load %arg14[%c0_25, %c0_26] : memref<8x128xf32, #tpu.memory_space<vmem>>, vector<8x128xf32>
    %43 = arith.mulf %33, %42 : vector<8x128xf32>
    %44 = arith.mulf %27, %35 : vector<8x128xf32>
    %45 = arith.addf %43, %44 : vector<8x128xf32>
    %46 = math.tanh %45 : vector<8x128xf32>
    %47 = arith.mulf %41, %46 : vector<8x128xf32>
    %c0_27 = arith.constant 0 : index
    %c0_28 = arith.constant 0 : index
    %48 = vector.load %arg14[%c0_27, %c0_28] : memref<8x128xf32, #tpu.memory_space<vmem>>, vector<8x128xf32>
    tpu.vector_store %arg14[%c0_27, %c0_28], %45 {strides = array<i32>} : memref<8x128xf32, #tpu.memory_space<vmem>>, vector<8x128xf32>,
    %c0_29 = arith.constant 0 : index
    %c0_30 = arith.constant 0 : index
    %49 = vector.load %arg13[%c0_29, %c0_30] : memref<8x128xf32, #tpu.memory_space<vmem>>, vector<8x128xf32>
    tpu.vector_store %arg13[%c0_29, %c0_30], %47 {strides = array<i32>} : memref<8x128xf32, #tpu.memory_space<vmem>>, vector<8x128xf32>,
    %50 = arith.index_cast %c0_i32 : i32 to index
    %c0_31 = arith.constant 0 : index
    %c0_32 = arith.constant 0 : index
    %51 = vector.load %arg12[%50, %c0_31, %c0_32] : memref<8x8x128xf32, #tpu.memory_space<vmem>>, vector<1x8x128xf32>
    %52 = vector.shape_cast %51 : vector<1x8x128xf32> to vector<8x128xf32>
    %53 = vector.shape_cast %47 : vector<8x128xf32> to vector<1x8x128xf32>
    tpu.vector_store %arg12[%50, %c0_31, %c0_32], %53 {strides = array<i32>} : memref<8x8x128xf32, #tpu.memory_space<vmem>>, vector<1x8x128xf32>,
    %c1_i32 = arith.constant 1 : i32
    %c0_33 = arith.constant 0 : index
    %c0_34 = arith.constant 0 : index
    %54 = vector.load %arg13[%c0_33, %c0_34] : memref<8x128xf32, #tpu.memory_space<vmem>>, vector<8x128xf32>
    %55 = arith.index_cast %c1_i32 : i32 to index
    %c0_35 = arith.constant 0 : index
    %c0_36 = arith.constant 0 : index
    %56 = vector.load %arg11[%55, %c0_35, %c0_36] : memref<8x8x512xf32, #tpu.memory_space<vmem>>, vector<1x8x512xf32>
    %57 = vector.shape_cast %56 : vector<1x8x512xf32> to vector<8x512xf32>
    %58 = arith.truncf %54 : vector<8x128xf32> to vector<8x128xbf16>
    %c0_37 = arith.constant 0 : index
    %c0_38 = arith.constant 0 : index
    %59 = vector.load %arg3[%c0_37, %c0_38] : memref<128x512xbf16, #tpu.memory_space<vmem>>, vector<128x512xbf16>
    %cst_39 = arith.constant dense<0.000000e+00> : vector<8x512xf32>
    %60 = tpu.matmul %58, %59, %cst_39 {dimension_numbers = #tpu.dot_dimension_numbers<[1], [0], [0], [1], [0, 0, 1, 1], [], []>} : vector<8x128xbf16>, vector<128x512xbf16>, vector<8x512xf32> -> vector<8x512xf32>
    %61 = arith.addf %57, %60 : vector<8x512xf32>
    %62 = vector.extract_strided_slice %61 {offsets = [0, 0], sizes = [8, 128], strides = [1, 1]} : vector<8x512xf32> to vector<8x128xf32>
    %63 = arith.negf %62 : vector<8x128xf32>
    %64 = math.exp %63 : vector<8x128xf32>
    %cst_40 = arith.constant 1.000000e+00 : f32
    %65 = vector.broadcast %cst_40 : f32 to vector<8x128xf32>
    %66 = arith.addf %65, %64 : vector<8x128xf32>
    %67 = arith.divf %65, %66 : vector<8x128xf32>
    %68 = vector.extract_strided_slice %61 {offsets = [0, 128], sizes = [8, 128], strides = [1, 1]} : vector<8x512xf32> to vector<8x128xf32>
    %69 = arith.negf %68 : vector<8x128xf32>
    %70 = math.exp %69 : vector<8x128xf32>
    %cst_41 = arith.constant 1.000000e+00 : f32
    %71 = vector.broadcast %cst_41 : f32 to vector<8x128xf32>
    %72 = arith.addf %71, %70 : vector<8x128xf32>
    %73 = arith.divf %71, %72 : vector<8x128xf32>
    %74 = vector.extract_strided_slice %61 {offsets = [0, 256], sizes = [8, 128], strides = [1, 1]} : vector<8x512xf32> to vector<8x128xf32>
    %75 = math.tanh %74 : vector<8x128xf32>
    %76 = vector.extract_strided_slice %61 {offsets = [0, 384], sizes = [8, 128], strides = [1, 1]} : vector<8x512xf32> to vector<8x128xf32>
    %77 = arith.negf %76 : vector<8x128xf32>
    %78 = math.exp %77 : vector<8x128xf32>
    %cst_42 = arith.constant 1.000000e+00 : f32
    %79 = vector.broadcast %cst_42 : f32 to vector<8x128xf32>
    %80 = arith.addf %79, %78 : vector<8x128xf32>
    %81 = arith.divf %79, %80 : vector<8x128xf32>
    %c0_43 = arith.constant 0 : index
    %c0_44 = arith.constant 0 : index
    %82 = vector.load %arg14[%c0_43, %c0_44] : memref<8x128xf32, #tpu.memory_space<vmem>>, vector<8x128xf32>
    %83 = arith.mulf %73, %82 : vector<8x128xf32>
    %84 = arith.mulf %67, %75 : vector<8x128xf32>
    %85 = arith.addf %83, %84 : vector<8x128xf32>
    %86 = math.tanh %85 : vector<8x128xf32>
    %87 = arith.mulf %81, %86 : vector<8x128xf32>
    %c0_45 = arith.constant 0 : index
    %c0_46 = arith.constant 0 : index
    %88 = vector.load %arg14[%c0_45, %c0_46] : memref<8x128xf32, #tpu.memory_space<vmem>>, vector<8x128xf32>
    tpu.vector_store %arg14[%c0_45, %c0_46], %85 {strides = array<i32>} : memref<8x128xf32, #tpu.memory_space<vmem>>, vector<8x128xf32>,
    %c0_47 = arith.constant 0 : index
    %c0_48 = arith.constant 0 : index
    %89 = vector.load %arg13[%c0_47, %c0_48] : memref<8x128xf32, #tpu.memory_space<vmem>>, vector<8x128xf32>
    tpu.vector_store %arg13[%c0_47, %c0_48], %87 {strides = array<i32>} : memref<8x128xf32, #tpu.memory_space<vmem>>, vector<8x128xf32>,
    %90 = arith.index_cast %c1_i32 : i32 to index
    %c0_49 = arith.constant 0 : index
    %c0_50 = arith.constant 0 : index
    %91 = vector.load %arg12[%90, %c0_49, %c0_50] : memref<8x8x128xf32, #tpu.memory_space<vmem>>, vector<1x8x128xf32>
    %92 = vector.shape_cast %91 : vector<1x8x128xf32> to vector<8x128xf32>
    %93 = vector.shape_cast %87 : vector<8x128xf32> to vector<1x8x128xf32>
    tpu.vector_store %arg12[%90, %c0_49, %c0_50], %93 {strides = array<i32>} : memref<8x8x128xf32, #tpu.memory_space<vmem>>, vector<1x8x128xf32>,
    %c2_i32 = arith.constant 2 : i32
    %c0_51 = arith.constant 0 : index
    %c0_52 = arith.constant 0 : index
    %94 = vector.load %arg13[%c0_51, %c0_52] : memref<8x128xf32, #tpu.memory_space<vmem>>, vector<8x128xf32>
    %95 = arith.index_cast %c2_i32 : i32 to index
    %c0_53 = arith.constant 0 : index
    %c0_54 = arith.constant 0 : index
    %96 = vector.load %arg11[%95, %c0_53, %c0_54] : memref<8x8x512xf32, #tpu.memory_space<vmem>>, vector<1x8x512xf32>
    %97 = vector.shape_cast %96 : vector<1x8x512xf32> to vector<8x512xf32>
    %98 = arith.truncf %94 : vector<8x128xf32> to vector<8x128xbf16>
    %c0_55 = arith.constant 0 : index
    %c0_56 = arith.constant 0 : index
    %99 = vector.load %arg3[%c0_55, %c0_56] : memref<128x512xbf16, #tpu.memory_space<vmem>>, vector<128x512xbf16>
    %cst_57 = arith.constant dense<0.000000e+00> : vector<8x512xf32>
    %100 = tpu.matmul %98, %99, %cst_57 {dimension_numbers = #tpu.dot_dimension_numbers<[1], [0], [0], [1], [0, 0, 1, 1], [], []>} : vector<8x128xbf16>, vector<128x512xbf16>, vector<8x512xf32> -> vector<8x512xf32>
    %101 = arith.addf %97, %100 : vector<8x512xf32>
    %102 = vector.extract_strided_slice %101 {offsets = [0, 0], sizes = [8, 128], strides = [1, 1]} : vector<8x512xf32> to vector<8x128xf32>
    %103 = arith.negf %102 : vector<8x128xf32>
    %104 = math.exp %103 : vector<8x128xf32>
    %cst_58 = arith.constant 1.000000e+00 : f32
    %105 = vector.broadcast %cst_58 : f32 to vector<8x128xf32>
    %106 = arith.addf %105, %104 : vector<8x128xf32>
    %107 = arith.divf %105, %106 : vector<8x128xf32>
    %108 = vector.extract_strided_slice %101 {offsets = [0, 128], sizes = [8, 128], strides = [1, 1]} : vector<8x512xf32> to vector<8x128xf32>
    %109 = arith.negf %108 : vector<8x128xf32>
    %110 = math.exp %109 : vector<8x128xf32>
    %cst_59 = arith.constant 1.000000e+00 : f32
    %111 = vector.broadcast %cst_59 : f32 to vector<8x128xf32>
    %112 = arith.addf %111, %110 : vector<8x128xf32>
    %113 = arith.divf %111, %112 : vector<8x128xf32>
    %114 = vector.extract_strided_slice %101 {offsets = [0, 256], sizes = [8, 128], strides = [1, 1]} : vector<8x512xf32> to vector<8x128xf32>
    %115 = math.tanh %114 : vector<8x128xf32>
    %116 = vector.extract_strided_slice %101 {offsets = [0, 384], sizes = [8, 128], strides = [1, 1]} : vector<8x512xf32> to vector<8x128xf32>
    %117 = arith.negf %116 : vector<8x128xf32>
    %118 = math.exp %117 : vector<8x128xf32>
    %cst_60 = arith.constant 1.000000e+00 : f32
    %119 = vector.broadcast %cst_60 : f32 to vector<8x128xf32>
    %120 = arith.addf %119, %118 : vector<8x128xf32>
    %121 = arith.divf %119, %120 : vector<8x128xf32>
    %c0_61 = arith.constant 0 : index
    %c0_62 = arith.constant 0 : index
    %122 = vector.load %arg14[%c0_61, %c0_62] : memref<8x128xf32, #tpu.memory_space<vmem>>, vector<8x128xf32>
    %123 = arith.mulf %113, %122 : vector<8x128xf32>
    %124 = arith.mulf %107, %115 : vector<8x128xf32>
    %125 = arith.addf %123, %124 : vector<8x128xf32>
    %126 = math.tanh %125 : vector<8x128xf32>
    %127 = arith.mulf %121, %126 : vector<8x128xf32>
    %c0_63 = arith.constant 0 : index
    %c0_64 = arith.constant 0 : index
    %128 = vector.load %arg14[%c0_63, %c0_64] : memref<8x128xf32, #tpu.memory_space<vmem>>, vector<8x128xf32>
    tpu.vector_store %arg14[%c0_63, %c0_64], %125 {strides = array<i32>} : memref<8x128xf32, #tpu.memory_space<vmem>>, vector<8x128xf32>,
    %c0_65 = arith.constant 0 : index
    %c0_66 = arith.constant 0 : index
    %129 = vector.load %arg13[%c0_65, %c0_66] : memref<8x128xf32, #tpu.memory_space<vmem>>, vector<8x128xf32>
    tpu.vector_store %arg13[%c0_65, %c0_66], %127 {strides = array<i32>} : memref<8x128xf32, #tpu.memory_space<vmem>>, vector<8x128xf32>,
    %130 = arith.index_cast %c2_i32 : i32 to index
    %c0_67 = arith.constant 0 : index
    %c0_68 = arith.constant 0 : index
    %131 = vector.load %arg12[%130, %c0_67, %c0_68] : memref<8x8x128xf32, #tpu.memory_space<vmem>>, vector<1x8x128xf32>
    %132 = vector.shape_cast %131 : vector<1x8x128xf32> to vector<8x128xf32>
    %133 = vector.shape_cast %127 : vector<8x128xf32> to vector<1x8x128xf32>
    tpu.vector_store %arg12[%130, %c0_67, %c0_68], %133 {strides = array<i32>} : memref<8x8x128xf32, #tpu.memory_space<vmem>>, vector<1x8x128xf32>,
    %c3_i32 = arith.constant 3 : i32
    %c0_69 = arith.constant 0 : index
    %c0_70 = arith.constant 0 : index
    %134 = vector.load %arg13[%c0_69, %c0_70] : memref<8x128xf32, #tpu.memory_space<vmem>>, vector<8x128xf32>
    %135 = arith.index_cast %c3_i32 : i32 to index
    %c0_71 = arith.constant 0 : index
    %c0_72 = arith.constant 0 : index
    %136 = vector.load %arg11[%135, %c0_71, %c0_72] : memref<8x8x512xf32, #tpu.memory_space<vmem>>, vector<1x8x512xf32>
    %137 = vector.shape_cast %136 : vector<1x8x512xf32> to vector<8x512xf32>
    %138 = arith.truncf %134 : vector<8x128xf32> to vector<8x128xbf16>
    %c0_73 = arith.constant 0 : index
    %c0_74 = arith.constant 0 : index
    %139 = vector.load %arg3[%c0_73, %c0_74] : memref<128x512xbf16, #tpu.memory_space<vmem>>, vector<128x512xbf16>
    %cst_75 = arith.constant dense<0.000000e+00> : vector<8x512xf32>
    %140 = tpu.matmul %138, %139, %cst_75 {dimension_numbers = #tpu.dot_dimension_numbers<[1], [0], [0], [1], [0, 0, 1, 1], [], []>} : vector<8x128xbf16>, vector<128x512xbf16>, vector<8x512xf32> -> vector<8x512xf32>
    %141 = arith.addf %137, %140 : vector<8x512xf32>
    %142 = vector.extract_strided_slice %141 {offsets = [0, 0], sizes = [8, 128], strides = [1, 1]} : vector<8x512xf32> to vector<8x128xf32>
    %143 = arith.negf %142 : vector<8x128xf32>
    %144 = math.exp %143 : vector<8x128xf32>
    %cst_76 = arith.constant 1.000000e+00 : f32
    %145 = vector.broadcast %cst_76 : f32 to vector<8x128xf32>
    %146 = arith.addf %145, %144 : vector<8x128xf32>
    %147 = arith.divf %145, %146 : vector<8x128xf32>
    %148 = vector.extract_strided_slice %141 {offsets = [0, 128], sizes = [8, 128], strides = [1, 1]} : vector<8x512xf32> to vector<8x128xf32>
    %149 = arith.negf %148 : vector<8x128xf32>
    %150 = math.exp %149 : vector<8x128xf32>
    %cst_77 = arith.constant 1.000000e+00 : f32
    %151 = vector.broadcast %cst_77 : f32 to vector<8x128xf32>
    %152 = arith.addf %151, %150 : vector<8x128xf32>
    %153 = arith.divf %151, %152 : vector<8x128xf32>
    %154 = vector.extract_strided_slice %141 {offsets = [0, 256], sizes = [8, 128], strides = [1, 1]} : vector<8x512xf32> to vector<8x128xf32>
    %155 = math.tanh %154 : vector<8x128xf32>
    %156 = vector.extract_strided_slice %141 {offsets = [0, 384], sizes = [8, 128], strides = [1, 1]} : vector<8x512xf32> to vector<8x128xf32>
    %157 = arith.negf %156 : vector<8x128xf32>
    %158 = math.exp %157 : vector<8x128xf32>
    %cst_78 = arith.constant 1.000000e+00 : f32
    %159 = vector.broadcast %cst_78 : f32 to vector<8x128xf32>
    %160 = arith.addf %159, %158 : vector<8x128xf32>
    %161 = arith.divf %159, %160 : vector<8x128xf32>
    %c0_79 = arith.constant 0 : index
    %c0_80 = arith.constant 0 : index
    %162 = vector.load %arg14[%c0_79, %c0_80] : memref<8x128xf32, #tpu.memory_space<vmem>>, vector<8x128xf32>
    %163 = arith.mulf %153, %162 : vector<8x128xf32>
    %164 = arith.mulf %147, %155 : vector<8x128xf32>
    %165 = arith.addf %163, %164 : vector<8x128xf32>
    %166 = math.tanh %165 : vector<8x128xf32>
    %167 = arith.mulf %161, %166 : vector<8x128xf32>
    %c0_81 = arith.constant 0 : index
    %c0_82 = arith.constant 0 : index
    %168 = vector.load %arg14[%c0_81, %c0_82] : memref<8x128xf32, #tpu.memory_space<vmem>>, vector<8x128xf32>
    tpu.vector_store %arg14[%c0_81, %c0_82], %165 {strides = array<i32>} : memref<8x128xf32, #tpu.memory_space<vmem>>, vector<8x128xf32>,
    %c0_83 = arith.constant 0 : index
    %c0_84 = arith.constant 0 : index
    %169 = vector.load %arg13[%c0_83, %c0_84] : memref<8x128xf32, #tpu.memory_space<vmem>>, vector<8x128xf32>
    tpu.vector_store %arg13[%c0_83, %c0_84], %167 {strides = array<i32>} : memref<8x128xf32, #tpu.memory_space<vmem>>, vector<8x128xf32>,
    %170 = arith.index_cast %c3_i32 : i32 to index
    %c0_85 = arith.constant 0 : index
    %c0_86 = arith.constant 0 : index
    %171 = vector.load %arg12[%170, %c0_85, %c0_86] : memref<8x8x128xf32, #tpu.memory_space<vmem>>, vector<1x8x128xf32>
    %172 = vector.shape_cast %171 : vector<1x8x128xf32> to vector<8x128xf32>
    %173 = vector.shape_cast %167 : vector<8x128xf32> to vector<1x8x128xf32>
    tpu.vector_store %arg12[%170, %c0_85, %c0_86], %173 {strides = array<i32>} : memref<8x8x128xf32, #tpu.memory_space<vmem>>, vector<1x8x128xf32>,
    %c4_i32 = arith.constant 4 : i32
    %c0_87 = arith.constant 0 : index
    %c0_88 = arith.constant 0 : index
    %174 = vector.load %arg13[%c0_87, %c0_88] : memref<8x128xf32, #tpu.memory_space<vmem>>, vector<8x128xf32>
    %175 = arith.index_cast %c4_i32 : i32 to index
    %c0_89 = arith.constant 0 : index
    %c0_90 = arith.constant 0 : index
    %176 = vector.load %arg11[%175, %c0_89, %c0_90] : memref<8x8x512xf32, #tpu.memory_space<vmem>>, vector<1x8x512xf32>
    %177 = vector.shape_cast %176 : vector<1x8x512xf32> to vector<8x512xf32>
    %178 = arith.truncf %174 : vector<8x128xf32> to vector<8x128xbf16>
    %c0_91 = arith.constant 0 : index
    %c0_92 = arith.constant 0 : index
    %179 = vector.load %arg3[%c0_91, %c0_92] : memref<128x512xbf16, #tpu.memory_space<vmem>>, vector<128x512xbf16>
    %cst_93 = arith.constant dense<0.000000e+00> : vector<8x512xf32>
    %180 = tpu.matmul %178, %179, %cst_93 {dimension_numbers = #tpu.dot_dimension_numbers<[1], [0], [0], [1], [0, 0, 1, 1], [], []>} : vector<8x128xbf16>, vector<128x512xbf16>, vector<8x512xf32> -> vector<8x512xf32>
    %181 = arith.addf %177, %180 : vector<8x512xf32>
    %182 = vector.extract_strided_slice %181 {offsets = [0, 0], sizes = [8, 128], strides = [1, 1]} : vector<8x512xf32> to vector<8x128xf32>
    %183 = arith.negf %182 : vector<8x128xf32>
    %184 = math.exp %183 : vector<8x128xf32>
    %cst_94 = arith.constant 1.000000e+00 : f32
    %185 = vector.broadcast %cst_94 : f32 to vector<8x128xf32>
    %186 = arith.addf %185, %184 : vector<8x128xf32>
    %187 = arith.divf %185, %186 : vector<8x128xf32>
    %188 = vector.extract_strided_slice %181 {offsets = [0, 128], sizes = [8, 128], strides = [1, 1]} : vector<8x512xf32> to vector<8x128xf32>
    %189 = arith.negf %188 : vector<8x128xf32>
    %190 = math.exp %189 : vector<8x128xf32>
    %cst_95 = arith.constant 1.000000e+00 : f32
    %191 = vector.broadcast %cst_95 : f32 to vector<8x128xf32>
    %192 = arith.addf %191, %190 : vector<8x128xf32>
    %193 = arith.divf %191, %192 : vector<8x128xf32>
    %194 = vector.extract_strided_slice %181 {offsets = [0, 256], sizes = [8, 128], strides = [1, 1]} : vector<8x512xf32> to vector<8x128xf32>
    %195 = math.tanh %194 : vector<8x128xf32>
    %196 = vector.extract_strided_slice %181 {offsets = [0, 384], sizes = [8, 128], strides = [1, 1]} : vector<8x512xf32> to vector<8x128xf32>
    %197 = arith.negf %196 : vector<8x128xf32>
    %198 = math.exp %197 : vector<8x128xf32>
    %cst_96 = arith.constant 1.000000e+00 : f32
    %199 = vector.broadcast %cst_96 : f32 to vector<8x128xf32>
    %200 = arith.addf %199, %198 : vector<8x128xf32>
    %201 = arith.divf %199, %200 : vector<8x128xf32>
    %c0_97 = arith.constant 0 : index
    %c0_98 = arith.constant 0 : index
    %202 = vector.load %arg14[%c0_97, %c0_98] : memref<8x128xf32, #tpu.memory_space<vmem>>, vector<8x128xf32>
    %203 = arith.mulf %193, %202 : vector<8x128xf32>
    %204 = arith.mulf %187, %195 : vector<8x128xf32>
    %205 = arith.addf %203, %204 : vector<8x128xf32>
    %206 = math.tanh %205 : vector<8x128xf32>
    %207 = arith.mulf %201, %206 : vector<8x128xf32>
    %c0_99 = arith.constant 0 : index
    %c0_100 = arith.constant 0 : index
    %208 = vector.load %arg14[%c0_99, %c0_100] : memref<8x128xf32, #tpu.memory_space<vmem>>, vector<8x128xf32>
    tpu.vector_store %arg14[%c0_99, %c0_100], %205 {strides = array<i32>} : memref<8x128xf32, #tpu.memory_space<vmem>>, vector<8x128xf32>,
    %c0_101 = arith.constant 0 : index
    %c0_102 = arith.constant 0 : index
    %209 = vector.load %arg13[%c0_101, %c0_102] : memref<8x128xf32, #tpu.memory_space<vmem>>, vector<8x128xf32>
    tpu.vector_store %arg13[%c0_101, %c0_102], %207 {strides = array<i32>} : memref<8x128xf32, #tpu.memory_space<vmem>>, vector<8x128xf32>,
    %210 = arith.index_cast %c4_i32 : i32 to index
    %c0_103 = arith.constant 0 : index
    %c0_104 = arith.constant 0 : index
    %211 = vector.load %arg12[%210, %c0_103, %c0_104] : memref<8x8x128xf32, #tpu.memory_space<vmem>>, vector<1x8x128xf32>
    %212 = vector.shape_cast %211 : vector<1x8x128xf32> to vector<8x128xf32>
    %213 = vector.shape_cast %207 : vector<8x128xf32> to vector<1x8x128xf32>
    tpu.vector_store %arg12[%210, %c0_103, %c0_104], %213 {strides = array<i32>} : memref<8x8x128xf32, #tpu.memory_space<vmem>>, vector<1x8x128xf32>,
    %c5_i32 = arith.constant 5 : i32
    %c0_105 = arith.constant 0 : index
    %c0_106 = arith.constant 0 : index
    %214 = vector.load %arg13[%c0_105, %c0_106] : memref<8x128xf32, #tpu.memory_space<vmem>>, vector<8x128xf32>
    %215 = arith.index_cast %c5_i32 : i32 to index
    %c0_107 = arith.constant 0 : index
    %c0_108 = arith.constant 0 : index
    %216 = vector.load %arg11[%215, %c0_107, %c0_108] : memref<8x8x512xf32, #tpu.memory_space<vmem>>, vector<1x8x512xf32>
    %217 = vector.shape_cast %216 : vector<1x8x512xf32> to vector<8x512xf32>
    %218 = arith.truncf %214 : vector<8x128xf32> to vector<8x128xbf16>
    %c0_109 = arith.constant 0 : index
    %c0_110 = arith.constant 0 : index
    %219 = vector.load %arg3[%c0_109, %c0_110] : memref<128x512xbf16, #tpu.memory_space<vmem>>, vector<128x512xbf16>
    %cst_111 = arith.constant dense<0.000000e+00> : vector<8x512xf32>
    %220 = tpu.matmul %218, %219, %cst_111 {dimension_numbers = #tpu.dot_dimension_numbers<[1], [0], [0], [1], [0, 0, 1, 1], [], []>} : vector<8x128xbf16>, vector<128x512xbf16>, vector<8x512xf32> -> vector<8x512xf32>
    %221 = arith.addf %217, %220 : vector<8x512xf32>
    %222 = vector.extract_strided_slice %221 {offsets = [0, 0], sizes = [8, 128], strides = [1, 1]} : vector<8x512xf32> to vector<8x128xf32>
    %223 = arith.negf %222 : vector<8x128xf32>
    %224 = math.exp %223 : vector<8x128xf32>
    %cst_112 = arith.constant 1.000000e+00 : f32
    %225 = vector.broadcast %cst_112 : f32 to vector<8x128xf32>
    %226 = arith.addf %225, %224 : vector<8x128xf32>
    %227 = arith.divf %225, %226 : vector<8x128xf32>
    %228 = vector.extract_strided_slice %221 {offsets = [0, 128], sizes = [8, 128], strides = [1, 1]} : vector<8x512xf32> to vector<8x128xf32>
    %229 = arith.negf %228 : vector<8x128xf32>
    %230 = math.exp %229 : vector<8x128xf32>
    %cst_113 = arith.constant 1.000000e+00 : f32
    %231 = vector.broadcast %cst_113 : f32 to vector<8x128xf32>
    %232 = arith.addf %231, %230 : vector<8x128xf32>
    %233 = arith.divf %231, %232 : vector<8x128xf32>
    %234 = vector.extract_strided_slice %221 {offsets = [0, 256], sizes = [8, 128], strides = [1, 1]} : vector<8x512xf32> to vector<8x128xf32>
    %235 = math.tanh %234 : vector<8x128xf32>
    %236 = vector.extract_strided_slice %221 {offsets = [0, 384], sizes = [8, 128], strides = [1, 1]} : vector<8x512xf32> to vector<8x128xf32>
    %237 = arith.negf %236 : vector<8x128xf32>
    %238 = math.exp %237 : vector<8x128xf32>
    %cst_114 = arith.constant 1.000000e+00 : f32
    %239 = vector.broadcast %cst_114 : f32 to vector<8x128xf32>
    %240 = arith.addf %239, %238 : vector<8x128xf32>
    %241 = arith.divf %239, %240 : vector<8x128xf32>
    %c0_115 = arith.constant 0 : index
    %c0_116 = arith.constant 0 : index
    %242 = vector.load %arg14[%c0_115, %c0_116] : memref<8x128xf32, #tpu.memory_space<vmem>>, vector<8x128xf32>
    %243 = arith.mulf %233, %242 : vector<8x128xf32>
    %244 = arith.mulf %227, %235 : vector<8x128xf32>
    %245 = arith.addf %243, %244 : vector<8x128xf32>
    %246 = math.tanh %245 : vector<8x128xf32>
    %247 = arith.mulf %241, %246 : vector<8x128xf32>
    %c0_117 = arith.constant 0 : index
    %c0_118 = arith.constant 0 : index
    %248 = vector.load %arg14[%c0_117, %c0_118] : memref<8x128xf32, #tpu.memory_space<vmem>>, vector<8x128xf32>
    tpu.vector_store %arg14[%c0_117, %c0_118], %245 {strides = array<i32>} : memref<8x128xf32, #tpu.memory_space<vmem>>, vector<8x128xf32>,
    %c0_119 = arith.constant 0 : index
    %c0_120 = arith.constant 0 : index
    %249 = vector.load %arg13[%c0_119, %c0_120] : memref<8x128xf32, #tpu.memory_space<vmem>>, vector<8x128xf32>
    tpu.vector_store %arg13[%c0_119, %c0_120], %247 {strides = array<i32>} : memref<8x128xf32, #tpu.memory_space<vmem>>, vector<8x128xf32>,
    %250 = arith.index_cast %c5_i32 : i32 to index
    %c0_121 = arith.constant 0 : index
    %c0_122 = arith.constant 0 : index
    %251 = vector.load %arg12[%250, %c0_121, %c0_122] : memref<8x8x128xf32, #tpu.memory_space<vmem>>, vector<1x8x128xf32>
    %252 = vector.shape_cast %251 : vector<1x8x128xf32> to vector<8x128xf32>
    %253 = vector.shape_cast %247 : vector<8x128xf32> to vector<1x8x128xf32>
    tpu.vector_store %arg12[%250, %c0_121, %c0_122], %253 {strides = array<i32>} : memref<8x8x128xf32, #tpu.memory_space<vmem>>, vector<1x8x128xf32>,
    %c6_i32 = arith.constant 6 : i32
    %c0_123 = arith.constant 0 : index
    %c0_124 = arith.constant 0 : index
    %254 = vector.load %arg13[%c0_123, %c0_124] : memref<8x128xf32, #tpu.memory_space<vmem>>, vector<8x128xf32>
    %255 = arith.index_cast %c6_i32 : i32 to index
    %c0_125 = arith.constant 0 : index
    %c0_126 = arith.constant 0 : index
    %256 = vector.load %arg11[%255, %c0_125, %c0_126] : memref<8x8x512xf32, #tpu.memory_space<vmem>>, vector<1x8x512xf32>
    %257 = vector.shape_cast %256 : vector<1x8x512xf32> to vector<8x512xf32>
    %258 = arith.truncf %254 : vector<8x128xf32> to vector<8x128xbf16>
    %c0_127 = arith.constant 0 : index
    %c0_128 = arith.constant 0 : index
    %259 = vector.load %arg3[%c0_127, %c0_128] : memref<128x512xbf16, #tpu.memory_space<vmem>>, vector<128x512xbf16>
    %cst_129 = arith.constant dense<0.000000e+00> : vector<8x512xf32>
    %260 = tpu.matmul %258, %259, %cst_129 {dimension_numbers = #tpu.dot_dimension_numbers<[1], [0], [0], [1], [0, 0, 1, 1], [], []>} : vector<8x128xbf16>, vector<128x512xbf16>, vector<8x512xf32> -> vector<8x512xf32>
    %261 = arith.addf %257, %260 : vector<8x512xf32>
    %262 = vector.extract_strided_slice %261 {offsets = [0, 0], sizes = [8, 128], strides = [1, 1]} : vector<8x512xf32> to vector<8x128xf32>
    %263 = arith.negf %262 : vector<8x128xf32>
    %264 = math.exp %263 : vector<8x128xf32>
    %cst_130 = arith.constant 1.000000e+00 : f32
    %265 = vector.broadcast %cst_130 : f32 to vector<8x128xf32>
    %266 = arith.addf %265, %264 : vector<8x128xf32>
    %267 = arith.divf %265, %266 : vector<8x128xf32>
    %268 = vector.extract_strided_slice %261 {offsets = [0, 128], sizes = [8, 128], strides = [1, 1]} : vector<8x512xf32> to vector<8x128xf32>
    %269 = arith.negf %268 : vector<8x128xf32>
    %270 = math.exp %269 : vector<8x128xf32>
    %cst_131 = arith.constant 1.000000e+00 : f32
    %271 = vector.broadcast %cst_131 : f32 to vector<8x128xf32>
    %272 = arith.addf %271, %270 : vector<8x128xf32>
    %273 = arith.divf %271, %272 : vector<8x128xf32>
    %274 = vector.extract_strided_slice %261 {offsets = [0, 256], sizes = [8, 128], strides = [1, 1]} : vector<8x512xf32> to vector<8x128xf32>
    %275 = math.tanh %274 : vector<8x128xf32>
    %276 = vector.extract_strided_slice %261 {offsets = [0, 384], sizes = [8, 128], strides = [1, 1]} : vector<8x512xf32> to vector<8x128xf32>
    %277 = arith.negf %276 : vector<8x128xf32>
    %278 = math.exp %277 : vector<8x128xf32>
    %cst_132 = arith.constant 1.000000e+00 : f32
    %279 = vector.broadcast %cst_132 : f32 to vector<8x128xf32>
    %280 = arith.addf %279, %278 : vector<8x128xf32>
    %281 = arith.divf %279, %280 : vector<8x128xf32>
    %c0_133 = arith.constant 0 : index
    %c0_134 = arith.constant 0 : index
    %282 = vector.load %arg14[%c0_133, %c0_134] : memref<8x128xf32, #tpu.memory_space<vmem>>, vector<8x128xf32>
    %283 = arith.mulf %273, %282 : vector<8x128xf32>
    %284 = arith.mulf %267, %275 : vector<8x128xf32>
    %285 = arith.addf %283, %284 : vector<8x128xf32>
    %286 = math.tanh %285 : vector<8x128xf32>
    %287 = arith.mulf %281, %286 : vector<8x128xf32>
    %c0_135 = arith.constant 0 : index
    %c0_136 = arith.constant 0 : index
    %288 = vector.load %arg14[%c0_135, %c0_136] : memref<8x128xf32, #tpu.memory_space<vmem>>, vector<8x128xf32>
    tpu.vector_store %arg14[%c0_135, %c0_136], %285 {strides = array<i32>} : memref<8x128xf32, #tpu.memory_space<vmem>>, vector<8x128xf32>,
    %c0_137 = arith.constant 0 : index
    %c0_138 = arith.constant 0 : index
    %289 = vector.load %arg13[%c0_137, %c0_138] : memref<8x128xf32, #tpu.memory_space<vmem>>, vector<8x128xf32>
    tpu.vector_store %arg13[%c0_137, %c0_138], %287 {strides = array<i32>} : memref<8x128xf32, #tpu.memory_space<vmem>>, vector<8x128xf32>,
    %290 = arith.index_cast %c6_i32 : i32 to index
    %c0_139 = arith.constant 0 : index
    %c0_140 = arith.constant 0 : index
    %291 = vector.load %arg12[%290, %c0_139, %c0_140] : memref<8x8x128xf32, #tpu.memory_space<vmem>>, vector<1x8x128xf32>
    %292 = vector.shape_cast %291 : vector<1x8x128xf32> to vector<8x128xf32>
    %293 = vector.shape_cast %287 : vector<8x128xf32> to vector<1x8x128xf32>
    tpu.vector_store %arg12[%290, %c0_139, %c0_140], %293 {strides = array<i32>} : memref<8x8x128xf32, #tpu.memory_space<vmem>>, vector<1x8x128xf32>,
    %c7_i32 = arith.constant 7 : i32
    %c0_141 = arith.constant 0 : index
    %c0_142 = arith.constant 0 : index
    %294 = vector.load %arg13[%c0_141, %c0_142] : memref<8x128xf32, #tpu.memory_space<vmem>>, vector<8x128xf32>
    %295 = arith.index_cast %c7_i32 : i32 to index
    %c0_143 = arith.constant 0 : index
    %c0_144 = arith.constant 0 : index
    %296 = vector.load %arg11[%295, %c0_143, %c0_144] : memref<8x8x512xf32, #tpu.memory_space<vmem>>, vector<1x8x512xf32>
    %297 = vector.shape_cast %296 : vector<1x8x512xf32> to vector<8x512xf32>
    %298 = arith.truncf %294 : vector<8x128xf32> to vector<8x128xbf16>
    %c0_145 = arith.constant 0 : index
    %c0_146 = arith.constant 0 : index
    %299 = vector.load %arg3[%c0_145, %c0_146] : memref<128x512xbf16, #tpu.memory_space<vmem>>, vector<128x512xbf16>
    %cst_147 = arith.constant dense<0.000000e+00> : vector<8x512xf32>
    %300 = tpu.matmul %298, %299, %cst_147 {dimension_numbers = #tpu.dot_dimension_numbers<[1], [0], [0], [1], [0, 0, 1, 1], [], []>} : vector<8x128xbf16>, vector<128x512xbf16>, vector<8x512xf32> -> vector<8x512xf32>
    %301 = arith.addf %297, %300 : vector<8x512xf32>
    %302 = vector.extract_strided_slice %301 {offsets = [0, 0], sizes = [8, 128], strides = [1, 1]} : vector<8x512xf32> to vector<8x128xf32>
    %303 = arith.negf %302 : vector<8x128xf32>
    %304 = math.exp %303 : vector<8x128xf32>
    %cst_148 = arith.constant 1.000000e+00 : f32
    %305 = vector.broadcast %cst_148 : f32 to vector<8x128xf32>
    %306 = arith.addf %305, %304 : vector<8x128xf32>
    %307 = arith.divf %305, %306 : vector<8x128xf32>
    %308 = vector.extract_strided_slice %301 {offsets = [0, 128], sizes = [8, 128], strides = [1, 1]} : vector<8x512xf32> to vector<8x128xf32>
    %309 = arith.negf %308 : vector<8x128xf32>
    %310 = math.exp %309 : vector<8x128xf32>
    %cst_149 = arith.constant 1.000000e+00 : f32
    %311 = vector.broadcast %cst_149 : f32 to vector<8x128xf32>
    %312 = arith.addf %311, %310 : vector<8x128xf32>
    %313 = arith.divf %311, %312 : vector<8x128xf32>
    %314 = vector.extract_strided_slice %301 {offsets = [0, 256], sizes = [8, 128], strides = [1, 1]} : vector<8x512xf32> to vector<8x128xf32>
    %315 = math.tanh %314 : vector<8x128xf32>
    %316 = vector.extract_strided_slice %301 {offsets = [0, 384], sizes = [8, 128], strides = [1, 1]} : vector<8x512xf32> to vector<8x128xf32>
    %317 = arith.negf %316 : vector<8x128xf32>
    %318 = math.exp %317 : vector<8x128xf32>
    %cst_150 = arith.constant 1.000000e+00 : f32
    %319 = vector.broadcast %cst_150 : f32 to vector<8x128xf32>
    %320 = arith.addf %319, %318 : vector<8x128xf32>
    %321 = arith.divf %319, %320 : vector<8x128xf32>
    %c0_151 = arith.constant 0 : index
    %c0_152 = arith.constant 0 : index
    %322 = vector.load %arg14[%c0_151, %c0_152] : memref<8x128xf32, #tpu.memory_space<vmem>>, vector<8x128xf32>
    %323 = arith.mulf %313, %322 : vector<8x128xf32>
    %324 = arith.mulf %307, %315 : vector<8x128xf32>
    %325 = arith.addf %323, %324 : vector<8x128xf32>
    %326 = math.tanh %325 : vector<8x128xf32>
    %327 = arith.mulf %321, %326 : vector<8x128xf32>
    %c0_153 = arith.constant 0 : index
    %c0_154 = arith.constant 0 : index
    %328 = vector.load %arg14[%c0_153, %c0_154] : memref<8x128xf32, #tpu.memory_space<vmem>>, vector<8x128xf32>
    tpu.vector_store %arg14[%c0_153, %c0_154], %325 {strides = array<i32>} : memref<8x128xf32, #tpu.memory_space<vmem>>, vector<8x128xf32>,
    %c0_155 = arith.constant 0 : index
    %c0_156 = arith.constant 0 : index
    %329 = vector.load %arg13[%c0_155, %c0_156] : memref<8x128xf32, #tpu.memory_space<vmem>>, vector<8x128xf32>
    tpu.vector_store %arg13[%c0_155, %c0_156], %327 {strides = array<i32>} : memref<8x128xf32, #tpu.memory_space<vmem>>, vector<8x128xf32>,
    %330 = arith.index_cast %c7_i32 : i32 to index
    %c0_157 = arith.constant 0 : index
    %c0_158 = arith.constant 0 : index
    %331 = vector.load %arg12[%330, %c0_157, %c0_158] : memref<8x8x128xf32, #tpu.memory_space<vmem>>, vector<1x8x128xf32>
    %332 = vector.shape_cast %331 : vector<1x8x128xf32> to vector<8x128xf32>
    %333 = vector.shape_cast %327 : vector<8x128xf32> to vector<1x8x128xf32>
    tpu.vector_store %arg12[%330, %c0_157, %c0_158], %333 {strides = array<i32>} : memref<8x8x128xf32, #tpu.memory_space<vmem>>, vector<1x8x128xf32>,
    %c8_i32 = arith.constant 8 : i32
    %c0_159 = arith.constant 0 : index
    %c0_160 = arith.constant 0 : index
    %c0_161 = arith.constant 0 : index
    %334 = vector.load %arg12[%c0_159, %c0_160, %c0_161] : memref<8x8x128xf32, #tpu.memory_space<vmem>>, vector<8x8x128xf32>
    %335 = vector.shape_cast %334 : vector<8x8x128xf32> to vector<64x128xf32>
    %336 = arith.truncf %335 : vector<64x128xf32> to vector<64x128xbf16>
    %c0_162 = arith.constant 0 : index
    %c0_163 = arith.constant 0 : index
    %337 = vector.load %arg5[%c0_162, %c0_163] : memref<128x512xbf16, #tpu.memory_space<vmem>>, vector<128x512xbf16>
    %cst_164 = arith.constant dense<0.000000e+00> : vector<64x512xf32>
    %338 = tpu.matmul %336, %337, %cst_164 {dimension_numbers = #tpu.dot_dimension_numbers<[1], [0], [0], [1], [0, 0, 1, 1], [], []>} : vector<64x128xbf16>, vector<128x512xbf16>, vector<64x512xf32> -> vector<64x512xf32>
    %c0_165 = arith.constant 0 : index
    %c0_166 = arith.constant 0 : index
    %339 = vector.load %arg7[%c0_165, %c0_166] : memref<1x512xf32, #tpu.memory_space<vmem>>, vector<1x512xf32>
    %340 = vector.broadcast %339 : vector<1x512xf32> to vector<64x512xf32>
    %341 = arith.addf %338, %340 : vector<64x512xf32>
    %342 = vector.shape_cast %341 : vector<64x512xf32> to vector<8x8x512xf32>
    %c0_167 = arith.constant 0 : index
    %c0_168 = arith.constant 0 : index
    %c0_169 = arith.constant 0 : index
    %343 = vector.load %arg11[%c0_167, %c0_168, %c0_169] : memref<8x8x512xf32, #tpu.memory_space<vmem>>, vector<8x8x512xf32>
    tpu.vector_store %arg11[%c0_167, %c0_168, %c0_169], %342 {strides = array<i32>} : memref<8x8x512xf32, #tpu.memory_space<vmem>>, vector<8x8x512xf32>,
    %cst_170 = arith.constant 0.000000e+00 : f32
    %344 = vector.broadcast %cst_170 : f32 to vector<8x128xf32>
    %c0_171 = arith.constant 0 : index
    %c0_172 = arith.constant 0 : index
    %345 = vector.load %arg13[%c0_171, %c0_172] : memref<8x128xf32, #tpu.memory_space<vmem>>, vector<8x128xf32>
    tpu.vector_store %arg13[%c0_171, %c0_172], %344 {strides = array<i32>} : memref<8x128xf32, #tpu.memory_space<vmem>>, vector<8x128xf32>,
    %cst_173 = arith.constant 0.000000e+00 : f32
    %346 = vector.broadcast %cst_173 : f32 to vector<8x128xf32>
    %c0_174 = arith.constant 0 : index
    %c0_175 = arith.constant 0 : index
    %347 = vector.load %arg14[%c0_174, %c0_175] : memref<8x128xf32, #tpu.memory_space<vmem>>, vector<8x128xf32>
    tpu.vector_store %arg14[%c0_174, %c0_175], %346 {strides = array<i32>} : memref<8x128xf32, #tpu.memory_space<vmem>>, vector<8x128xf32>,
    %c0_i32_176 = arith.constant 0 : i32
    %c0_177 = arith.constant 0 : index
    %c0_178 = arith.constant 0 : index
    %348 = vector.load %arg13[%c0_177, %c0_178] : memref<8x128xf32, #tpu.memory_space<vmem>>, vector<8x128xf32>
    %349 = arith.index_cast %c0_i32_176 : i32 to index
    %c0_179 = arith.constant 0 : index
    %c0_180 = arith.constant 0 : index
    %350 = vector.load %arg11[%349, %c0_179, %c0_180] : memref<8x8x512xf32, #tpu.memory_space<vmem>>, vector<1x8x512xf32>
    %351 = vector.shape_cast %350 : vector<1x8x512xf32> to vector<8x512xf32>
    %352 = arith.truncf %348 : vector<8x128xf32> to vector<8x128xbf16>
    %c0_181 = arith.constant 0 : index
    %c0_182 = arith.constant 0 : index
    %353 = vector.load %arg6[%c0_181, %c0_182] : memref<128x512xbf16, #tpu.memory_space<vmem>>, vector<128x512xbf16>
    %cst_183 = arith.constant dense<0.000000e+00> : vector<8x512xf32>
    %354 = tpu.matmul %352, %353, %cst_183 {dimension_numbers = #tpu.dot_dimension_numbers<[1], [0], [0], [1], [0, 0, 1, 1], [], []>} : vector<8x128xbf16>, vector<128x512xbf16>, vector<8x512xf32> -> vector<8x512xf32>
    %355 = arith.addf %351, %354 : vector<8x512xf32>
    %356 = vector.extract_strided_slice %355 {offsets = [0, 0], sizes = [8, 128], strides = [1, 1]} : vector<8x512xf32> to vector<8x128xf32>
    %357 = arith.negf %356 : vector<8x128xf32>
    %358 = math.exp %357 : vector<8x128xf32>
    %cst_184 = arith.constant 1.000000e+00 : f32
    %359 = vector.broadcast %cst_184 : f32 to vector<8x128xf32>
    %360 = arith.addf %359, %358 : vector<8x128xf32>
    %361 = arith.divf %359, %360 : vector<8x128xf32>
    %362 = vector.extract_strided_slice %355 {offsets = [0, 128], sizes = [8, 128], strides = [1, 1]} : vector<8x512xf32> to vector<8x128xf32>
    %363 = arith.negf %362 : vector<8x128xf32>
    %364 = math.exp %363 : vector<8x128xf32>
    %cst_185 = arith.constant 1.000000e+00 : f32
    %365 = vector.broadcast %cst_185 : f32 to vector<8x128xf32>
    %366 = arith.addf %365, %364 : vector<8x128xf32>
    %367 = arith.divf %365, %366 : vector<8x128xf32>
    %368 = vector.extract_strided_slice %355 {offsets = [0, 256], sizes = [8, 128], strides = [1, 1]} : vector<8x512xf32> to vector<8x128xf32>
    %369 = math.tanh %368 : vector<8x128xf32>
    %370 = vector.extract_strided_slice %355 {offsets = [0, 384], sizes = [8, 128], strides = [1, 1]} : vector<8x512xf32> to vector<8x128xf32>
    %371 = arith.negf %370 : vector<8x128xf32>
    %372 = math.exp %371 : vector<8x128xf32>
    %cst_186 = arith.constant 1.000000e+00 : f32
    %373 = vector.broadcast %cst_186 : f32 to vector<8x128xf32>
    %374 = arith.addf %373, %372 : vector<8x128xf32>
    %375 = arith.divf %373, %374 : vector<8x128xf32>
    %c0_187 = arith.constant 0 : index
    %c0_188 = arith.constant 0 : index
    %376 = vector.load %arg14[%c0_187, %c0_188] : memref<8x128xf32, #tpu.memory_space<vmem>>, vector<8x128xf32>
    %377 = arith.mulf %367, %376 : vector<8x128xf32>
    %378 = arith.mulf %361, %369 : vector<8x128xf32>
    %379 = arith.addf %377, %378 : vector<8x128xf32>
    %380 = math.tanh %379 : vector<8x128xf32>
    %381 = arith.mulf %375, %380 : vector<8x128xf32>
    %c0_189 = arith.constant 0 : index
    %c0_190 = arith.constant 0 : index
    %382 = vector.load %arg14[%c0_189, %c0_190] : memref<8x128xf32, #tpu.memory_space<vmem>>, vector<8x128xf32>
    tpu.vector_store %arg14[%c0_189, %c0_190], %379 {strides = array<i32>} : memref<8x128xf32, #tpu.memory_space<vmem>>, vector<8x128xf32>,
    %c0_191 = arith.constant 0 : index
    %c0_192 = arith.constant 0 : index
    %383 = vector.load %arg13[%c0_191, %c0_192] : memref<8x128xf32, #tpu.memory_space<vmem>>, vector<8x128xf32>
    tpu.vector_store %arg13[%c0_191, %c0_192], %381 {strides = array<i32>} : memref<8x128xf32, #tpu.memory_space<vmem>>, vector<8x128xf32>,
    %384 = arith.index_cast %c0_i32_176 : i32 to index
    %c0_193 = arith.constant 0 : index
    %c0_194 = arith.constant 0 : index
    %385 = vector.load %arg12[%384, %c0_193, %c0_194] : memref<8x8x128xf32, #tpu.memory_space<vmem>>, vector<1x8x128xf32>
    %386 = vector.shape_cast %385 : vector<1x8x128xf32> to vector<8x128xf32>
    %387 = vector.shape_cast %381 : vector<8x128xf32> to vector<1x8x128xf32>
    tpu.vector_store %arg12[%384, %c0_193, %c0_194], %387 {strides = array<i32>} : memref<8x8x128xf32, #tpu.memory_space<vmem>>, vector<1x8x128xf32>,
    %c1_i32_195 = arith.constant 1 : i32
    %c0_196 = arith.constant 0 : index
    %c0_197 = arith.constant 0 : index
    %388 = vector.load %arg13[%c0_196, %c0_197] : memref<8x128xf32, #tpu.memory_space<vmem>>, vector<8x128xf32>
    %389 = arith.index_cast %c1_i32_195 : i32 to index
    %c0_198 = arith.constant 0 : index
    %c0_199 = arith.constant 0 : index
    %390 = vector.load %arg11[%389, %c0_198, %c0_199] : memref<8x8x512xf32, #tpu.memory_space<vmem>>, vector<1x8x512xf32>
    %391 = vector.shape_cast %390 : vector<1x8x512xf32> to vector<8x512xf32>
    %392 = arith.truncf %388 : vector<8x128xf32> to vector<8x128xbf16>
    %c0_200 = arith.constant 0 : index
    %c0_201 = arith.constant 0 : index
    %393 = vector.load %arg6[%c0_200, %c0_201] : memref<128x512xbf16, #tpu.memory_space<vmem>>, vector<128x512xbf16>
    %cst_202 = arith.constant dense<0.000000e+00> : vector<8x512xf32>
    %394 = tpu.matmul %392, %393, %cst_202 {dimension_numbers = #tpu.dot_dimension_numbers<[1], [0], [0], [1], [0, 0, 1, 1], [], []>} : vector<8x128xbf16>, vector<128x512xbf16>, vector<8x512xf32> -> vector<8x512xf32>
    %395 = arith.addf %391, %394 : vector<8x512xf32>
    %396 = vector.extract_strided_slice %395 {offsets = [0, 0], sizes = [8, 128], strides = [1, 1]} : vector<8x512xf32> to vector<8x128xf32>
    %397 = arith.negf %396 : vector<8x128xf32>
    %398 = math.exp %397 : vector<8x128xf32>
    %cst_203 = arith.constant 1.000000e+00 : f32
    %399 = vector.broadcast %cst_203 : f32 to vector<8x128xf32>
    %400 = arith.addf %399, %398 : vector<8x128xf32>
    %401 = arith.divf %399, %400 : vector<8x128xf32>
    %402 = vector.extract_strided_slice %395 {offsets = [0, 128], sizes = [8, 128], strides = [1, 1]} : vector<8x512xf32> to vector<8x128xf32>
    %403 = arith.negf %402 : vector<8x128xf32>
    %404 = math.exp %403 : vector<8x128xf32>
    %cst_204 = arith.constant 1.000000e+00 : f32
    %405 = vector.broadcast %cst_204 : f32 to vector<8x128xf32>
    %406 = arith.addf %405, %404 : vector<8x128xf32>
    %407 = arith.divf %405, %406 : vector<8x128xf32>
    %408 = vector.extract_strided_slice %395 {offsets = [0, 256], sizes = [8, 128], strides = [1, 1]} : vector<8x512xf32> to vector<8x128xf32>
    %409 = math.tanh %408 : vector<8x128xf32>
    %410 = vector.extract_strided_slice %395 {offsets = [0, 384], sizes = [8, 128], strides = [1, 1]} : vector<8x512xf32> to vector<8x128xf32>
    %411 = arith.negf %410 : vector<8x128xf32>
    %412 = math.exp %411 : vector<8x128xf32>
    %cst_205 = arith.constant 1.000000e+00 : f32
    %413 = vector.broadcast %cst_205 : f32 to vector<8x128xf32>
    %414 = arith.addf %413, %412 : vector<8x128xf32>
    %415 = arith.divf %413, %414 : vector<8x128xf32>
    %c0_206 = arith.constant 0 : index
    %c0_207 = arith.constant 0 : index
    %416 = vector.load %arg14[%c0_206, %c0_207] : memref<8x128xf32, #tpu.memory_space<vmem>>, vector<8x128xf32>
    %417 = arith.mulf %407, %416 : vector<8x128xf32>
    %418 = arith.mulf %401, %409 : vector<8x128xf32>
    %419 = arith.addf %417, %418 : vector<8x128xf32>
    %420 = math.tanh %419 : vector<8x128xf32>
    %421 = arith.mulf %415, %420 : vector<8x128xf32>
    %c0_208 = arith.constant 0 : index
    %c0_209 = arith.constant 0 : index
    %422 = vector.load %arg14[%c0_208, %c0_209] : memref<8x128xf32, #tpu.memory_space<vmem>>, vector<8x128xf32>
    tpu.vector_store %arg14[%c0_208, %c0_209], %419 {strides = array<i32>} : memref<8x128xf32, #tpu.memory_space<vmem>>, vector<8x128xf32>,
    %c0_210 = arith.constant 0 : index
    %c0_211 = arith.constant 0 : index
    %423 = vector.load %arg13[%c0_210, %c0_211] : memref<8x128xf32, #tpu.memory_space<vmem>>, vector<8x128xf32>
    tpu.vector_store %arg13[%c0_210, %c0_211], %421 {strides = array<i32>} : memref<8x128xf32, #tpu.memory_space<vmem>>, vector<8x128xf32>,
    %424 = arith.index_cast %c1_i32_195 : i32 to index
    %c0_212 = arith.constant 0 : index
    %c0_213 = arith.constant 0 : index
    %425 = vector.load %arg12[%424, %c0_212, %c0_213] : memref<8x8x128xf32, #tpu.memory_space<vmem>>, vector<1x8x128xf32>
    %426 = vector.shape_cast %425 : vector<1x8x128xf32> to vector<8x128xf32>
    %427 = vector.shape_cast %421 : vector<8x128xf32> to vector<1x8x128xf32>
    tpu.vector_store %arg12[%424, %c0_212, %c0_213], %427 {strides = array<i32>} : memref<8x8x128xf32, #tpu.memory_space<vmem>>, vector<1x8x128xf32>,
    %c2_i32_214 = arith.constant 2 : i32
    %c0_215 = arith.constant 0 : index
    %c0_216 = arith.constant 0 : index
    %428 = vector.load %arg13[%c0_215, %c0_216] : memref<8x128xf32, #tpu.memory_space<vmem>>, vector<8x128xf32>
    %429 = arith.index_cast %c2_i32_214 : i32 to index
    %c0_217 = arith.constant 0 : index
    %c0_218 = arith.constant 0 : index
    %430 = vector.load %arg11[%429, %c0_217, %c0_218] : memref<8x8x512xf32, #tpu.memory_space<vmem>>, vector<1x8x512xf32>
    %431 = vector.shape_cast %430 : vector<1x8x512xf32> to vector<8x512xf32>
    %432 = arith.truncf %428 : vector<8x128xf32> to vector<8x128xbf16>
    %c0_219 = arith.constant 0 : index
    %c0_220 = arith.constant 0 : index
    %433 = vector.load %arg6[%c0_219, %c0_220] : memref<128x512xbf16, #tpu.memory_space<vmem>>, vector<128x512xbf16>
    %cst_221 = arith.constant dense<0.000000e+00> : vector<8x512xf32>
    %434 = tpu.matmul %432, %433, %cst_221 {dimension_numbers = #tpu.dot_dimension_numbers<[1], [0], [0], [1], [0, 0, 1, 1], [], []>} : vector<8x128xbf16>, vector<128x512xbf16>, vector<8x512xf32> -> vector<8x512xf32>
    %435 = arith.addf %431, %434 : vector<8x512xf32>
    %436 = vector.extract_strided_slice %435 {offsets = [0, 0], sizes = [8, 128], strides = [1, 1]} : vector<8x512xf32> to vector<8x128xf32>
    %437 = arith.negf %436 : vector<8x128xf32>
    %438 = math.exp %437 : vector<8x128xf32>
    %cst_222 = arith.constant 1.000000e+00 : f32
    %439 = vector.broadcast %cst_222 : f32 to vector<8x128xf32>
    %440 = arith.addf %439, %438 : vector<8x128xf32>
    %441 = arith.divf %439, %440 : vector<8x128xf32>
    %442 = vector.extract_strided_slice %435 {offsets = [0, 128], sizes = [8, 128], strides = [1, 1]} : vector<8x512xf32> to vector<8x128xf32>
    %443 = arith.negf %442 : vector<8x128xf32>
    %444 = math.exp %443 : vector<8x128xf32>
    %cst_223 = arith.constant 1.000000e+00 : f32
    %445 = vector.broadcast %cst_223 : f32 to vector<8x128xf32>
    %446 = arith.addf %445, %444 : vector<8x128xf32>
    %447 = arith.divf %445, %446 : vector<8x128xf32>
    %448 = vector.extract_strided_slice %435 {offsets = [0, 256], sizes = [8, 128], strides = [1, 1]} : vector<8x512xf32> to vector<8x128xf32>
    %449 = math.tanh %448 : vector<8x128xf32>
    %450 = vector.extract_strided_slice %435 {offsets = [0, 384], sizes = [8, 128], strides = [1, 1]} : vector<8x512xf32> to vector<8x128xf32>
    %451 = arith.negf %450 : vector<8x128xf32>
    %452 = math.exp %451 : vector<8x128xf32>
    %cst_224 = arith.constant 1.000000e+00 : f32
    %453 = vector.broadcast %cst_224 : f32 to vector<8x128xf32>
    %454 = arith.addf %453, %452 : vector<8x128xf32>
    %455 = arith.divf %453, %454 : vector<8x128xf32>
    %c0_225 = arith.constant 0 : index
    %c0_226 = arith.constant 0 : index
    %456 = vector.load %arg14[%c0_225, %c0_226] : memref<8x128xf32, #tpu.memory_space<vmem>>, vector<8x128xf32>
    %457 = arith.mulf %447, %456 : vector<8x128xf32>
    %458 = arith.mulf %441, %449 : vector<8x128xf32>
    %459 = arith.addf %457, %458 : vector<8x128xf32>
    %460 = math.tanh %459 : vector<8x128xf32>
    %461 = arith.mulf %455, %460 : vector<8x128xf32>
    %c0_227 = arith.constant 0 : index
    %c0_228 = arith.constant 0 : index
    %462 = vector.load %arg14[%c0_227, %c0_228] : memref<8x128xf32, #tpu.memory_space<vmem>>, vector<8x128xf32>
    tpu.vector_store %arg14[%c0_227, %c0_228], %459 {strides = array<i32>} : memref<8x128xf32, #tpu.memory_space<vmem>>, vector<8x128xf32>,
    %c0_229 = arith.constant 0 : index
    %c0_230 = arith.constant 0 : index
    %463 = vector.load %arg13[%c0_229, %c0_230] : memref<8x128xf32, #tpu.memory_space<vmem>>, vector<8x128xf32>
    tpu.vector_store %arg13[%c0_229, %c0_230], %461 {strides = array<i32>} : memref<8x128xf32, #tpu.memory_space<vmem>>, vector<8x128xf32>,
    %464 = arith.index_cast %c2_i32_214 : i32 to index
    %c0_231 = arith.constant 0 : index
    %c0_232 = arith.constant 0 : index
    %465 = vector.load %arg12[%464, %c0_231, %c0_232] : memref<8x8x128xf32, #tpu.memory_space<vmem>>, vector<1x8x128xf32>
    %466 = vector.shape_cast %465 : vector<1x8x128xf32> to vector<8x128xf32>
    %467 = vector.shape_cast %461 : vector<8x128xf32> to vector<1x8x128xf32>
    tpu.vector_store %arg12[%464, %c0_231, %c0_232], %467 {strides = array<i32>} : memref<8x8x128xf32, #tpu.memory_space<vmem>>, vector<1x8x128xf32>,
    %c3_i32_233 = arith.constant 3 : i32
    %c0_234 = arith.constant 0 : index
    %c0_235 = arith.constant 0 : index
    %468 = vector.load %arg13[%c0_234, %c0_235] : memref<8x128xf32, #tpu.memory_space<vmem>>, vector<8x128xf32>
    %469 = arith.index_cast %c3_i32_233 : i32 to index
    %c0_236 = arith.constant 0 : index
    %c0_237 = arith.constant 0 : index
    %470 = vector.load %arg11[%469, %c0_236, %c0_237] : memref<8x8x512xf32, #tpu.memory_space<vmem>>, vector<1x8x512xf32>
    %471 = vector.shape_cast %470 : vector<1x8x512xf32> to vector<8x512xf32>
    %472 = arith.truncf %468 : vector<8x128xf32> to vector<8x128xbf16>
    %c0_238 = arith.constant 0 : index
    %c0_239 = arith.constant 0 : index
    %473 = vector.load %arg6[%c0_238, %c0_239] : memref<128x512xbf16, #tpu.memory_space<vmem>>, vector<128x512xbf16>
    %cst_240 = arith.constant dense<0.000000e+00> : vector<8x512xf32>
    %474 = tpu.matmul %472, %473, %cst_240 {dimension_numbers = #tpu.dot_dimension_numbers<[1], [0], [0], [1], [0, 0, 1, 1], [], []>} : vector<8x128xbf16>, vector<128x512xbf16>, vector<8x512xf32> -> vector<8x512xf32>
    %475 = arith.addf %471, %474 : vector<8x512xf32>
    %476 = vector.extract_strided_slice %475 {offsets = [0, 0], sizes = [8, 128], strides = [1, 1]} : vector<8x512xf32> to vector<8x128xf32>
    %477 = arith.negf %476 : vector<8x128xf32>
    %478 = math.exp %477 : vector<8x128xf32>
    %cst_241 = arith.constant 1.000000e+00 : f32
    %479 = vector.broadcast %cst_241 : f32 to vector<8x128xf32>
    %480 = arith.addf %479, %478 : vector<8x128xf32>
    %481 = arith.divf %479, %480 : vector<8x128xf32>
    %482 = vector.extract_strided_slice %475 {offsets = [0, 128], sizes = [8, 128], strides = [1, 1]} : vector<8x512xf32> to vector<8x128xf32>
    %483 = arith.negf %482 : vector<8x128xf32>
    %484 = math.exp %483 : vector<8x128xf32>
    %cst_242 = arith.constant 1.000000e+00 : f32
    %485 = vector.broadcast %cst_242 : f32 to vector<8x128xf32>
    %486 = arith.addf %485, %484 : vector<8x128xf32>
    %487 = arith.divf %485, %486 : vector<8x128xf32>
    %488 = vector.extract_strided_slice %475 {offsets = [0, 256], sizes = [8, 128], strides = [1, 1]} : vector<8x512xf32> to vector<8x128xf32>
    %489 = math.tanh %488 : vector<8x128xf32>
    %490 = vector.extract_strided_slice %475 {offsets = [0, 384], sizes = [8, 128], strides = [1, 1]} : vector<8x512xf32> to vector<8x128xf32>
    %491 = arith.negf %490 : vector<8x128xf32>
    %492 = math.exp %491 : vector<8x128xf32>
    %cst_243 = arith.constant 1.000000e+00 : f32
    %493 = vector.broadcast %cst_243 : f32 to vector<8x128xf32>
    %494 = arith.addf %493, %492 : vector<8x128xf32>
    %495 = arith.divf %493, %494 : vector<8x128xf32>
    %c0_244 = arith.constant 0 : index
    %c0_245 = arith.constant 0 : index
    %496 = vector.load %arg14[%c0_244, %c0_245] : memref<8x128xf32, #tpu.memory_space<vmem>>, vector<8x128xf32>
    %497 = arith.mulf %487, %496 : vector<8x128xf32>
    %498 = arith.mulf %481, %489 : vector<8x128xf32>
    %499 = arith.addf %497, %498 : vector<8x128xf32>
    %500 = math.tanh %499 : vector<8x128xf32>
    %501 = arith.mulf %495, %500 : vector<8x128xf32>
    %c0_246 = arith.constant 0 : index
    %c0_247 = arith.constant 0 : index
    %502 = vector.load %arg14[%c0_246, %c0_247] : memref<8x128xf32, #tpu.memory_space<vmem>>, vector<8x128xf32>
    tpu.vector_store %arg14[%c0_246, %c0_247], %499 {strides = array<i32>} : memref<8x128xf32, #tpu.memory_space<vmem>>, vector<8x128xf32>,
    %c0_248 = arith.constant 0 : index
    %c0_249 = arith.constant 0 : index
    %503 = vector.load %arg13[%c0_248, %c0_249] : memref<8x128xf32, #tpu.memory_space<vmem>>, vector<8x128xf32>
    tpu.vector_store %arg13[%c0_248, %c0_249], %501 {strides = array<i32>} : memref<8x128xf32, #tpu.memory_space<vmem>>, vector<8x128xf32>,
    %504 = arith.index_cast %c3_i32_233 : i32 to index
    %c0_250 = arith.constant 0 : index
    %c0_251 = arith.constant 0 : index
    %505 = vector.load %arg12[%504, %c0_250, %c0_251] : memref<8x8x128xf32, #tpu.memory_space<vmem>>, vector<1x8x128xf32>
    %506 = vector.shape_cast %505 : vector<1x8x128xf32> to vector<8x128xf32>
    %507 = vector.shape_cast %501 : vector<8x128xf32> to vector<1x8x128xf32>
    tpu.vector_store %arg12[%504, %c0_250, %c0_251], %507 {strides = array<i32>} : memref<8x8x128xf32, #tpu.memory_space<vmem>>, vector<1x8x128xf32>,
    %c4_i32_252 = arith.constant 4 : i32
    %c0_253 = arith.constant 0 : index
    %c0_254 = arith.constant 0 : index
    %508 = vector.load %arg13[%c0_253, %c0_254] : memref<8x128xf32, #tpu.memory_space<vmem>>, vector<8x128xf32>
    %509 = arith.index_cast %c4_i32_252 : i32 to index
    %c0_255 = arith.constant 0 : index
    %c0_256 = arith.constant 0 : index
    %510 = vector.load %arg11[%509, %c0_255, %c0_256] : memref<8x8x512xf32, #tpu.memory_space<vmem>>, vector<1x8x512xf32>
    %511 = vector.shape_cast %510 : vector<1x8x512xf32> to vector<8x512xf32>
    %512 = arith.truncf %508 : vector<8x128xf32> to vector<8x128xbf16>
    %c0_257 = arith.constant 0 : index
    %c0_258 = arith.constant 0 : index
    %513 = vector.load %arg6[%c0_257, %c0_258] : memref<128x512xbf16, #tpu.memory_space<vmem>>, vector<128x512xbf16>
    %cst_259 = arith.constant dense<0.000000e+00> : vector<8x512xf32>
    %514 = tpu.matmul %512, %513, %cst_259 {dimension_numbers = #tpu.dot_dimension_numbers<[1], [0], [0], [1], [0, 0, 1, 1], [], []>} : vector<8x128xbf16>, vector<128x512xbf16>, vector<8x512xf32> -> vector<8x512xf32>
    %515 = arith.addf %511, %514 : vector<8x512xf32>
    %516 = vector.extract_strided_slice %515 {offsets = [0, 0], sizes = [8, 128], strides = [1, 1]} : vector<8x512xf32> to vector<8x128xf32>
    %517 = arith.negf %516 : vector<8x128xf32>
    %518 = math.exp %517 : vector<8x128xf32>
    %cst_260 = arith.constant 1.000000e+00 : f32
    %519 = vector.broadcast %cst_260 : f32 to vector<8x128xf32>
    %520 = arith.addf %519, %518 : vector<8x128xf32>
    %521 = arith.divf %519, %520 : vector<8x128xf32>
    %522 = vector.extract_strided_slice %515 {offsets = [0, 128], sizes = [8, 128], strides = [1, 1]} : vector<8x512xf32> to vector<8x128xf32>
    %523 = arith.negf %522 : vector<8x128xf32>
    %524 = math.exp %523 : vector<8x128xf32>
    %cst_261 = arith.constant 1.000000e+00 : f32
    %525 = vector.broadcast %cst_261 : f32 to vector<8x128xf32>
    %526 = arith.addf %525, %524 : vector<8x128xf32>
    %527 = arith.divf %525, %526 : vector<8x128xf32>
    %528 = vector.extract_strided_slice %515 {offsets = [0, 256], sizes = [8, 128], strides = [1, 1]} : vector<8x512xf32> to vector<8x128xf32>
    %529 = math.tanh %528 : vector<8x128xf32>
    %530 = vector.extract_strided_slice %515 {offsets = [0, 384], sizes = [8, 128], strides = [1, 1]} : vector<8x512xf32> to vector<8x128xf32>
    %531 = arith.negf %530 : vector<8x128xf32>
    %532 = math.exp %531 : vector<8x128xf32>
    %cst_262 = arith.constant 1.000000e+00 : f32
    %533 = vector.broadcast %cst_262 : f32 to vector<8x128xf32>
    %534 = arith.addf %533, %532 : vector<8x128xf32>
    %535 = arith.divf %533, %534 : vector<8x128xf32>
    %c0_263 = arith.constant 0 : index
    %c0_264 = arith.constant 0 : index
    %536 = vector.load %arg14[%c0_263, %c0_264] : memref<8x128xf32, #tpu.memory_space<vmem>>, vector<8x128xf32>
    %537 = arith.mulf %527, %536 : vector<8x128xf32>
    %538 = arith.mulf %521, %529 : vector<8x128xf32>
    %539 = arith.addf %537, %538 : vector<8x128xf32>
    %540 = math.tanh %539 : vector<8x128xf32>
    %541 = arith.mulf %535, %540 : vector<8x128xf32>
    %c0_265 = arith.constant 0 : index
    %c0_266 = arith.constant 0 : index
    %542 = vector.load %arg14[%c0_265, %c0_266] : memref<8x128xf32, #tpu.memory_space<vmem>>, vector<8x128xf32>
    tpu.vector_store %arg14[%c0_265, %c0_266], %539 {strides = array<i32>} : memref<8x128xf32, #tpu.memory_space<vmem>>, vector<8x128xf32>,
    %c0_267 = arith.constant 0 : index
    %c0_268 = arith.constant 0 : index
    %543 = vector.load %arg13[%c0_267, %c0_268] : memref<8x128xf32, #tpu.memory_space<vmem>>, vector<8x128xf32>
    tpu.vector_store %arg13[%c0_267, %c0_268], %541 {strides = array<i32>} : memref<8x128xf32, #tpu.memory_space<vmem>>, vector<8x128xf32>,
    %544 = arith.index_cast %c4_i32_252 : i32 to index
    %c0_269 = arith.constant 0 : index
    %c0_270 = arith.constant 0 : index
    %545 = vector.load %arg12[%544, %c0_269, %c0_270] : memref<8x8x128xf32, #tpu.memory_space<vmem>>, vector<1x8x128xf32>
    %546 = vector.shape_cast %545 : vector<1x8x128xf32> to vector<8x128xf32>
    %547 = vector.shape_cast %541 : vector<8x128xf32> to vector<1x8x128xf32>
    tpu.vector_store %arg12[%544, %c0_269, %c0_270], %547 {strides = array<i32>} : memref<8x8x128xf32, #tpu.memory_space<vmem>>, vector<1x8x128xf32>,
    %c5_i32_271 = arith.constant 5 : i32
    %c0_272 = arith.constant 0 : index
    %c0_273 = arith.constant 0 : index
    %548 = vector.load %arg13[%c0_272, %c0_273] : memref<8x128xf32, #tpu.memory_space<vmem>>, vector<8x128xf32>
    %549 = arith.index_cast %c5_i32_271 : i32 to index
    %c0_274 = arith.constant 0 : index
    %c0_275 = arith.constant 0 : index
    %550 = vector.load %arg11[%549, %c0_274, %c0_275] : memref<8x8x512xf32, #tpu.memory_space<vmem>>, vector<1x8x512xf32>
    %551 = vector.shape_cast %550 : vector<1x8x512xf32> to vector<8x512xf32>
    %552 = arith.truncf %548 : vector<8x128xf32> to vector<8x128xbf16>
    %c0_276 = arith.constant 0 : index
    %c0_277 = arith.constant 0 : index
    %553 = vector.load %arg6[%c0_276, %c0_277] : memref<128x512xbf16, #tpu.memory_space<vmem>>, vector<128x512xbf16>
    %cst_278 = arith.constant dense<0.000000e+00> : vector<8x512xf32>
    %554 = tpu.matmul %552, %553, %cst_278 {dimension_numbers = #tpu.dot_dimension_numbers<[1], [0], [0], [1], [0, 0, 1, 1], [], []>} : vector<8x128xbf16>, vector<128x512xbf16>, vector<8x512xf32> -> vector<8x512xf32>
    %555 = arith.addf %551, %554 : vector<8x512xf32>
    %556 = vector.extract_strided_slice %555 {offsets = [0, 0], sizes = [8, 128], strides = [1, 1]} : vector<8x512xf32> to vector<8x128xf32>
    %557 = arith.negf %556 : vector<8x128xf32>
    %558 = math.exp %557 : vector<8x128xf32>
    %cst_279 = arith.constant 1.000000e+00 : f32
    %559 = vector.broadcast %cst_279 : f32 to vector<8x128xf32>
    %560 = arith.addf %559, %558 : vector<8x128xf32>
    %561 = arith.divf %559, %560 : vector<8x128xf32>
    %562 = vector.extract_strided_slice %555 {offsets = [0, 128], sizes = [8, 128], strides = [1, 1]} : vector<8x512xf32> to vector<8x128xf32>
    %563 = arith.negf %562 : vector<8x128xf32>
    %564 = math.exp %563 : vector<8x128xf32>
    %cst_280 = arith.constant 1.000000e+00 : f32
    %565 = vector.broadcast %cst_280 : f32 to vector<8x128xf32>
    %566 = arith.addf %565, %564 : vector<8x128xf32>
    %567 = arith.divf %565, %566 : vector<8x128xf32>
    %568 = vector.extract_strided_slice %555 {offsets = [0, 256], sizes = [8, 128], strides = [1, 1]} : vector<8x512xf32> to vector<8x128xf32>
    %569 = math.tanh %568 : vector<8x128xf32>
    %570 = vector.extract_strided_slice %555 {offsets = [0, 384], sizes = [8, 128], strides = [1, 1]} : vector<8x512xf32> to vector<8x128xf32>
    %571 = arith.negf %570 : vector<8x128xf32>
    %572 = math.exp %571 : vector<8x128xf32>
    %cst_281 = arith.constant 1.000000e+00 : f32
    %573 = vector.broadcast %cst_281 : f32 to vector<8x128xf32>
    %574 = arith.addf %573, %572 : vector<8x128xf32>
    %575 = arith.divf %573, %574 : vector<8x128xf32>
    %c0_282 = arith.constant 0 : index
    %c0_283 = arith.constant 0 : index
    %576 = vector.load %arg14[%c0_282, %c0_283] : memref<8x128xf32, #tpu.memory_space<vmem>>, vector<8x128xf32>
    %577 = arith.mulf %567, %576 : vector<8x128xf32>
    %578 = arith.mulf %561, %569 : vector<8x128xf32>
    %579 = arith.addf %577, %578 : vector<8x128xf32>
    %580 = math.tanh %579 : vector<8x128xf32>
    %581 = arith.mulf %575, %580 : vector<8x128xf32>
    %c0_284 = arith.constant 0 : index
    %c0_285 = arith.constant 0 : index
    %582 = vector.load %arg14[%c0_284, %c0_285] : memref<8x128xf32, #tpu.memory_space<vmem>>, vector<8x128xf32>
    tpu.vector_store %arg14[%c0_284, %c0_285], %579 {strides = array<i32>} : memref<8x128xf32, #tpu.memory_space<vmem>>, vector<8x128xf32>,
    %c0_286 = arith.constant 0 : index
    %c0_287 = arith.constant 0 : index
    %583 = vector.load %arg13[%c0_286, %c0_287] : memref<8x128xf32, #tpu.memory_space<vmem>>, vector<8x128xf32>
    tpu.vector_store %arg13[%c0_286, %c0_287], %581 {strides = array<i32>} : memref<8x128xf32, #tpu.memory_space<vmem>>, vector<8x128xf32>,
    %584 = arith.index_cast %c5_i32_271 : i32 to index
    %c0_288 = arith.constant 0 : index
    %c0_289 = arith.constant 0 : index
    %585 = vector.load %arg12[%584, %c0_288, %c0_289] : memref<8x8x128xf32, #tpu.memory_space<vmem>>, vector<1x8x128xf32>
    %586 = vector.shape_cast %585 : vector<1x8x128xf32> to vector<8x128xf32>
    %587 = vector.shape_cast %581 : vector<8x128xf32> to vector<1x8x128xf32>
    tpu.vector_store %arg12[%584, %c0_288, %c0_289], %587 {strides = array<i32>} : memref<8x8x128xf32, #tpu.memory_space<vmem>>, vector<1x8x128xf32>,
    %c6_i32_290 = arith.constant 6 : i32
    %c0_291 = arith.constant 0 : index
    %c0_292 = arith.constant 0 : index
    %588 = vector.load %arg13[%c0_291, %c0_292] : memref<8x128xf32, #tpu.memory_space<vmem>>, vector<8x128xf32>
    %589 = arith.index_cast %c6_i32_290 : i32 to index
    %c0_293 = arith.constant 0 : index
    %c0_294 = arith.constant 0 : index
    %590 = vector.load %arg11[%589, %c0_293, %c0_294] : memref<8x8x512xf32, #tpu.memory_space<vmem>>, vector<1x8x512xf32>
    %591 = vector.shape_cast %590 : vector<1x8x512xf32> to vector<8x512xf32>
    %592 = arith.truncf %588 : vector<8x128xf32> to vector<8x128xbf16>
    %c0_295 = arith.constant 0 : index
    %c0_296 = arith.constant 0 : index
    %593 = vector.load %arg6[%c0_295, %c0_296] : memref<128x512xbf16, #tpu.memory_space<vmem>>, vector<128x512xbf16>
    %cst_297 = arith.constant dense<0.000000e+00> : vector<8x512xf32>
    %594 = tpu.matmul %592, %593, %cst_297 {dimension_numbers = #tpu.dot_dimension_numbers<[1], [0], [0], [1], [0, 0, 1, 1], [], []>} : vector<8x128xbf16>, vector<128x512xbf16>, vector<8x512xf32> -> vector<8x512xf32>
    %595 = arith.addf %591, %594 : vector<8x512xf32>
    %596 = vector.extract_strided_slice %595 {offsets = [0, 0], sizes = [8, 128], strides = [1, 1]} : vector<8x512xf32> to vector<8x128xf32>
    %597 = arith.negf %596 : vector<8x128xf32>
    %598 = math.exp %597 : vector<8x128xf32>
    %cst_298 = arith.constant 1.000000e+00 : f32
    %599 = vector.broadcast %cst_298 : f32 to vector<8x128xf32>
    %600 = arith.addf %599, %598 : vector<8x128xf32>
    %601 = arith.divf %599, %600 : vector<8x128xf32>
    %602 = vector.extract_strided_slice %595 {offsets = [0, 128], sizes = [8, 128], strides = [1, 1]} : vector<8x512xf32> to vector<8x128xf32>
    %603 = arith.negf %602 : vector<8x128xf32>
    %604 = math.exp %603 : vector<8x128xf32>
    %cst_299 = arith.constant 1.000000e+00 : f32
    %605 = vector.broadcast %cst_299 : f32 to vector<8x128xf32>
    %606 = arith.addf %605, %604 : vector<8x128xf32>
    %607 = arith.divf %605, %606 : vector<8x128xf32>
    %608 = vector.extract_strided_slice %595 {offsets = [0, 256], sizes = [8, 128], strides = [1, 1]} : vector<8x512xf32> to vector<8x128xf32>
    %609 = math.tanh %608 : vector<8x128xf32>
    %610 = vector.extract_strided_slice %595 {offsets = [0, 384], sizes = [8, 128], strides = [1, 1]} : vector<8x512xf32> to vector<8x128xf32>
    %611 = arith.negf %610 : vector<8x128xf32>
    %612 = math.exp %611 : vector<8x128xf32>
    %cst_300 = arith.constant 1.000000e+00 : f32
    %613 = vector.broadcast %cst_300 : f32 to vector<8x128xf32>
    %614 = arith.addf %613, %612 : vector<8x128xf32>
    %615 = arith.divf %613, %614 : vector<8x128xf32>
    %c0_301 = arith.constant 0 : index
    %c0_302 = arith.constant 0 : index
    %616 = vector.load %arg14[%c0_301, %c0_302] : memref<8x128xf32, #tpu.memory_space<vmem>>, vector<8x128xf32>
    %617 = arith.mulf %607, %616 : vector<8x128xf32>
    %618 = arith.mulf %601, %609 : vector<8x128xf32>
    %619 = arith.addf %617, %618 : vector<8x128xf32>
    %620 = math.tanh %619 : vector<8x128xf32>
    %621 = arith.mulf %615, %620 : vector<8x128xf32>
    %c0_303 = arith.constant 0 : index
    %c0_304 = arith.constant 0 : index
    %622 = vector.load %arg14[%c0_303, %c0_304] : memref<8x128xf32, #tpu.memory_space<vmem>>, vector<8x128xf32>
    tpu.vector_store %arg14[%c0_303, %c0_304], %619 {strides = array<i32>} : memref<8x128xf32, #tpu.memory_space<vmem>>, vector<8x128xf32>,
    %c0_305 = arith.constant 0 : index
    %c0_306 = arith.constant 0 : index
    %623 = vector.load %arg13[%c0_305, %c0_306] : memref<8x128xf32, #tpu.memory_space<vmem>>, vector<8x128xf32>
    tpu.vector_store %arg13[%c0_305, %c0_306], %621 {strides = array<i32>} : memref<8x128xf32, #tpu.memory_space<vmem>>, vector<8x128xf32>,
    %624 = arith.index_cast %c6_i32_290 : i32 to index
    %c0_307 = arith.constant 0 : index
    %c0_308 = arith.constant 0 : index
    %625 = vector.load %arg12[%624, %c0_307, %c0_308] : memref<8x8x128xf32, #tpu.memory_space<vmem>>, vector<1x8x128xf32>
    %626 = vector.shape_cast %625 : vector<1x8x128xf32> to vector<8x128xf32>
    %627 = vector.shape_cast %621 : vector<8x128xf32> to vector<1x8x128xf32>
    tpu.vector_store %arg12[%624, %c0_307, %c0_308], %627 {strides = array<i32>} : memref<8x8x128xf32, #tpu.memory_space<vmem>>, vector<1x8x128xf32>,
    %c7_i32_309 = arith.constant 7 : i32
    %c0_310 = arith.constant 0 : index
    %c0_311 = arith.constant 0 : index
    %628 = vector.load %arg13[%c0_310, %c0_311] : memref<8x128xf32, #tpu.memory_space<vmem>>, vector<8x128xf32>
    %629 = arith.index_cast %c7_i32_309 : i32 to index
    %c0_312 = arith.constant 0 : index
    %c0_313 = arith.constant 0 : index
    %630 = vector.load %arg11[%629, %c0_312, %c0_313] : memref<8x8x512xf32, #tpu.memory_space<vmem>>, vector<1x8x512xf32>
    %631 = vector.shape_cast %630 : vector<1x8x512xf32> to vector<8x512xf32>
    %632 = arith.truncf %628 : vector<8x128xf32> to vector<8x128xbf16>
    %c0_314 = arith.constant 0 : index
    %c0_315 = arith.constant 0 : index
    %633 = vector.load %arg6[%c0_314, %c0_315] : memref<128x512xbf16, #tpu.memory_space<vmem>>, vector<128x512xbf16>
    %cst_316 = arith.constant dense<0.000000e+00> : vector<8x512xf32>
    %634 = tpu.matmul %632, %633, %cst_316 {dimension_numbers = #tpu.dot_dimension_numbers<[1], [0], [0], [1], [0, 0, 1, 1], [], []>} : vector<8x128xbf16>, vector<128x512xbf16>, vector<8x512xf32> -> vector<8x512xf32>
    %635 = arith.addf %631, %634 : vector<8x512xf32>
    %636 = vector.extract_strided_slice %635 {offsets = [0, 0], sizes = [8, 128], strides = [1, 1]} : vector<8x512xf32> to vector<8x128xf32>
    %637 = arith.negf %636 : vector<8x128xf32>
    %638 = math.exp %637 : vector<8x128xf32>
    %cst_317 = arith.constant 1.000000e+00 : f32
    %639 = vector.broadcast %cst_317 : f32 to vector<8x128xf32>
    %640 = arith.addf %639, %638 : vector<8x128xf32>
    %641 = arith.divf %639, %640 : vector<8x128xf32>
    %642 = vector.extract_strided_slice %635 {offsets = [0, 128], sizes = [8, 128], strides = [1, 1]} : vector<8x512xf32> to vector<8x128xf32>
    %643 = arith.negf %642 : vector<8x128xf32>
    %644 = math.exp %643 : vector<8x128xf32>
    %cst_318 = arith.constant 1.000000e+00 : f32
    %645 = vector.broadcast %cst_318 : f32 to vector<8x128xf32>
    %646 = arith.addf %645, %644 : vector<8x128xf32>
    %647 = arith.divf %645, %646 : vector<8x128xf32>
    %648 = vector.extract_strided_slice %635 {offsets = [0, 256], sizes = [8, 128], strides = [1, 1]} : vector<8x512xf32> to vector<8x128xf32>
    %649 = math.tanh %648 : vector<8x128xf32>
    %650 = vector.extract_strided_slice %635 {offsets = [0, 384], sizes = [8, 128], strides = [1, 1]} : vector<8x512xf32> to vector<8x128xf32>
    %651 = arith.negf %650 : vector<8x128xf32>
    %652 = math.exp %651 : vector<8x128xf32>
    %cst_319 = arith.constant 1.000000e+00 : f32
    %653 = vector.broadcast %cst_319 : f32 to vector<8x128xf32>
    %654 = arith.addf %653, %652 : vector<8x128xf32>
    %655 = arith.divf %653, %654 : vector<8x128xf32>
    %c0_320 = arith.constant 0 : index
    %c0_321 = arith.constant 0 : index
    %656 = vector.load %arg14[%c0_320, %c0_321] : memref<8x128xf32, #tpu.memory_space<vmem>>, vector<8x128xf32>
    %657 = arith.mulf %647, %656 : vector<8x128xf32>
    %658 = arith.mulf %641, %649 : vector<8x128xf32>
    %659 = arith.addf %657, %658 : vector<8x128xf32>
    %660 = math.tanh %659 : vector<8x128xf32>
    %661 = arith.mulf %655, %660 : vector<8x128xf32>
    %c0_322 = arith.constant 0 : index
    %c0_323 = arith.constant 0 : index
    %662 = vector.load %arg14[%c0_322, %c0_323] : memref<8x128xf32, #tpu.memory_space<vmem>>, vector<8x128xf32>
    tpu.vector_store %arg14[%c0_322, %c0_323], %659 {strides = array<i32>} : memref<8x128xf32, #tpu.memory_space<vmem>>, vector<8x128xf32>,
    %c0_324 = arith.constant 0 : index
    %c0_325 = arith.constant 0 : index
    %663 = vector.load %arg13[%c0_324, %c0_325] : memref<8x128xf32, #tpu.memory_space<vmem>>, vector<8x128xf32>
    tpu.vector_store %arg13[%c0_324, %c0_325], %661 {strides = array<i32>} : memref<8x128xf32, #tpu.memory_space<vmem>>, vector<8x128xf32>,
    %664 = arith.index_cast %c7_i32_309 : i32 to index
    %c0_326 = arith.constant 0 : index
    %c0_327 = arith.constant 0 : index
    %665 = vector.load %arg12[%664, %c0_326, %c0_327] : memref<8x8x128xf32, #tpu.memory_space<vmem>>, vector<1x8x128xf32>
    %666 = vector.shape_cast %665 : vector<1x8x128xf32> to vector<8x128xf32>
    %667 = vector.shape_cast %661 : vector<8x128xf32> to vector<1x8x128xf32>
    tpu.vector_store %arg12[%664, %c0_326, %c0_327], %667 {strides = array<i32>} : memref<8x8x128xf32, #tpu.memory_space<vmem>>, vector<1x8x128xf32>,
    %c8_i32_328 = arith.constant 8 : i32
    %c0_329 = arith.constant 0 : index
    %c0_330 = arith.constant 0 : index
    %c0_331 = arith.constant 0 : index
    %668 = vector.load %arg12[%c0_329, %c0_330, %c0_331] : memref<8x8x128xf32, #tpu.memory_space<vmem>>, vector<8x8x128xf32>
    %669 = vector.shape_cast %668 : vector<8x8x128xf32> to vector<64x128xf32>
    %670 = arith.truncf %669 : vector<64x128xf32> to vector<64x128xbf16>
    %c0_332 = arith.constant 0 : index
    %c0_333 = arith.constant 0 : index
    %671 = vector.load %arg8[%c0_332, %c0_333] : memref<128x128xbf16, #tpu.memory_space<vmem>>, vector<128x128xbf16>
    %cst_334 = arith.constant dense<0.000000e+00> : vector<64x128xf32>
    %672 = tpu.matmul %670, %671, %cst_334 {dimension_numbers = #tpu.dot_dimension_numbers<[1], [0], [0], [1], [0, 0, 1, 1], [], []>} : vector<64x128xbf16>, vector<128x128xbf16>, vector<64x128xf32> -> vector<64x128xf32>
    %c0_335 = arith.constant 0 : index
    %c0_336 = arith.constant 0 : index
    %673 = vector.load %arg9[%c0_335, %c0_336] : memref<1x128xf32, #tpu.memory_space<vmem>>, vector<1x128xf32>
    %674 = vector.broadcast %673 : vector<1x128xf32> to vector<64x128xf32>
    %675 = arith.addf %672, %674 : vector<64x128xf32>
    %676 = vector.shape_cast %675 : vector<64x128xf32> to vector<8x8x128xf32>
    %c0_337 = arith.constant 0 : index
    %c0_338 = arith.constant 0 : index
    %c0_339 = arith.constant 0 : index
    %677 = vector.load %arg10[%c0_337, %c0_338, %c0_339] : memref<8x8x128xf32, #tpu.memory_space<vmem>>, vector<8x8x128xf32>
    tpu.vector_store %arg10[%c0_337, %c0_338, %c0_339], %676 {strides = array<i32>} : memref<8x8x128xf32, #tpu.memory_space<vmem>>, vector<8x8x128xf32>,
    return
  }
  func.func @transform_0(%arg0: i32) -> (i32, i32, i32) {
    %c0_i32 = arith.constant 0 : i32
    %c0_i32_0 = arith.constant 0 : i32
    %c0_i32_1 = arith.constant 0 : i32
    return %c0_i32, %arg0, %c0_i32_0 : i32, i32, i32
  }
  func.func @transform_1(%arg0: i32) -> (i32, i32) {
    %c0_i32 = arith.constant 0 : i32
    %c0_i32_0 = arith.constant 0 : i32
    %c0_i32_1 = arith.constant 0 : i32
    return %c0_i32, %c0_i32_0 : i32, i32
  }
  func.func @transform_2(%arg0: i32) -> (i32, i32) {
    %c0_i32 = arith.constant 0 : i32
    %c0_i32_0 = arith.constant 0 : i32
    %c0_i32_1 = arith.constant 0 : i32
    return %c0_i32, %c0_i32_0 : i32, i32
  }
  func.func @transform_3(%arg0: i32) -> (i32, i32) {
    %c0_i32 = arith.constant 0 : i32
    %c0_i32_0 = arith.constant 0 : i32
    %c0_i32_1 = arith.constant 0 : i32
    return %c0_i32, %c0_i32_0 : i32, i32
  }
  func.func @transform_4(%arg0: i32) -> (i32, i32) {
    %c0_i32 = arith.constant 0 : i32
    %c0_i32_0 = arith.constant 0 : i32
    %c0_i32_1 = arith.constant 0 : i32
    return %c0_i32, %c0_i32_0 : i32, i32
  }
  func.func @transform_5(%arg0: i32) -> (i32, i32) {
    %c0_i32 = arith.constant 0 : i32
    %c0_i32_0 = arith.constant 0 : i32
    %c0_i32_1 = arith.constant 0 : i32
    return %c0_i32, %c0_i32_0 : i32, i32
  }
  func.func @transform_6(%arg0: i32) -> (i32, i32) {
    %c0_i32 = arith.constant 0 : i32
    %c0_i32_0 = arith.constant 0 : i32
    %c0_i32_1 = arith.constant 0 : i32
    return %c0_i32, %c0_i32_0 : i32, i32
  }
  func.func @transform_7(%arg0: i32) -> (i32, i32) {
    %c0_i32 = arith.constant 0 : i32
    %c0_i32_0 = arith.constant 0 : i32
    %c0_i32_1 = arith.constant 0 : i32
    return %c0_i32, %c0_i32_0 : i32, i32
  }
  func.func @transform_8(%arg0: i32) -> (i32, i32) {
    %c0_i32 = arith.constant 0 : i32
    %c0_i32_0 = arith.constant 0 : i32
    %c0_i32_1 = arith.constant 0 : i32
    return %c0_i32, %c0_i32_0 : i32, i32
  }
  func.func @transform_9(%arg0: i32) -> (i32, i32, i32) {
    %c0_i32 = arith.constant 0 : i32
    %c0_i32_0 = arith.constant 0 : i32
    %c0_i32_1 = arith.constant 0 : i32
    return %c0_i32, %arg0, %c0_i32_0 : i32, i32, i32
  }
}

</mosaic_0001>

<bundles_post_ra>
// kernel: tpu_custom_call.1
= control target key start
LH: loop header
LB: loop body
LE: loop exit
PB: predicated region body
PF: predicated region fallthrough
CT: control target
= control target key end

     0   :  { %14 = vsyncpa [#allocation7], 0  ;;  %s8801_s0 = inlined_call_operand.hbm [shape: f32[8,8,128], index: 0, kind: input, shape index: {}]   ;;  %s8802_s1 = inlined_call_operand.hbm [shape: bf16[128,512], index: 1, kind: input, shape index: {}]   ;;  %s8803_s2 = inlined_call_operand.hbm [shape: bf16[128,512], index: 2, kind: input, shape index: {}]   ;;  %s8804_s3 = inlined_call_operand.vmem [shape: f32[1,512], index: 3, kind: input, shape index: {}]   ;;  %s8805_s4 = inlined_call_operand.hbm [shape: bf16[128,512], index: 4, kind: input, shape index: {}]   ;;  %s8806_s5 = inlined_call_operand.hbm [shape: bf16[128,512], index: 5, kind: input, shape index: {}]   ;;  %s8807_s6 = inlined_call_operand.vmem [shape: f32[1,512], index: 6, kind: input, shape index: {}]   ;;  %s8808_s7 = inlined_call_operand.hbm [shape: bf16[128,128], index: 7, kind: input, shape index: {}]   ;;  %s8809_s8 = inlined_call_operand.vmem [shape: f32[1,128], index: 8, kind: input, shape index: {}]   ;;  %s8810_s9 = inlined_call_operand.hbm [shape: f32[8,8,128], index: 9, kind: output, shape index: {}]  }
   0x1   :  { %15 = vsyncpa [#allocation10], 0 }
   0x2   :  { %16 = vsyncpa [#allocation13], 0 }
   0x3   :  { %17 = vsyncpa [#allocation16], 0 }
   0x4   :  { %18 = vsyncpa [#allocation8], 0  ;;  %s7524_s30 = smov [#allocation9]  }
   0x5   :  { %s36_s10 = sshll.u32 %s7524_s30, 4  ;;  %s37_s10 = int_to_ptr.vmem [resolvable:$true] %s36_s10 }
   0x6   :  { %s7382_s11 = scalar_lea.vmem %s37_s10, 4096  ;;  %p7387_p1 = scmp.lt.s32.totalorder %s37_s10, %s37_s10 }
   0x7   :  { %p7383_p0 = scmp.ne.s32.totalorder %s37_s10, %s7382_s11  ;;  %p7388_p2 = scmp.lt.s32.totalorder %s7382_s11, %s7382_s11 }
   0x9   :  { %p7389_p3 = por %p7388_p2, %p7387_p1 }
   0xb   :  { %p7390_p4 = pnand %p7389_p3, %p7383_p0 }
   0xd   :  { %7393 = shalt.err (!%p7390_p4)
}
   0xe   :  { %s7525_s12 = smov 256   ;;  %s7526_s13 = smov 16  }
   0xf   :  { %42 = dma.hbm_to_vmem [thread:$0]  %s8802_s1, 4096, %s37_s10, [#allocation10], %s7525_s12, %s7525_s12, %s7526_s13  }
  0x10   :  { %s7527_s16 = smov [#allocation12]   ;;  %s7528_s18 = smov [#allocation6]  }
  0x11   :  { %s62_s17 = sshll.u32 %s7527_s16, 4  ;;  %s24_s19 = sshll.u32 %s7528_s18, 4  ;;  %s63_s17 = int_to_ptr.vmem [resolvable:$true] %s62_s17  ;;  %s25_s19 = int_to_ptr.vmem [resolvable:$true] %s24_s19 }
  0x12   :  { %s7402_s20 = scalar_lea.vmem %s63_s17, 4096  ;;  %p7407_p6 = scmp.lt.s32.totalorder %s63_s17, %s63_s17 }
  0x13   :  { %p7403_p5 = scmp.ne.s32.totalorder %s63_s17, %s7402_s20  ;;  %p7408_p7 = scmp.lt.s32.totalorder %s7402_s20, %s7402_s20 }
  0x15   :  { %p7409_p8 = por %p7408_p7, %p7407_p6 }
  0x17   :  { %p7410_p9 = pnand %p7409_p8, %p7403_p5 }
  0x19   :  { %7413 = shalt.err (!%p7410_p9)
}
  0x1a   :  { %68 = dma.hbm_to_vmem [thread:$0]  %s8805_s4, 4096, %s63_s17, [#allocation13], %s7525_s12, %s7525_s12, %s7526_s13  }
  0x1b   :  { %s7422_s1 = scalar_lea.vmem %s25_s19, 1024  ;;  %p7427_p11 = scmp.lt.s32.totalorder %s25_s19, %s25_s19 }
  0x1c   :  { %p7423_p10 = scmp.ne.s32.totalorder %s25_s19, %s7422_s1  ;;  %p7428_p12 = scmp.lt.s32.totalorder %s7422_s1, %s7422_s1 }
  0x1e   :  { %p7429_p13 = por %p7428_p12, %p7427_p11 }
  0x20   :  { %p7430_p0 = pnand %p7429_p13, %p7423_p10 }
  0x22   :  { %7433 = shalt.err (!%p7430_p0)
}
  0x23   :  { %s7529_s23 = smov 128   ;;  %s7530_s24 = smov 8  }
  0x24   :  { %30 = dma.hbm_to_vmem [thread:$0]  %s8801_s0, 1024, %s25_s19, [#allocation7], %s7529_s23, %s7529_s23, %s7530_s24  }
  0x25   :  { %s7531_s27 = smov [#allocation11]   ;;  %s7532_s4 = smov [#allocation14]  }
  0x26   :  { %s48_s28 = sshll.u32 %s7531_s27, 4  ;;  %s74_s29 = sshll.u32 %s7532_s4, 4  ;;  %s49_s28 = int_to_ptr.vmem [resolvable:$true] %s48_s28  ;;  %s75_s29 = int_to_ptr.vmem [resolvable:$true] %s74_s29 }
  0x27   :  { %s7442_s30 = scalar_lea.vmem %s49_s28, 4096  ;;  %p7447_p2 = scmp.lt.s32.totalorder %s49_s28, %s49_s28 }
  0x28   :  { %p7443_p1 = scmp.ne.s32.totalorder %s49_s28, %s7442_s30  ;;  %p7448_p3 = scmp.lt.s32.totalorder %s7442_s30, %s7442_s30 }
  0x2a   :  { %p7449_p4 = por %p7448_p3, %p7447_p2 }
  0x2c   :  { %p7450_p5 = pnand %p7449_p4, %p7443_p1 }
  0x2e   :  { %7453 = shalt.err (!%p7450_p5)
}
  0x2f   :  { %54 = dma.hbm_to_vmem [thread:$0]  %s8803_s2, 4096, %s49_s28, [#allocation10], %s7525_s12, %s7525_s12, %s7526_s13  }
  0x30   :  { %s7462_s0 = scalar_lea.vmem %s75_s29, 4096  ;;  %p7467_p7 = scmp.lt.s32.totalorder %s75_s29, %s75_s29 }
  0x31   :  { %p7463_p6 = scmp.ne.s32.totalorder %s75_s29, %s7462_s0  ;;  %p7468_p8 = scmp.lt.s32.totalorder %s7462_s0, %s7462_s0 }
  0x33   :  { %p7469_p9 = por %p7468_p8, %p7467_p7 }
  0x35   :  { %p7470_p10 = pnand %p7469_p9, %p7463_p6 }
  0x37   :  { %7473 = shalt.err (!%p7470_p10)
}
  0x38   :  { %80 = dma.hbm_to_vmem [thread:$0]  %s8806_s5, 4096, %s75_s29, [#allocation13], %s7525_s12, %s7525_s12, %s7526_s13  }
  0x39   :  { %s7533_s16 = smov [#allocation15]  }
  0x3a   :  { %s88_s17 = sshll.u32 %s7533_s16, 4  ;;  %s89_s17 = int_to_ptr.vmem [resolvable:$true] %s88_s17 }
  0x3b   :  { %s7482_s18 = scalar_lea.vmem %s89_s17, 1024  ;;  %p7487_p12 = scmp.lt.s32.totalorder %s89_s17, %s89_s17 }
  0x3c   :  { %p7483_p11 = scmp.ne.s32.totalorder %s89_s17, %s7482_s18  ;;  %p7488_p13 = scmp.lt.s32.totalorder %s7482_s18, %s7482_s18 }
  0x3e   :  { %p7489_p0 = por %p7488_p13, %p7487_p12 }
  0x40   :  { %p7490_p1 = pnand %p7489_p0, %p7483_p11 }
  0x42   :  { %7493 = shalt.err (!%p7490_p1)
}
  0x43   :  { %s7534_s2 = smov 64   ;;  %s7535_s19 = smov 4  }
  0x44   :  { %94 = dma.hbm_to_vmem [thread:$0]  %s8808_s7, 1024, %s89_s17, [#allocation16], %s7534_s2, %s7534_s2, %s7535_s19  }
  0x45   :  { %7514 = dma.done.wait [#allocation7], 1024  }
  0x46   :  { %7515 = vsyncadd [#allocation7], 4294966272 }
  0x47   :  { %7516 = dma.done.wait [#allocation10], 8192  }
  0x48   :  { %7517 = vsyncadd [#allocation10], 4294959104 }
  0x49   :  { %7518 = dma.done.wait [#allocation13], 8192  }
  0x4a   :  { %7519 = vsyncadd [#allocation13], 4294959104 }
  0x4b   :  { %7520 = dma.done.wait [#allocation16], 1024  }
  0x4c   :  { %7521 = vsyncadd [#allocation16], 4294966272  ;;  %v8815_v0 = vmov 0   ;;  %v6794_v1 = vld [vmem:[#allocation9 + $0xe4] ss:$16 sps:$4 sm:$0xff]   ;;  %v117_v33 = vld [vmem:[#allocation6 + $0x8] sm:$0xff] }
  0x4d   :  { %374 = vmatprep.mubr.bf16.mxu1 %v8815_v0  ;;  %752 = vmatprep.mubr.bf16.mxu0 %v8815_v0  ;;  %v6796_v2 = vld [vmem:[#allocation9 + $0xe0] ss:$16 sps:$4 sm:$0xff]   ;;  %v7624_v3 = vld [vmem:[#allocation11 + $0xe4] ss:$16 sps:$4 sm:$0xff]   ;;  %v6844_v34 = vld [vmem:[#allocation9 + $0xec] ss:$16 sps:$4 sm:$0xff]  }
  0x4e   :  { %342 = vmatprep.subr.bf16.mxu1 %v6794_v1  ;;  %v7626_v4 = vld [vmem:[#allocation11 + $0xe0] ss:$16 sps:$4 sm:$0xff]   ;;  %v6800_v5 = vld [vmem:[#allocation9 + $0xc4] ss:$16 sps:$4 sm:$0xff]   ;;  %720 = vmatprep.subr.bf16.mxu0 %v7624_v3  ;;  %v6842_v37 = vld [vmem:[#allocation9 + $0xe8] ss:$16 sps:$4 sm:$0xff]  }
  0x4f   :  { %343 = vmatpush1.bf16.msra.mxu1 %v6796_v2  ;;  %v6802_v6 = vld [vmem:[#allocation9 + $0xc0] ss:$16 sps:$4 sm:$0xff]   ;;  %v7629_v7 = vld [vmem:[#allocation11 + $0xc4] ss:$16 sps:$4 sm:$0xff]   ;;  %721 = vmatpush1.bf16.msra.mxu0 %v7626_v4  ;;  %v6847_v38 = vld [vmem:[#allocation9 + $0xcc] ss:$16 sps:$4 sm:$0xff]  }
  0x50   :  { %344 = vmatprep.subr.bf16.mxu1 %v6800_v5  ;;  %v7632_v8 = vld [vmem:[#allocation11 + $0xc0] ss:$16 sps:$4 sm:$0xff]   ;;  %722 = vmatprep.subr.bf16.mxu0 %v7629_v7  ;;  %v6806_v9 = vld [vmem:[#allocation9 + $0xa4] ss:$16 sps:$4 sm:$0xff]   ;;  %v6845_v39 = vld [vmem:[#allocation9 + $0xc8] ss:$16 sps:$4 sm:$0xff]  }
  0x51   :  { %v6808_v10 = vld [vmem:[#allocation9 + $0xa0] ss:$16 sps:$4 sm:$0xff]   ;;  %v7635_v11 = vld [vmem:[#allocation11 + $0xa4] ss:$16 sps:$4 sm:$0xff]   ;;  %v119_v41 = vld [vmem:[#allocation6 + $0x18] sm:$0xff]  ;;  %v8813_v42 = vmov 0.0|0.0  }
  0x52   :  { %v6812_v12 = vld [vmem:[#allocation9 + $0x84] ss:$16 sps:$4 sm:$0xff]   ;;  %v7638_v13 = vld [vmem:[#allocation11 + $0xa0] ss:$16 sps:$4 sm:$0xff]   ;;  %v6850_v43 = vld [vmem:[#allocation9 + $0xac] ss:$16 sps:$4 sm:$0xff]  }
  0x53   :  { %345 = vmatpush1.bf16.msra.mxu1 %v6802_v6  ;;  %723 = vmatpush1.bf16.msra.mxu0 %v7632_v8  ;;  %v7641_v14 = vld [vmem:[#allocation11 + $0x84] ss:$16 sps:$4 sm:$0xff]   ;;  %v6814_v15 = vld [vmem:[#allocation9 + $0x80] ss:$16 sps:$4 sm:$0xff]   ;;  %v6848_v45 = vld [vmem:[#allocation9 + $0xa8] ss:$16 sps:$4 sm:$0xff]  }
  0x54   :  { %346 = vmatprep.subr.bf16.mxu1 %v6806_v9  ;;  %724 = vmatprep.subr.bf16.mxu0 %v7635_v11  ;;  %v6818_v16 = vld [vmem:[#allocation9 + $0x64] ss:$16 sps:$4 sm:$0xff]   ;;  %v7644_v17 = vld [vmem:[#allocation11 + $0x80] ss:$16 sps:$4 sm:$0xff]   ;;  %v6853_v46 = vld [vmem:[#allocation9 + $0x8c] ss:$16 sps:$4 sm:$0xff]  }
  0x55   :  { %v7647_v18 = vld [vmem:[#allocation11 + $0x64] ss:$16 sps:$4 sm:$0xff]   ;;  %v6820_v19 = vld [vmem:[#allocation9 + $0x60] ss:$16 sps:$4 sm:$0xff]   ;;  %v6851_v47 = vld [vmem:[#allocation9 + $0x88] ss:$16 sps:$4 sm:$0xff]  }
  0x56   :  { %v6824_v20 = vld [vmem:[#allocation9 + $0x44] ss:$16 sps:$4 sm:$0xff]   ;;  %v7650_v21 = vld [vmem:[#allocation11 + $0x60] ss:$16 sps:$4 sm:$0xff]   ;;  %v121_v49 = vld [vmem:[#allocation6 + $0x28] sm:$0xff] }
  0x57   :  { %347 = vmatpush1.bf16.msra.mxu1 %v6808_v10  ;;  %725 = vmatpush1.bf16.msra.mxu0 %v7638_v13  ;;  %v7653_v22 = vld [vmem:[#allocation11 + $0x44] ss:$16 sps:$4 sm:$0xff]   ;;  %v6826_v23 = vld [vmem:[#allocation9 + $0x40] ss:$16 sps:$4 sm:$0xff]   ;;  %v6856_v50 = vld [vmem:[#allocation9 + $0x6c] ss:$16 sps:$4 sm:$0xff]  }
  0x58   :  { %348 = vmatprep.subr.bf16.mxu1 %v6812_v12  ;;  %726 = vmatprep.subr.bf16.mxu0 %v7641_v14  ;;  %v6830_v24 = vld [vmem:[#allocation9 + $0x24] ss:$16 sps:$4 sm:$0xff]   ;;  %v7656_v25 = vld [vmem:[#allocation11 + $0x40] ss:$16 sps:$4 sm:$0xff]   ;;  %v6854_v51 = vld [vmem:[#allocation9 + $0x68] ss:$16 sps:$4 sm:$0xff]  }
  0x59   :  { %v7659_v26 = vld [vmem:[#allocation11 + $0x24] ss:$16 sps:$4 sm:$0xff]   ;;  %v6832_v27 = vld [vmem:[#allocation9 + $0x20] ss:$16 sps:$4 sm:$0xff]   ;;  %v6859_v53 = vld [vmem:[#allocation9 + $0x4c] ss:$16 sps:$4 sm:$0xff]  }
  0x5a   :  { %v6836_v28 = vld [vmem:[#allocation9 + $0x4] ss:$16 sps:$4 sm:$0xff]   ;;  %v7662_v29 = vld [vmem:[#allocation11 + $0x20] ss:$16 sps:$4 sm:$0xff]   ;;  %v6857_v54 = vld [vmem:[#allocation9 + $0x48] ss:$16 sps:$4 sm:$0xff]  }
  0x5b   :  { %349 = vmatpush1.bf16.msra.mxu1 %v6814_v15  ;;  %727 = vmatpush1.bf16.msra.mxu0 %v7644_v17  ;;  %v6838_v30 = vld [vmem:[#allocation9] ss:$16 sps:$4 sm:$0xff]   ;;  %v7665_v31 = vld [vmem:[#allocation11 + $0x4] ss:$16 sps:$4 sm:$0xff]   ;;  %v123_v56 = vld [vmem:[#allocation6 + $0x38] sm:$0xff] }
  0x5c   :  { %350 = vmatprep.subr.bf16.mxu1 %v6818_v16  ;;  %728 = vmatprep.subr.bf16.mxu0 %v7647_v18  ;;  %v116_v32 = vld [vmem:[#allocation6] sm:$0xff]  ;;  %v118_v40 = vld [vmem:[#allocation6 + $0x10] sm:$0xff]  ;;  %v6862_v57 = vld [vmem:[#allocation9 + $0x2c] ss:$16 sps:$4 sm:$0xff]  }
  0x5d   :  { %v7668_v35 = vld [vmem:[#allocation11] ss:$16 sps:$4 sm:$0xff]   ;;  %v7671_v36 = vpack.c.bf16 %v117_v33, %v116_v32  ;;  %v7680_v44 = vpack.c.bf16 %v119_v41, %v118_v40  ;;  %v6860_v58 = vld [vmem:[#allocation9 + $0x28] ss:$16 sps:$4 sm:$0xff]   ;;  %v6865_v60 = vld [vmem:[#allocation9 + $0xc] ss:$16 sps:$4 sm:$0xff]  }
  0x5e   :  { %v120_v48 = vld [vmem:[#allocation6 + $0x20] sm:$0xff]  ;;  %v122_v55 = vld [vmem:[#allocation6 + $0x30] sm:$0xff]  ;;  %v6863_v61 = vld [vmem:[#allocation9 + $0x8] ss:$16 sps:$4 sm:$0xff]  }
  0x5f   :  { %351 = vmatpush1.bf16.msra.mxu1 %v6820_v19  ;;  %729 = vmatpush1.bf16.msra.mxu0 %v7650_v21  ;;  %v126_v52 = vpack.c.bf16 %v121_v49, %v120_v48  ;;  %v127_v59 = vpack.c.bf16 %v123_v56, %v122_v55  ;;  %v7695_v62 = vld [vmem:[#allocation11 + $0xec] ss:$16 sps:$4 sm:$0xff]   ;;  %v7699_v63 = vld [vmem:[#allocation11 + $0xe8] ss:$16 sps:$4 sm:$0xff]   ;;  %v162_v19 = vlaneseq }
  0x60   :  { %352 = vmatprep.subr.bf16.mxu1 %v6824_v20  ;;  %730 = vmatprep.subr.bf16.mxu0 %v7653_v22  ;;  %v7702_v1 = vld [vmem:[#allocation11 + $0xcc] ss:$16 sps:$4 sm:$0xff]   ;;  %v7706_v2 = vld [vmem:[#allocation11 + $0xc8] ss:$16 sps:$4 sm:$0xff]  }
  0x61   :  { %v7716_v5 = vld [vmem:[#allocation11 + $0xa8] ss:$16 sps:$4 sm:$0xff]   ;;  %v7718_v6 = vld [vmem:[#allocation11 + $0x8c] ss:$16 sps:$4 sm:$0xff]   ;;  %v7774_v20 = vshrl.u32 %v162_v19, 7 }
  0x62   :  { %v7732_v9 = vld [vmem:[#allocation11 + $0x4c] ss:$16 sps:$4 sm:$0xff]   ;;  %v7736_v10 = vld [vmem:[#allocation11 + $0x48] ss:$16 sps:$4 sm:$0xff]  }
  0x63   :  { %353 = vmatpush1.bf16.msra.mxu1 %v6826_v23  ;;  %731 = vmatpush1.bf16.msra.mxu0 %v7656_v25  ;;  %v7743_v12 = vld [vmem:[#allocation11 + $0x28] ss:$16 sps:$4 sm:$0xff]   ;;  %v7745_v15 = vld [vmem:[#allocation11 + $0xc] ss:$16 sps:$4 sm:$0xff]   ;;  %8821 = vst [vmem:[#allocation23_spill] sm:$0xff] %v7774_v20  ;;  %v8812_v23 = vsub.s32 0, %v7774_v20 }
  0x64   :  { %354 = vmatprep.subr.bf16.mxu1 %v6830_v24  ;;  %732 = vmatprep.subr.bf16.mxu0 %v7659_v26  ;;  %v7749_v16 = vld [vmem:[#allocation11 + $0x8] ss:$16 sps:$4 sm:$0xff]   ;;  %v160_v24 = vld [vmem:[%s8804_s3] sm:$0xf] }
  0x65   :  { %v165_v33 = vrot.slane %v160_v24, %v8812_v23 }
  0x67   :  { %355 = vmatpush1.bf16.msra.mxu1 %v6832_v27  ;;  %733 = vmatpush1.bf16.msra.mxu0 %v7662_v29 }
  0x68   :  { %356 = vmatprep.subr.bf16.mxu1 %v6836_v28  ;;  %734 = vmatprep.subr.bf16.mxu0 %v7665_v31  ;;  %v8811_v28 = vsub.s32 1, %v7774_v20 }
  0x6b   :  { %357 = vmatpush1.bf16.msra.mxu1 %v6838_v30  ;;  %735 = vmatpush1.bf16.msra.mxu0 %v7668_v35 }
  0x6c   :  { %415 = vmatprep.subr.bf16.mxu1 %v6844_v34  ;;  %1033 = vmatprep.subr.bf16.mxu0 %v7624_v3 }
  0x6e   :  { %375 = vmatmul.mubr.bf16.vlgmr.msra.gmra.mxu1 %v7671_v36  ;;  %753 = vmatmul.mubr.bf16.vlgmr.msra.gmra.mxu0 %v8813_v42 }
  0x6f   :  { %416 = vmatpush1.bf16.msra.mxu1 %v6842_v37  ;;  %384 = vmatprep.mubr.bf16.mxu1 %v8815_v0  ;;  %v169_v37 = vrot.slane %v160_v24, %v8811_v28 }
  0x70   :  { %417 = vmatprep.subr.bf16.mxu1 %v6847_v38  ;;  %1034 = vmatpush1.bf16.msra.mxu0 %v7626_v4  ;;  %v7710_v4 = vld [vmem:[#allocation11 + $0xac] ss:$16 sps:$4 sm:$0xff]  }
  0x71   :  { %1065 = vmatprep.mubr.bf16.mxu0 %v8815_v0  ;;  %1035 = vmatprep.subr.bf16.mxu0 %v7629_v7  ;;  %v7722_v7 = vld [vmem:[#allocation11 + $0x88] ss:$16 sps:$4 sm:$0xff]  }
  0x73   :  { %418 = vmatpush1.bf16.msra.mxu1 %v6845_v39 }
  0x74   :  { %419 = vmatprep.subr.bf16.mxu1 %v6850_v43  ;;  %1036 = vmatpush1.bf16.msra.mxu0 %v7632_v8  ;;  %v7725_v8 = vld [vmem:[#allocation11 + $0x6c] ss:$16 sps:$4 sm:$0xff]  }
  0x75   :  { %1037 = vmatprep.subr.bf16.mxu0 %v7635_v11  ;;  %v7738_v11 = vld [vmem:[#allocation11 + $0x2c] ss:$16 sps:$4 sm:$0xff]  }
  0x76   :  { %385 = vmatmul.mubr.bf16.gmra.mxu1 %v7680_v44 }
  0x77   :  { %420 = vmatpush1.bf16.msra.mxu1 %v6848_v45  ;;  %394 = vmatprep.mubr.bf16.mxu1 %v8815_v0 }
  0x78   :  { %421 = vmatprep.subr.bf16.mxu1 %v6853_v46  ;;  %1038 = vmatpush1.bf16.msra.mxu0 %v7638_v13 }
  0x79   :  { %1039 = vmatprep.subr.bf16.mxu0 %v7641_v14 }
  0x7b   :  { %422 = vmatpush1.bf16.msra.mxu1 %v6851_v47 }
  0x7c   :  { %423 = vmatprep.subr.bf16.mxu1 %v6856_v50  ;;  %1040 = vmatpush1.bf16.msra.mxu0 %v7644_v17 }
  0x7d   :  { %1041 = vmatprep.subr.bf16.mxu0 %v7647_v18 }
  0x7e   :  { %395 = vmatmul.mubr.bf16.gmra.mxu1 %v126_v52 }
  0x7f   :  { %424 = vmatpush1.bf16.msra.mxu1 %v6854_v51  ;;  %404 = vmatprep.mubr.bf16.mxu1 %v8815_v0 }
  0x80   :  { %425 = vmatprep.subr.bf16.mxu1 %v6859_v53  ;;  %1042 = vmatpush1.bf16.msra.mxu0 %v7650_v21 }
  0x81   :  { %1043 = vmatprep.subr.bf16.mxu0 %v7653_v22 }
  0x83   :  { %426 = vmatpush1.bf16.msra.mxu1 %v6857_v54 }
  0x84   :  { %427 = vmatprep.subr.bf16.mxu1 %v6862_v57  ;;  %1044 = vmatpush1.bf16.msra.mxu0 %v7656_v25 }
  0x85   :  { %1045 = vmatprep.subr.bf16.mxu0 %v7659_v26 }
  0x86   :  { %405 = vmatmul.mubr.bf16.gmra.mxu1 %v127_v59 }
  0x87   :  { %428 = vmatpush1.bf16.msra.mxu1 %v6860_v58  ;;  %447 = vmatprep.mubr.bf16.mxu1 %v8815_v0 }
  0x88   :  { %429 = vmatprep.subr.bf16.mxu1 %v6865_v60  ;;  %1046 = vmatpush1.bf16.msra.mxu0 %v7662_v29 }
  0x89   :  { %1047 = vmatprep.subr.bf16.mxu0 %v7665_v31 }
  0x8b   :  { %430 = vmatpush1.bf16.msra.mxu1 %v6863_v61 }
  0x8c   :  { %761 = vmatprep.subr.bf16.mxu1 %v7695_v62  ;;  %1048 = vmatpush1.bf16.msra.mxu0 %v7668_v35 }
  0x8d   :  { %1347 = vmatprep.subr.bf16.mxu0 %v7624_v3  ;;  %v7730_v3 = vld [vmem:[#allocation11 + $0x68] ss:$16 sps:$4 sm:$0xff]  }
  0x8e   :  { %448 = vmatmul.mubr.bf16.vlgmr.msra.gmra.mxu1 %v7671_v36 }
  0x8f   :  { %762 = vmatpush1.bf16.msra.mxu1 %v7699_v63  ;;  %457 = vmatprep.mubr.bf16.mxu1 %v8815_v0 }
  0x90   :  { %763 = vmatprep.subr.bf16.mxu1 %v7702_v1 }
  0x93   :  { %764 = vmatpush1.bf16.msra.mxu1 %v7706_v2 }
  0x94   :  { %765 = vmatprep.subr.bf16.mxu1 %v7710_v4 }
  0x96   :  { %458 = vmatmul.mubr.bf16.gmra.mxu1 %v7680_v44 }
  0x97   :  { %766 = vmatpush1.bf16.msra.mxu1 %v7716_v5  ;;  %467 = vmatprep.mubr.bf16.mxu1 %v8815_v0 }
  0x98   :  { %767 = vmatprep.subr.bf16.mxu1 %v7718_v6 }
  0x9b   :  { %768 = vmatpush1.bf16.msra.mxu1 %v7722_v7 }
  0x9c   :  { %769 = vmatprep.subr.bf16.mxu1 %v7725_v8 }
  0x9e   :  { %468 = vmatmul.mubr.bf16.gmra.mxu1 %v126_v52 }
  0x9f   :  { %770 = vmatpush1.bf16.msra.mxu1 %v7730_v3  ;;  %477 = vmatprep.mubr.bf16.mxu1 %v8815_v0 }
  0xa0   :  { %771 = vmatprep.subr.bf16.mxu1 %v7732_v9 }
  0xa3   :  { %772 = vmatpush1.bf16.msra.mxu1 %v7736_v10 }
  0xa4   :  { %773 = vmatprep.subr.bf16.mxu1 %v7738_v11 }
  0xa6   :  { %478 = vmatmul.mubr.bf16.gmra.mxu1 %v127_v59 }
  0xa7   :  { %774 = vmatpush1.bf16.msra.mxu1 %v7743_v12  ;;  %793 = vmatprep.mubr.bf16.mxu1 %v8815_v0 }
  0xa8   :  { %775 = vmatprep.subr.bf16.mxu1 %v7745_v15 }
  0xab   :  { %776 = vmatpush1.bf16.msra.mxu1 %v7749_v16 }
  0xac   :  { %1074 = vmatprep.subr.bf16.mxu1 %v7695_v62 }
  0xae   :  { %794 = vmatmul.mubr.bf16.vlgmr.msra.gmra.mxu1 %v8813_v42 }
  0xaf   :  { %1075 = vmatpush1.bf16.msra.mxu1 %v7699_v63  ;;  %1106 = vmatprep.mubr.bf16.mxu1 %v8815_v0 }
  0xb0   :  { %1076 = vmatprep.subr.bf16.mxu1 %v7702_v1 }
  0xb3   :  { %1077 = vmatpush1.bf16.msra.mxu1 %v7706_v2 }
  0xb4   :  { %1078 = vmatprep.subr.bf16.mxu1 %v7710_v4 }
  0xb7   :  { %1079 = vmatpush1.bf16.msra.mxu1 %v7716_v5 }
  0xb8   :  { %1080 = vmatprep.subr.bf16.mxu1 %v7718_v6 }
  0xbb   :  { %1081 = vmatpush1.bf16.msra.mxu1 %v7722_v7 }
  0xbc   :  { %1082 = vmatprep.subr.bf16.mxu1 %v7725_v8 }
  0xbf   :  { %1083 = vmatpush1.bf16.msra.mxu1 %v7730_v3 }
  0xc0   :  { %1084 = vmatprep.subr.bf16.mxu1 %v7732_v9 }
  0xc3   :  { %1085 = vmatpush1.bf16.msra.mxu1 %v7736_v10 }
  0xc4   :  { %1086 = vmatprep.subr.bf16.mxu1 %v7738_v11 }
  0xc7   :  { %1087 = vmatpush1.bf16.msra.mxu1 %v7743_v12 }
  0xc8   :  { %1088 = vmatprep.subr.bf16.mxu1 %v7745_v15 }
  0xcb   :  { %1089 = vmatpush1.bf16.msra.mxu1 %v7749_v16 }
  0xcc   :  { %1388 = vmatprep.subr.bf16.mxu1 %v7695_v62 }
 0x12e   :  { %v376_v27 = vpop.f32.mrf.mxu1  ;;  %v754_v32 = vpop.f32.mrf.mxu0 }
 0x130   :  { %v378_v30 = vpop.f32.mrf.mxu1  ;;  %v756_v36 = vpop.f32.mrf.mxu0 }
 0x132   :  { %v380_v34 = vpop.f32.mrf.mxu1  ;;  %v758_v40 = vpop.f32.mrf.mxu0 }
 0x133   :  { %v7785_v38 = vadd.f32 %v380_v34, %v165_v33 }
 0x134   :  { %v382_v39 = vpop.f32.mrf.mxu1  ;;  %v759_v44 = vpop.f32.mrf.mxu0 }
 0x135   :  { %v7787_v41 = vadd.f32 %v382_v39, %v169_v37 }
 0x136   :  { %v386_v43 = vpop.f32.mrf.mxu1 }
 0x137   :  { %v7789_v45 = vadd.f32 %v386_v43, %v165_v33 }
 0x138   :  { %v388_v46 = vpop.f32.mrf.mxu1 }
 0x139   :  { %v7791_v47 = vadd.f32 %v388_v46, %v169_v37  ;;  %v8817_v46 = vsub.s32 2, %v7774_v20 }
 0x13a   :  { %v390_v48 = vpop.f32.mrf.mxu1 }
 0x13b   :  { %v7793_v49 = vadd.f32 %v390_v48, %v165_v33 }
 0x13c   :  { %v392_v50 = vpop.f32.mrf.mxu1 }
 0x13d   :  { %v7795_v51 = vadd.f32 %v392_v50, %v169_v37  ;;  %v379_v50 = vadd.f32 %v378_v30, %v169_v37 }
 0x13e   :  { %v396_v52 = vpop.f32.mrf.mxu1 }
 0x13f   :  { %v7797_v53 = vadd.f32 %v396_v52, %v165_v33  ;;  %v8818_v52 = vsub.s32 3, %v7774_v20 }
 0x140   :  { %v398_v54 = vpop.f32.mrf.mxu1 }
 0x141   :  { %v7799_v55 = vadd.f32 %v398_v54, %v169_v37  ;;  %v377_v54 = vadd.f32 %v376_v27, %v165_v33 }
 0x142   :  { %v400_v56 = vpop.f32.mrf.mxu1 }
 0x143   :  { %v7801_v57 = vadd.f32 %v400_v56, %v165_v33 }
 0x144   :  { %v402_v58 = vpop.f32.mrf.mxu1 }
 0x145   :  { %8822 = vst [vmem:[#allocation24_spill] sm:$0xff] %v7801_v57  ;;  %v7803_v59 = vadd.f32 %v402_v58, %v169_v37  ;;  %v173_v58 = vrot.slane %v160_v24, %v8817_v46 }
 0x146   :  { %v406_v60 = vpop.f32.mrf.mxu1 }
 0x147   :  { %8823 = vst [vmem:[#allocation25_spill] sm:$0xff] %v7803_v59  ;;  %v7805_v61 = vadd.f32 %v406_v60, %v165_v33 }
 0x148   :  { %v408_v19 = vpop.f32.mrf.mxu1 }
 0x149   :  { %8824 = vst [vmem:[#allocation26_spill] sm:$0xff] %v7805_v61  ;;  %v7807_v34 = vadd.f32 %v408_v19, %v169_v37  ;;  %v803_v19 = vadd.f32 %v756_v36, %v379_v50 }
 0x14a   :  { %v410_v39 = vpop.f32.mrf.mxu1 }
 0x14b   :  { %8825 = vst [vmem:[#allocation27_spill] sm:$0xff] %v7807_v34  ;;  %v7809_v40 = vadd.f32 %v410_v39, %v165_v33  ;;  %v177_v39 = vrot.slane %v160_v24, %v8818_v52  ;;  %v6175_v30 = vmul.f32 -1.442695, %v803_v19 }
 0x14c   :  { %v412_v43 = vpop.f32.mrf.mxu1 }
 0x14d   :  { %8826 = vst [vmem:[#allocation28_spill] sm:$0xff] %v7809_v40  ;;  %v7811_v44 = vadd.f32 %v412_v43, %v169_v37  ;;  %v802_v43 = vadd.f32 %v754_v32, %v377_v54  ;;  %7114 = vpow2.f32 %v6175_v30 }
 0x14e   :  { %v449_v48 = vpop.f32.mrf.mxu1 }
 0x14f   :  { %8827 = vst [vmem:[#allocation29_spill] sm:$0xff] %v7811_v44  ;;  %v6174_v27 = vmul.f32 -1.442695, %v802_v43  ;;  %v450_v59 = vadd.f32 %v449_v48, %v173_v58 }
 0x150   :  { %v451_v56 = vpop.f32.mrf.mxu1 }
 0x151   :  { %7116 = vpow2.f32 %v6174_v27 }
 0x152   :  { %v453_v60 = vpop.f32.mrf.mxu1 }
 0x153   :  { %v7819_v28 = vadd.f32 %v453_v60, %v173_v58 }
 0x154   :  { %v455_v23 = vpop.f32.mrf.mxu1 }
 0x155   :  { %v7821_v42 = vadd.f32 %v455_v23, %v177_v39 }
 0x156   :  { %v459_v0 = vpop.f32.mrf.mxu1 }
 0x157   :  { %v7823_v37 = vadd.f32 %v459_v0, %v173_v58 }
 0x158   :  { %v461_v33 = vpop.f32.mrf.mxu1 }
 0x159   :  { %v7825_v44 = vadd.f32 %v461_v33, %v177_v39 }
 0x15a   :  { %v463_v46 = vpop.f32.mrf.mxu1 }
 0x15b   :  { %v7827_v36 = vadd.f32 %v463_v46, %v173_v58  ;;  %v7115_v46 = vpop.eup %7114 }
 0x15c   :  { %v465_v24 = vpop.f32.mrf.mxu1 }
 0x15d   :  { %v7829_v50 = vadd.f32 %v465_v24, %v177_v39 }
 0x15e   :  { %v469_v32 = vpop.f32.mrf.mxu1  ;;  %v7117_v20 = vpop.eup %7116 }
 0x15f   :  { %v7831_v54 = vadd.f32 %v469_v32, %v173_v58  ;;  %v815_v32 = vadd.f32 1.0, %v7115_v46 }
 0x160   :  { %v471_v23 = vpop.f32.mrf.mxu1 }
 0x161   :  { %8828 = vst [vmem:[#allocation30_spill] sm:$0xff] %v7831_v54  ;;  %v7833_v60 = vadd.f32 %v471_v23, %v177_v39  ;;  %v809_v23 = vadd.f32 1.0, %v7117_v20  ;;  %7118 = vrcp.f32 %v815_v32 }
 0x162   :  { %v473_v0 = vpop.f32.mrf.mxu1 }
 0x163   :  { %v7835_v19 = vadd.f32 %v473_v0, %v173_v58  ;;  %7120 = vrcp.f32 %v809_v23 }
 0x164   :  { %v475_v43 = vpop.f32.mrf.mxu1 }
 0x165   :  { %8829 = vst [vmem:[#allocation31_spill] sm:$0xff] %v7835_v19  ;;  %v7837_v33 = vadd.f32 %v475_v43, %v177_v39  ;;  %v452_v43 = vadd.f32 %v451_v56, %v177_v39 }
 0x166   :  { %v479_v52 = vpop.f32.mrf.mxu1 }
 0x167   :  { %8830 = vst [vmem:[#allocation32_spill] sm:$0xff] %v7837_v33  ;;  %v7839_v30 = vadd.f32 %v479_v52, %v173_v58 }
 0x168   :  { %v481_v27 = vpop.f32.mrf.mxu1 }
 0x169   :  { %8831 = vst [vmem:[#allocation33_spill] sm:$0xff] %v7839_v30  ;;  %v7841_v24 = vadd.f32 %v481_v27, %v177_v39 }
 0x16a   :  { %v483_v40 = vpop.f32.mrf.mxu1 }
 0x16b   :  { %8832 = vst [vmem:[#allocation34_spill] sm:$0xff] %v7841_v24  ;;  %v7843_v34 = vadd.f32 %v483_v40, %v173_v58 }
 0x16c   :  { %v485_v61 = vpop.f32.mrf.mxu1 }
 0x16d   :  { %8833 = vst [vmem:[#allocation35_spill] sm:$0xff] %v7843_v34  ;;  %v7845_v0 = vadd.f32 %v485_v61, %v177_v39 }
 0x16e   :  { %v795_v19 = vpop.f32.mrf.mxu1  ;;  %v7119_v46 = vpop.eup %7118 }
 0x16f   :  { %v804_v33 = vadd.f32 %v795_v19, %v450_v59  ;;  %v826_v20 = vmul.f32 0.0, %v7119_v46  ;;  %v7370_v19 = vld [vmem:[#allocation11 + $0xe0] ss:$16 sps:$4 sm:$0xff]  }
 0x170   :  { %v797_v52 = vpop.f32.mrf.mxu1  ;;  %v7121_v40 = vpop.eup %7120 }
 0x171   :  { %7122 = vtanh.f32 %v804_v33  ;;  %v805_v30 = vadd.f32 %v797_v52, %v452_v43  ;;  %v7372_v33 = vld [vmem:[#allocation11 + $0xc0] ss:$16 sps:$4 sm:$0xff]  }
 0x172   :  { %v799_v57 = vpop.f32.mrf.mxu1 }
 0x173   :  { %v6176_v27 = vmul.f32 -1.442695, %v805_v30  ;;  %v7373_v30 = vld [vmem:[#allocation11 + $0xa4] ss:$16 sps:$4 sm:$0xff]  }
 0x174   :  { %v800_v24 = vpop.f32.mrf.mxu1 }
 0x175   :  { %7124 = vpow2.f32 %v6176_v27 }
 0x17e   :  { %v7123_v34 = vpop.eup %7122 }
 0x17f   :  { %v827_v54 = vmul.f32 %v7123_v34, %v7121_v40  ;;  %v7371_v34 = vld [vmem:[#allocation11 + $0xc4] ss:$16 sps:$4 sm:$0xff]  }
 0x181   :  { %v7847_v48 = vadd.f32 %v827_v54, %v826_v20  ;;  %v8834_v54 = vmov 0  }
 0x182   :  { %v7125_v61 = vpop.eup %7124 }
 0x183   :  { %v822_v58 = vadd.f32 1.0, %v7125_v61  ;;  %7126 = vtanh.f32 %v7847_v48 }
 0x185   :  { %7128 = vrcp.f32 %v822_v58 }
 0x190   :  { %v7127_v59 = vpop.eup %7126 }
 0x192   :  { %v7129_v56 = vpop.eup %7128 }
 0x193   :  { %v7850_v39 = vmul.f32 %v7129_v56, %v7127_v59 }
 0x195   :  { %v840_v57 = vpack.c.bf16 %v7850_v39, %v7850_v39 }
 0x197   :  { %1066 = vmatmul.mubr.bf16.vlgmr.msra.gmra.mxu0 %v840_v57  ;;  %1107 = vmatmul.mubr.bf16.vlgmr.msra.gmra.mxu1 %v840_v57 }
 0x198   :  { %1348 = vmatpush1.bf16.msra.mxu0 %v7370_v19  ;;  %1389 = vmatpush1.bf16.msra.mxu1 %v7699_v63 }
 0x199   :  { %1349 = vmatprep.subr.bf16.mxu0 %v7371_v34  ;;  %1390 = vmatprep.subr.bf16.mxu1 %v7702_v1 }
 0x19a   :  { %1379 = vmatprep.mubr.bf16.mxu0 %v8834_v54  ;;  %1420 = vmatprep.mubr.bf16.mxu1 %v8834_v54 }
 0x19c   :  { %1350 = vmatpush1.bf16.msra.mxu0 %v7372_v33  ;;  %1391 = vmatpush1.bf16.msra.mxu1 %v7706_v2 }
 0x19d   :  { %1351 = vmatprep.subr.bf16.mxu0 %v7373_v30  ;;  %1392 = vmatprep.subr.bf16.mxu1 %v7710_v4 }
 0x1a0   :  { %1352 = vmatpush1.bf16.msra.mxu0 %v7638_v13  ;;  %1393 = vmatpush1.bf16.msra.mxu1 %v7716_v5 }
 0x1a1   :  { %1353 = vmatprep.subr.bf16.mxu0 %v7641_v14  ;;  %1394 = vmatprep.subr.bf16.mxu1 %v7718_v6 }
 0x1a4   :  { %1354 = vmatpush1.bf16.msra.mxu0 %v7644_v17  ;;  %1395 = vmatpush1.bf16.msra.mxu1 %v7722_v7 }
 0x1a5   :  { %1355 = vmatprep.subr.bf16.mxu0 %v7647_v18  ;;  %1396 = vmatprep.subr.bf16.mxu1 %v7725_v8 }
 0x1a8   :  { %1356 = vmatpush1.bf16.msra.mxu0 %v7650_v21  ;;  %1397 = vmatpush1.bf16.msra.mxu1 %v7730_v3 }
 0x1a9   :  { %1357 = vmatprep.subr.bf16.mxu0 %v7653_v22  ;;  %1398 = vmatprep.subr.bf16.mxu1 %v7732_v9 }
 0x1ac   :  { %1358 = vmatpush1.bf16.msra.mxu0 %v7656_v25  ;;  %1399 = vmatpush1.bf16.msra.mxu1 %v7736_v10 }
 0x1ad   :  { %1359 = vmatprep.subr.bf16.mxu0 %v7659_v26  ;;  %1400 = vmatprep.subr.bf16.mxu1 %v7738_v11 }
 0x1b0   :  { %1360 = vmatpush1.bf16.msra.mxu0 %v7662_v29  ;;  %1401 = vmatpush1.bf16.msra.mxu1 %v7743_v12 }
 0x1b1   :  { %1361 = vmatprep.subr.bf16.mxu0 %v7665_v31  ;;  %1402 = vmatprep.subr.bf16.mxu1 %v7745_v15 }
 0x1b4   :  { %1362 = vmatpush1.bf16.msra.mxu0 %v7668_v35  ;;  %1403 = vmatpush1.bf16.msra.mxu1 %v7749_v16 }
 0x1b5   :  { %1702 = vmatprep.subr.bf16.mxu1 %v7695_v62 }
 0x257   :  { %v1067_v13 = vpop.f32.mrf.mxu0  ;;  %v1108_v14 = vpop.f32.mrf.mxu1 }
 0x258   :  { %v1115_v17 = vadd.f32 %v1067_v13, %v7785_v38  ;;  %v1117_v62 = vadd.f32 %v1108_v14, %v7819_v28 }
 0x259   :  { %v1069_v18 = vpop.f32.mrf.mxu0  ;;  %v1110_v21 = vpop.f32.mrf.mxu1 }
 0x25a   :  { %v6209_v22 = vmul.f32 -1.442695, %v1115_v17  ;;  %v1116_v25 = vadd.f32 %v1069_v18, %v7787_v41  ;;  %v1118_v35 = vadd.f32 %v1110_v21, %v7821_v42 }
 0x25b   :  { %v1071_v26 = vpop.f32.mrf.mxu0  ;;  %v1112_v29 = vpop.f32.mrf.mxu1 }
 0x25c   :  { %7130 = vpow2.f32 %v6209_v22  ;;  %v6210_v31 = vmul.f32 -1.442695, %v1116_v25  ;;  %v6211_v23 = vmul.f32 -1.442695, %v1118_v35 }
 0x25d   :  { %v1072_v24 = vpop.f32.mrf.mxu0  ;;  %v1113_v32 = vpop.f32.mrf.mxu1 }
 0x25e   :  { %7132 = vpow2.f32 %v6210_v31 }
 0x25f   :  { %7134 = vtanh.f32 %v1117_v62 }
 0x260   :  { %7136 = vpow2.f32 %v6211_v23 }
 0x269   :  { %v7131_v43 = vpop.eup %7130 }
 0x26a   :  { %v1122_v52 = vadd.f32 1.0, %v7131_v43 }
 0x26b   :  { %v7133_v38 = vpop.eup %7132 }
 0x26c   :  { %7138 = vrcp.f32 %v1122_v52  ;;  %v1128_v27 = vadd.f32 1.0, %v7133_v38  ;;  %v7135_v41 = vpop.eup %7134 }
 0x26d   :  { %v7137_v46 = vpop.eup %7136 }
 0x26e   :  { %7140 = vrcp.f32 %v1128_v27  ;;  %v1135_v58 = vadd.f32 1.0, %v7137_v46 }
 0x270   :  { %7142 = vrcp.f32 %v1135_v58  ;;  %v7991_v58 = vld [vmem:[#allocation11 + $0xec] ss:$16 sps:$4 sm:$0xff]  }
 0x279   :  { %v7139_v40 = vpop.eup %7138 }
 0x27a   :  { %v1140_v20 = vmul.f32 %v7139_v40, %v7135_v41 }
 0x27b   :  { %v7141_v61 = vpop.eup %7140 }
 0x27c   :  { %v1139_v59 = vmul.f32 %v7141_v61, %v7847_v48  ;;  %v7956_v48 = vld [vmem:[#allocation11] ss:$16 sps:$4 sm:$0xff]  }
 0x27d   :  { %v7143_v28 = vpop.eup %7142 }
 0x27e   :  { %v7888_v42 = vadd.f32 %v1140_v20, %v1139_v59  ;;  %v7993_v59 = vld [vmem:[#allocation11 + $0xe8] ss:$16 sps:$4 sm:$0xff]  }
 0x280   :  { %7144 = vtanh.f32 %v7888_v42 }
 0x28d   :  { %v7145_v56 = vpop.eup %7144 }
 0x28e   :  { %v7891_v57 = vmul.f32 %v7145_v56, %v7143_v28  ;;  %v7999_v28 = vld [vmem:[#allocation11 + $0xc8] ss:$16 sps:$4 sm:$0xff]   ;;  %v8003_v56 = vld [vmem:[#allocation11 + $0xac] ss:$16 sps:$4 sm:$0xff]  }
 0x290   :  { %v1154_v19 = vpack.c.bf16 %v7891_v57, %v7891_v57 }
 0x292   :  { %1380 = vmatmul.mubr.bf16.vlgmr.msra.gmra.mxu0 %v1154_v19  ;;  %1421 = vmatmul.mubr.bf16.vlgmr.msra.gmra.mxu1 %v1154_v19  ;;  %v8005_v19 = vld [vmem:[#allocation11 + $0xa8] ss:$16 sps:$4 sm:$0xff]  }
 0x293   :  { %1703 = vmatpush1.bf16.msra.mxu1 %v7699_v63  ;;  %1693 = vmatprep.mubr.bf16.mxu0 %v8834_v54  ;;  %v7912_v63 = vld [vmem:[#allocation11 + $0xe4] ss:$16 sps:$4 sm:$0xff]  }
 0x294   :  { %1704 = vmatprep.subr.bf16.mxu1 %v7702_v1  ;;  %1734 = vmatprep.mubr.bf16.mxu1 %v8834_v54  ;;  %v7914_v1 = vld [vmem:[#allocation11 + $0xe0] ss:$16 sps:$4 sm:$0xff]  }
 0x295   :  { %1661 = vmatprep.subr.bf16.mxu0 %v7912_v63 }
 0x296   :  { %1662 = vmatpush1.bf16.msra.mxu0 %v7914_v1 }
 0x297   :  { %1705 = vmatpush1.bf16.msra.mxu1 %v7706_v2  ;;  %v7918_v2 = vld [vmem:[#allocation11 + $0xc4] ss:$16 sps:$4 sm:$0xff]  }
 0x298   :  { %1706 = vmatprep.subr.bf16.mxu1 %v7710_v4  ;;  %v7920_v4 = vld [vmem:[#allocation11 + $0xc0] ss:$16 sps:$4 sm:$0xff]   ;;  %1663 = vmatprep.subr.bf16.mxu0 %v7918_v2 }
 0x29a   :  { %1664 = vmatpush1.bf16.msra.mxu0 %v7920_v4 }
 0x29b   :  { %1707 = vmatpush1.bf16.msra.mxu1 %v7716_v5  ;;  %v7924_v5 = vld [vmem:[#allocation11 + $0xa4] ss:$16 sps:$4 sm:$0xff]  }
 0x29c   :  { %1708 = vmatprep.subr.bf16.mxu1 %v7718_v6  ;;  %v7926_v6 = vld [vmem:[#allocation11 + $0xa0] ss:$16 sps:$4 sm:$0xff]   ;;  %1665 = vmatprep.subr.bf16.mxu0 %v7924_v5 }
 0x29e   :  { %1666 = vmatpush1.bf16.msra.mxu0 %v7926_v6 }
 0x29f   :  { %1709 = vmatpush1.bf16.msra.mxu1 %v7722_v7  ;;  %v7930_v7 = vld [vmem:[#allocation11 + $0x84] ss:$16 sps:$4 sm:$0xff]  }
 0x2a0   :  { %1710 = vmatprep.subr.bf16.mxu1 %v7725_v8  ;;  %v7932_v8 = vld [vmem:[#allocation11 + $0x80] ss:$16 sps:$4 sm:$0xff]   ;;  %1667 = vmatprep.subr.bf16.mxu0 %v7930_v7 }
 0x2a2   :  { %1668 = vmatpush1.bf16.msra.mxu0 %v7932_v8 }
 0x2a3   :  { %1711 = vmatpush1.bf16.msra.mxu1 %v7730_v3  ;;  %v7934_v3 = vld [vmem:[#allocation11 + $0x64] ss:$16 sps:$4 sm:$0xff]  }
 0x2a4   :  { %1712 = vmatprep.subr.bf16.mxu1 %v7732_v9  ;;  %v7938_v9 = vld [vmem:[#allocation11 + $0x60] ss:$16 sps:$4 sm:$0xff]   ;;  %1669 = vmatprep.subr.bf16.mxu0 %v7934_v3 }
 0x2a6   :  { %1670 = vmatpush1.bf16.msra.mxu0 %v7938_v9 }
 0x2a7   :  { %1713 = vmatpush1.bf16.msra.mxu1 %v7736_v10  ;;  %v7941_v10 = vld [vmem:[#allocation11 + $0x44] ss:$16 sps:$4 sm:$0xff]  }
 0x2a8   :  { %1714 = vmatprep.subr.bf16.mxu1 %v7738_v11  ;;  %v7944_v11 = vld [vmem:[#allocation11 + $0x40] ss:$16 sps:$4 sm:$0xff]   ;;  %1671 = vmatprep.subr.bf16.mxu0 %v7941_v10 }
 0x2aa   :  { %1672 = vmatpush1.bf16.msra.mxu0 %v7944_v11 }
 0x2ab   :  { %1715 = vmatpush1.bf16.msra.mxu1 %v7743_v12  ;;  %v7947_v12 = vld [vmem:[#allocation11 + $0x24] ss:$16 sps:$4 sm:$0xff]  }
 0x2ac   :  { %1716 = vmatprep.subr.bf16.mxu1 %v7745_v15  ;;  %v7950_v15 = vld [vmem:[#allocation11 + $0x20] ss:$16 sps:$4 sm:$0xff]   ;;  %1673 = vmatprep.subr.bf16.mxu0 %v7947_v12 }
 0x2ae   :  { %1674 = vmatpush1.bf16.msra.mxu0 %v7950_v15 }
 0x2af   :  { %1717 = vmatpush1.bf16.msra.mxu1 %v7749_v16  ;;  %v7953_v16 = vld [vmem:[#allocation11 + $0x4] ss:$16 sps:$4 sm:$0xff]  }
 0x2b0   :  { %1675 = vmatprep.subr.bf16.mxu0 %v7953_v16  ;;  %2016 = vmatprep.subr.bf16.mxu1 %v7991_v58 }
 0x2b2   :  { %1676 = vmatpush1.bf16.msra.mxu0 %v7956_v48 }
 0x2b3   :  { %1975 = vmatprep.subr.bf16.mxu0 %v7912_v63 }
 0x352   :  { %v1381_v34 = vpop.f32.mrf.mxu0  ;;  %v1422_v33 = vpop.f32.mrf.mxu1 }
 0x353   :  { %v1429_v30 = vadd.f32 %v1381_v34, %v7789_v45  ;;  %v1431_v24 = vadd.f32 %v1422_v33, %v7823_v37  ;;  %v8009_v34 = vld [vmem:[#allocation11 + $0x8c] ss:$16 sps:$4 sm:$0xff]   ;;  %v8011_v33 = vld [vmem:[#allocation11 + $0x88] ss:$16 sps:$4 sm:$0xff]  }
 0x354   :  { %v1383_v13 = vpop.f32.mrf.mxu0  ;;  %v1424_v14 = vpop.f32.mrf.mxu1 }
 0x355   :  { %v6244_v17 = vmul.f32 -1.442695, %v1429_v30  ;;  %v1430_v18 = vadd.f32 %v1383_v13, %v7791_v47  ;;  %v1432_v31 = vadd.f32 %v1424_v14, %v7825_v44  ;;  %v8013_v30 = vld [vmem:[#allocation11 + $0x6c] ss:$16 sps:$4 sm:$0xff]   ;;  %v8017_v13 = vld [vmem:[#allocation11 + $0x68] ss:$16 sps:$4 sm:$0xff]  }
 0x356   :  { %v1385_v21 = vpop.f32.mrf.mxu0  ;;  %v1426_v22 = vpop.f32.mrf.mxu1  ;;  %v8020_v14 = vld [vmem:[#allocation11 + $0x4c] ss:$16 sps:$4 sm:$0xff]  }
 0x357   :  { %7146 = vpow2.f32 %v6244_v17  ;;  %v6245_v25 = vmul.f32 -1.442695, %v1430_v18  ;;  %v6246_v32 = vmul.f32 -1.442695, %v1432_v31  ;;  %v8023_v17 = vld [vmem:[#allocation11 + $0x48] ss:$16 sps:$4 sm:$0xff]  }
 0x358   :  { %v1386_v26 = vpop.f32.mrf.mxu0  ;;  %v1427_v29 = vpop.f32.mrf.mxu1  ;;  %v8026_v18 = vld [vmem:[#allocation11 + $0x2c] ss:$16 sps:$4 sm:$0xff]   ;;  %v8029_v21 = vld [vmem:[#allocation11 + $0x28] ss:$16 sps:$4 sm:$0xff]  }
 0x359   :  { %7148 = vpow2.f32 %v6245_v25  ;;  %v8032_v22 = vld [vmem:[#allocation11 + $0xc] ss:$16 sps:$4 sm:$0xff]   ;;  %v8035_v25 = vld [vmem:[#allocation11 + $0x8] ss:$16 sps:$4 sm:$0xff]  }
 0x35a   :  { %7150 = vtanh.f32 %v1431_v24 }
 0x35b   :  { %7152 = vpow2.f32 %v6246_v32 }
 0x364   :  { %v7147_v35 = vpop.eup %7146 }
 0x365   :  { %v1436_v62 = vadd.f32 1.0, %v7147_v35 }
 0x366   :  { %v7149_v45 = vpop.eup %7148 }
 0x367   :  { %7154 = vrcp.f32 %v1436_v62  ;;  %v1442_v23 = vadd.f32 1.0, %v7149_v45  ;;  %v7151_v47 = vpop.eup %7150 }
 0x368   :  { %v7153_v43 = vpop.eup %7152 }
 0x369   :  { %7156 = vrcp.f32 %v1442_v23  ;;  %v1449_v41 = vadd.f32 1.0, %v7153_v43 }
 0x36b   :  { %7158 = vrcp.f32 %v1449_v41 }
 0x374   :  { %v7155_v52 = vpop.eup %7154 }
 0x375   :  { %v1454_v38 = vmul.f32 %v7155_v52, %v7151_v47 }
 0x376   :  { %v7157_v27 = vpop.eup %7156 }
 0x377   :  { %v1453_v46 = vmul.f32 %v7157_v27, %v7888_v42  ;;  %v7997_v42 = vld [vmem:[#allocation11 + $0xcc] ss:$16 sps:$4 sm:$0xff]  }
 0x378   :  { %v7159_v37 = vpop.eup %7158 }
 0x379   :  { %v7966_v44 = vadd.f32 %v1454_v38, %v1453_v46 }
 0x37b   :  { %7160 = vtanh.f32 %v7966_v44 }
 0x388   :  { %v7161_v40 = vpop.eup %7160 }
 0x389   :  { %v7969_v20 = vmul.f32 %v7161_v40, %v7159_v37 }
 0x38b   :  { %v1468_v61 = vpack.c.bf16 %v7969_v20, %v7969_v20 }
 0x38d   :  { %1694 = vmatmul.mubr.bf16.vlgmr.msra.gmra.mxu0 %v1468_v61  ;;  %1735 = vmatmul.mubr.bf16.vlgmr.msra.gmra.mxu1 %v1468_v61 }
 0x38e   :  { %1976 = vmatpush1.bf16.msra.mxu0 %v7914_v1  ;;  %2007 = vmatprep.mubr.bf16.mxu0 %v8834_v54 }
 0x38f   :  { %1977 = vmatprep.subr.bf16.mxu0 %v7918_v2  ;;  %2048 = vmatprep.mubr.bf16.mxu1 %v8834_v54 }
 0x390   :  { %2017 = vmatpush1.bf16.msra.mxu1 %v7993_v59 }
 0x391   :  { %2018 = vmatprep.subr.bf16.mxu1 %v7997_v42 }
 0x392   :  { %1978 = vmatpush1.bf16.msra.mxu0 %v7920_v4 }
 0x393   :  { %1979 = vmatprep.subr.bf16.mxu0 %v7924_v5 }
 0x394   :  { %2019 = vmatpush1.bf16.msra.mxu1 %v7999_v28 }
 0x395   :  { %2020 = vmatprep.subr.bf16.mxu1 %v8003_v56 }
 0x396   :  { %1980 = vmatpush1.bf16.msra.mxu0 %v7926_v6 }
 0x397   :  { %1981 = vmatprep.subr.bf16.mxu0 %v7930_v7 }
 0x398   :  { %2021 = vmatpush1.bf16.msra.mxu1 %v8005_v19 }
 0x399   :  { %2022 = vmatprep.subr.bf16.mxu1 %v8009_v34 }
 0x39a   :  { %1982 = vmatpush1.bf16.msra.mxu0 %v7932_v8 }
 0x39b   :  { %1983 = vmatprep.subr.bf16.mxu0 %v7934_v3 }
 0x39c   :  { %2023 = vmatpush1.bf16.msra.mxu1 %v8011_v33 }
 0x39d   :  { %2024 = vmatprep.subr.bf16.mxu1 %v8013_v30 }
 0x39e   :  { %1984 = vmatpush1.bf16.msra.mxu0 %v7938_v9 }
 0x39f   :  { %1985 = vmatprep.subr.bf16.mxu0 %v7941_v10 }
 0x3a0   :  { %2025 = vmatpush1.bf16.msra.mxu1 %v8017_v13 }
 0x3a1   :  { %2026 = vmatprep.subr.bf16.mxu1 %v8020_v14 }
 0x3a2   :  { %1986 = vmatpush1.bf16.msra.mxu0 %v7944_v11 }
 0x3a3   :  { %1987 = vmatprep.subr.bf16.mxu0 %v7947_v12 }
 0x3a4   :  { %2027 = vmatpush1.bf16.msra.mxu1 %v8023_v17 }
 0x3a5   :  { %2028 = vmatprep.subr.bf16.mxu1 %v8026_v18 }
 0x3a6   :  { %1988 = vmatpush1.bf16.msra.mxu0 %v7950_v15 }
 0x3a7   :  { %1989 = vmatprep.subr.bf16.mxu0 %v7953_v16 }
 0x3a8   :  { %2029 = vmatpush1.bf16.msra.mxu1 %v8029_v21 }
 0x3a9   :  { %2030 = vmatprep.subr.bf16.mxu1 %v8032_v22 }
 0x3aa   :  { %1990 = vmatpush1.bf16.msra.mxu0 %v7956_v48 }
 0x3ab   :  { %2289 = vmatprep.subr.bf16.mxu0 %v7912_v63 }
 0x3ac   :  { %2031 = vmatpush1.bf16.msra.mxu1 %v8035_v25 }
 0x3ad   :  { %2330 = vmatprep.subr.bf16.mxu1 %v7991_v58 }
 0x44d   :  { %v1695_v26 = vpop.f32.mrf.mxu0  ;;  %v1736_v29 = vpop.f32.mrf.mxu1 }
 0x44e   :  { %v1743_v31 = vadd.f32 %v1695_v26, %v7793_v49  ;;  %v1745_v27 = vadd.f32 %v1736_v29, %v7827_v36 }
 0x44f   :  { %v1697_v24 = vpop.f32.mrf.mxu0  ;;  %v1738_v32 = vpop.f32.mrf.mxu1 }
 0x450   :  { %v6279_v35 = vmul.f32 -1.442695, %v1743_v31  ;;  %v1744_v62 = vadd.f32 %v1697_v24, %v7795_v51  ;;  %v1746_v38 = vadd.f32 %v1738_v32, %v7829_v50 }
 0x451   :  { %v1699_v45 = vpop.f32.mrf.mxu0  ;;  %v1740_v23 = vpop.f32.mrf.mxu1 }
 0x452   :  { %7162 = vpow2.f32 %v6279_v35  ;;  %v6280_v47 = vmul.f32 -1.442695, %v1744_v62  ;;  %v6281_v41 = vmul.f32 -1.442695, %v1746_v38 }
 0x453   :  { %v1700_v43 = vpop.f32.mrf.mxu0  ;;  %v1741_v52 = vpop.f32.mrf.mxu1 }
 0x454   :  { %7164 = vpow2.f32 %v6280_v47 }
 0x455   :  { %7166 = vtanh.f32 %v1745_v27 }
 0x456   :  { %7168 = vpow2.f32 %v6281_v41 }
 0x45f   :  { %v7163_v46 = vpop.eup %7162 }
 0x460   :  { %v1750_v37 = vadd.f32 1.0, %v7163_v46 }
 0x461   :  { %v7165_v49 = vpop.eup %7164 }
 0x462   :  { %7170 = vrcp.f32 %v1750_v37  ;;  %v1756_v40 = vadd.f32 1.0, %v7165_v49  ;;  %v7167_v51 = vpop.eup %7166 }
 0x463   :  { %v7169_v61 = vpop.eup %7168 }
 0x464   :  { %7172 = vrcp.f32 %v1756_v40  ;;  %v1763_v35 = vadd.f32 1.0, %v7169_v61 }
 0x466   :  { %7174 = vrcp.f32 %v1763_v35 }
 0x46f   :  { %v7171_v26 = vpop.eup %7170 }
 0x470   :  { %v1768_v31 = vmul.f32 %v7171_v26, %v7167_v51  ;;  %v8835_v51 = vld [vmem:[#allocation30_spill] sm:$0xff] }
 0x471   :  { %v7173_v24 = vpop.eup %7172 }
 0x472   :  { %v1767_v62 = vmul.f32 %v7173_v24, %v7966_v44 }
 0x473   :  { %v7175_v36 = vpop.eup %7174 }
 0x474   :  { %v8045_v50 = vadd.f32 %v1768_v31, %v1767_v62 }
 0x476   :  { %7176 = vtanh.f32 %v8045_v50 }
 0x483   :  { %v7177_v29 = vpop.eup %7176 }
 0x484   :  { %v8048_v32 = vmul.f32 %v7177_v29, %v7175_v36 }
 0x486   :  { %v1782_v45 = vpack.c.bf16 %v8048_v32, %v8048_v32 }
 0x488   :  { %2008 = vmatmul.mubr.bf16.vlgmr.msra.gmra.mxu0 %v1782_v45  ;;  %2049 = vmatmul.mubr.bf16.vlgmr.msra.gmra.mxu1 %v1782_v45 }
 0x489   :  { %2290 = vmatpush1.bf16.msra.mxu0 %v7914_v1  ;;  %2331 = vmatpush1.bf16.msra.mxu1 %v7993_v59 }
 0x48a   :  { %2291 = vmatprep.subr.bf16.mxu0 %v7918_v2  ;;  %2332 = vmatprep.subr.bf16.mxu1 %v7997_v42 }
 0x48b   :  { %2321 = vmatprep.mubr.bf16.mxu0 %v8834_v54  ;;  %2362 = vmatprep.mubr.bf16.mxu1 %v8834_v54 }
 0x48d   :  { %2292 = vmatpush1.bf16.msra.mxu0 %v7920_v4  ;;  %2333 = vmatpush1.bf16.msra.mxu1 %v7999_v28 }
 0x48e   :  { %2293 = vmatprep.subr.bf16.mxu0 %v7924_v5  ;;  %2334 = vmatprep.subr.bf16.mxu1 %v8003_v56 }
 0x491   :  { %2294 = vmatpush1.bf16.msra.mxu0 %v7926_v6  ;;  %2335 = vmatpush1.bf16.msra.mxu1 %v8005_v19 }
 0x492   :  { %2295 = vmatprep.subr.bf16.mxu0 %v7930_v7  ;;  %2336 = vmatprep.subr.bf16.mxu1 %v8009_v34 }
 0x495   :  { %2296 = vmatpush1.bf16.msra.mxu0 %v7932_v8  ;;  %2337 = vmatpush1.bf16.msra.mxu1 %v8011_v33 }
 0x496   :  { %2297 = vmatprep.subr.bf16.mxu0 %v7934_v3  ;;  %2338 = vmatprep.subr.bf16.mxu1 %v8013_v30 }
 0x499   :  { %2298 = vmatpush1.bf16.msra.mxu0 %v7938_v9  ;;  %2339 = vmatpush1.bf16.msra.mxu1 %v8017_v13 }
 0x49a   :  { %2299 = vmatprep.subr.bf16.mxu0 %v7941_v10  ;;  %2340 = vmatprep.subr.bf16.mxu1 %v8020_v14 }
 0x49d   :  { %2300 = vmatpush1.bf16.msra.mxu0 %v7944_v11  ;;  %2341 = vmatpush1.bf16.msra.mxu1 %v8023_v17 }
 0x49e   :  { %2301 = vmatprep.subr.bf16.mxu0 %v7947_v12  ;;  %2342 = vmatprep.subr.bf16.mxu1 %v8026_v18 }
 0x4a1   :  { %2302 = vmatpush1.bf16.msra.mxu0 %v7950_v15  ;;  %2343 = vmatpush1.bf16.msra.mxu1 %v8029_v21 }
 0x4a2   :  { %2303 = vmatprep.subr.bf16.mxu0 %v7953_v16  ;;  %2344 = vmatprep.subr.bf16.mxu1 %v8032_v22 }
 0x4a5   :  { %2304 = vmatpush1.bf16.msra.mxu0 %v7956_v48  ;;  %2345 = vmatpush1.bf16.msra.mxu1 %v8035_v25 }
 0x4a6   :  { %2603 = vmatprep.subr.bf16.mxu0 %v7912_v63  ;;  %2644 = vmatprep.subr.bf16.mxu1 %v7991_v58 }
 0x548   :  { %v2009_v44 = vpop.f32.mrf.mxu0  ;;  %v2050_v23 = vpop.f32.mrf.mxu1 }
 0x549   :  { %v2057_v47 = vadd.f32 %v2009_v44, %v7797_v53  ;;  %v2059_v61 = vadd.f32 %v2050_v23, %v8835_v51 }
 0x54a   :  { %v2011_v43 = vpop.f32.mrf.mxu0  ;;  %v2052_v52 = vpop.f32.mrf.mxu1 }
 0x54b   :  { %v6314_v38 = vmul.f32 -1.442695, %v2057_v47  ;;  %v2058_v27 = vadd.f32 %v2011_v43, %v7799_v55  ;;  %v2060_v63 = vadd.f32 %v2052_v52, %v7833_v60 }
 0x54c   :  { %v2013_v41 = vpop.f32.mrf.mxu0  ;;  %v2054_v46 = vpop.f32.mrf.mxu1 }
 0x54d   :  { %7178 = vpow2.f32 %v6314_v38  ;;  %v6315_v37 = vmul.f32 -1.442695, %v2058_v27  ;;  %v6316_v26 = vmul.f32 -1.442695, %v2060_v63  ;;  %v8839_v27 = vld [vmem:[#allocation31_spill] sm:$0xff] }
 0x54e   :  { %v2014_v49 = vpop.f32.mrf.mxu0  ;;  %v2055_v40 = vpop.f32.mrf.mxu1 }
 0x54f   :  { %7180 = vpow2.f32 %v6315_v37 }
 0x550   :  { %7182 = vtanh.f32 %v2059_v61 }
 0x551   :  { %7184 = vpow2.f32 %v6316_v26 }
 0x55a   :  { %v7179_v31 = vpop.eup %7178 }
 0x55b   :  { %v2064_v24 = vadd.f32 1.0, %v7179_v31 }
 0x55c   :  { %v7181_v53 = vpop.eup %7180 }
 0x55d   :  { %7186 = vrcp.f32 %v2064_v24  ;;  %v2070_v35 = vadd.f32 1.0, %v7181_v53  ;;  %v7183_v55 = vpop.eup %7182 }
 0x55e   :  { %v7185_v62 = vpop.eup %7184 }
 0x55f   :  { %7188 = vrcp.f32 %v2070_v35  ;;  %v2077_v44 = vadd.f32 1.0, %v7185_v62 }
 0x561   :  { %7190 = vrcp.f32 %v2077_v44  ;;  %v6959_v44 = vld [vmem:[#allocation11] ss:$16 sps:$4 sm:$0xff]  }
 0x56a   :  { %v7187_v36 = vpop.eup %7186 }
 0x56b   :  { %v2082_v29 = vmul.f32 %v7187_v36, %v7183_v55 }
 0x56c   :  { %v7189_v45 = vpop.eup %7188 }
 0x56d   :  { %v2081_v47 = vmul.f32 %v7189_v45, %v8045_v50  ;;  %v6961_v45 = vld [vmem:[#allocation11 + $0x4] ss:$16 sps:$4 sm:$0xff]  }
 0x56e   :  { %v7191_v23 = vpop.eup %7190 }
 0x56f   :  { %v8091_v60 = vadd.f32 %v2082_v29, %v2081_v47  ;;  %v6964_v47 = vld [vmem:[#allocation12 + $0xe4] ss:$16 sps:$4 sm:$0xff]  }
 0x571   :  { %7192 = vtanh.f32 %v8091_v60 }
 0x57e   :  { %v7193_v43 = vpop.eup %7192 }
 0x57f   :  { %v8094_v52 = vmul.f32 %v7193_v43, %v7191_v23  ;;  %v8840_v43 = vld [vmem:[#allocation26_spill] sm:$0xff] }
 0x581   :  { %v2096_v38 = vpack.c.bf16 %v8094_v52, %v8094_v52 }
 0x583   :  { %2322 = vmatmul.mubr.bf16.vlgmr.msra.gmra.mxu0 %v2096_v38  ;;  %2363 = vmatmul.mubr.bf16.vlgmr.msra.gmra.mxu1 %v2096_v38 }
 0x584   :  { %2604 = vmatpush1.bf16.msra.mxu0 %v7914_v1  ;;  %2645 = vmatpush1.bf16.msra.mxu1 %v7993_v59 }
 0x585   :  { %2605 = vmatprep.subr.bf16.mxu0 %v7918_v2  ;;  %2646 = vmatprep.subr.bf16.mxu1 %v7997_v42 }
 0x586   :  { %2635 = vmatprep.mubr.bf16.mxu0 %v8834_v54  ;;  %2676 = vmatprep.mubr.bf16.mxu1 %v8834_v54 }
 0x588   :  { %2606 = vmatpush1.bf16.msra.mxu0 %v7920_v4  ;;  %2647 = vmatpush1.bf16.msra.mxu1 %v7999_v28  ;;  %v8836_v4 = vld [vmem:[#allocation24_spill] sm:$0xff] }
 0x589   :  { %2607 = vmatprep.subr.bf16.mxu0 %v7924_v5  ;;  %2648 = vmatprep.subr.bf16.mxu1 %v8003_v56 }
 0x58c   :  { %2608 = vmatpush1.bf16.msra.mxu0 %v7926_v6  ;;  %2649 = vmatpush1.bf16.msra.mxu1 %v8005_v19 }
 0x58d   :  { %2609 = vmatprep.subr.bf16.mxu0 %v7930_v7  ;;  %2650 = vmatprep.subr.bf16.mxu1 %v8009_v34 }
 0x590   :  { %2610 = vmatpush1.bf16.msra.mxu0 %v7932_v8  ;;  %2651 = vmatpush1.bf16.msra.mxu1 %v8011_v33 }
 0x591   :  { %2611 = vmatprep.subr.bf16.mxu0 %v7934_v3  ;;  %2652 = vmatprep.subr.bf16.mxu1 %v8013_v30  ;;  %v8837_v3 = vld [vmem:[#allocation25_spill] sm:$0xff] }
 0x594   :  { %2612 = vmatpush1.bf16.msra.mxu0 %v7938_v9  ;;  %2653 = vmatpush1.bf16.msra.mxu1 %v8017_v13 }
 0x595   :  { %2613 = vmatprep.subr.bf16.mxu0 %v7941_v10  ;;  %2654 = vmatprep.subr.bf16.mxu1 %v8020_v14 }
 0x598   :  { %2614 = vmatpush1.bf16.msra.mxu0 %v7944_v11  ;;  %2655 = vmatpush1.bf16.msra.mxu1 %v8023_v17 }
 0x599   :  { %2615 = vmatprep.subr.bf16.mxu0 %v7947_v12  ;;  %2656 = vmatprep.subr.bf16.mxu1 %v8026_v18 }
 0x59c   :  { %2616 = vmatpush1.bf16.msra.mxu0 %v7950_v15  ;;  %2657 = vmatpush1.bf16.msra.mxu1 %v8029_v21 }
 0x59d   :  { %2617 = vmatprep.subr.bf16.mxu0 %v7953_v16  ;;  %2658 = vmatprep.subr.bf16.mxu1 %v8032_v22 }
 0x5a0   :  { %2618 = vmatpush1.bf16.msra.mxu0 %v7956_v48  ;;  %2659 = vmatpush1.bf16.msra.mxu1 %v8035_v25  ;;  %v8838_v48 = vld [vmem:[#allocation32_spill] sm:$0xff] }
 0x5a1   :  { %2958 = vmatprep.subr.bf16.mxu1 %v7991_v58 }
 0x643   :  { %v2323_v1 = vpop.f32.mrf.mxu0  ;;  %v2364_v2 = vpop.f32.mrf.mxu1 }
 0x644   :  { %v2371_v5 = vadd.f32 %v2323_v1, %v8836_v4  ;;  %v2373_v58 = vadd.f32 %v2364_v2, %v8839_v27 }
 0x645   :  { %v2325_v6 = vpop.f32.mrf.mxu0  ;;  %v2366_v7 = vpop.f32.mrf.mxu1 }
 0x646   :  { %v6349_v8 = vmul.f32 -1.442695, %v2371_v5  ;;  %v2372_v9 = vadd.f32 %v2325_v6, %v8837_v3  ;;  %v2374_v50 = vadd.f32 %v2366_v7, %v8838_v48  ;;  %v8841_v5 = vld [vmem:[#allocation27_spill] sm:$0xff] }
 0x647   :  { %v2327_v10 = vpop.f32.mrf.mxu0  ;;  %v2368_v11 = vpop.f32.mrf.mxu1 }
 0x648   :  { %7194 = vpow2.f32 %v6349_v8  ;;  %v6350_v12 = vmul.f32 -1.442695, %v2372_v9  ;;  %v6351_v41 = vmul.f32 -1.442695, %v2374_v50  ;;  %v8842_v11 = vld [vmem:[#allocation34_spill] sm:$0xff] }
 0x649   :  { %v2328_v15 = vpop.f32.mrf.mxu0  ;;  %v2369_v16 = vpop.f32.mrf.mxu1 }
 0x64a   :  { %7196 = vpow2.f32 %v6350_v12  ;;  %v8843_v15 = vld [vmem:[#allocation33_spill] sm:$0xff] }
 0x64b   :  { %7198 = vtanh.f32 %v2373_v58 }
 0x64c   :  { %7200 = vpow2.f32 %v6351_v41 }
 0x655   :  { %v7195_v46 = vpop.eup %7194 }
 0x656   :  { %v2378_v37 = vadd.f32 1.0, %v7195_v46 }
 0x657   :  { %v7197_v49 = vpop.eup %7196 }
 0x658   :  { %7202 = vrcp.f32 %v2378_v37  ;;  %v2384_v40 = vadd.f32 1.0, %v7197_v49  ;;  %v7199_v63 = vpop.eup %7198 }
 0x659   :  { %v7201_v51 = vpop.eup %7200 }
 0x65a   :  { %7204 = vrcp.f32 %v2384_v40  ;;  %v2391_v24 = vadd.f32 1.0, %v7201_v51 }
 0x65c   :  { %7206 = vrcp.f32 %v2391_v24 }
 0x665   :  { %v7203_v61 = vpop.eup %7202 }
 0x666   :  { %v2396_v26 = vmul.f32 %v7203_v61, %v7199_v63 }
 0x667   :  { %v7205_v31 = vpop.eup %7204 }
 0x668   :  { %v2395_v53 = vmul.f32 %v7205_v31, %v8091_v60 }
 0x669   :  { %v7207_v55 = vpop.eup %7206 }
 0x66a   :  { %v8136_v35 = vadd.f32 %v2396_v26, %v2395_v53 }
 0x66c   :  { %7208 = vtanh.f32 %v8136_v35 }
 0x679   :  { %v7209_v62 = vpop.eup %7208 }
 0x67a   :  { %v8139_v36 = vmul.f32 %v7209_v62, %v7207_v55  ;;  %v6962_v55 = vld [vmem:[#allocation12 + $0xe0] ss:$16 sps:$4 sm:$0xff]   ;;  %v6965_v62 = vld [vmem:[#allocation12 + $0xe8] ss:$16 sps:$4 sm:$0xff]  }
 0x67c   :  { %v2410_v29 = vpack.c.bf16 %v8139_v36, %v8139_v36 }
 0x67e   :  { %2636 = vmatmul.mubr.bf16.vlgmr.msra.gmra.mxu0 %v2410_v29  ;;  %2677 = vmatmul.mubr.bf16.vlgmr.msra.gmra.mxu1 %v2410_v29 }
 0x67f   :  { %2959 = vmatpush1.bf16.msra.mxu1 %v7993_v59  ;;  %2949 = vmatprep.mubr.bf16.mxu0 %v8834_v54  ;;  %v6940_v59 = vld [vmem:[#allocation11 + $0xe4] ss:$16 sps:$4 sm:$0xff]  }
 0x680   :  { %2960 = vmatprep.subr.bf16.mxu1 %v7997_v42  ;;  %2990 = vmatprep.mubr.bf16.mxu1 %v8834_v54  ;;  %v6938_v42 = vld [vmem:[#allocation11 + $0xe0] ss:$16 sps:$4 sm:$0xff]  }
 0x681   :  { %2917 = vmatprep.subr.bf16.mxu0 %v6940_v59  ;;  %v6970_v59 = vld [vmem:[#allocation12 + $0xc4] ss:$16 sps:$4 sm:$0xff]  }
 0x682   :  { %2918 = vmatpush1.bf16.msra.mxu0 %v6938_v42  ;;  %v6973_v42 = vld [vmem:[#allocation12 + $0xcc] ss:$16 sps:$4 sm:$0xff]  }
 0x683   :  { %2961 = vmatpush1.bf16.msra.mxu1 %v7999_v28  ;;  %v6943_v28 = vld [vmem:[#allocation11 + $0xc4] ss:$16 sps:$4 sm:$0xff]  }
 0x684   :  { %2962 = vmatprep.subr.bf16.mxu1 %v8003_v56  ;;  %v6941_v56 = vld [vmem:[#allocation11 + $0xc0] ss:$16 sps:$4 sm:$0xff]   ;;  %2919 = vmatprep.subr.bf16.mxu0 %v6943_v28  ;;  %v6971_v28 = vld [vmem:[#allocation12 + $0xc8] ss:$16 sps:$4 sm:$0xff]  }
 0x686   :  { %2920 = vmatpush1.bf16.msra.mxu0 %v6941_v56  ;;  %v6976_v56 = vld [vmem:[#allocation12 + $0xa4] ss:$16 sps:$4 sm:$0xff]  }
 0x687   :  { %2963 = vmatpush1.bf16.msra.mxu1 %v8005_v19  ;;  %v6946_v19 = vld [vmem:[#allocation11 + $0xa4] ss:$16 sps:$4 sm:$0xff]  }
 0x688   :  { %2964 = vmatprep.subr.bf16.mxu1 %v8009_v34  ;;  %v6944_v34 = vld [vmem:[#allocation11 + $0xa0] ss:$16 sps:$4 sm:$0xff]   ;;  %2921 = vmatprep.subr.bf16.mxu0 %v6946_v19  ;;  %v6979_v19 = vld [vmem:[#allocation12 + $0xac] ss:$16 sps:$4 sm:$0xff]  }
 0x68a   :  { %2922 = vmatpush1.bf16.msra.mxu0 %v6944_v34  ;;  %v6974_v34 = vld [vmem:[#allocation12 + $0xa0] ss:$16 sps:$4 sm:$0xff]  }
 0x68b   :  { %2965 = vmatpush1.bf16.msra.mxu1 %v8011_v33  ;;  %v6949_v33 = vld [vmem:[#allocation11 + $0x84] ss:$16 sps:$4 sm:$0xff]  }
 0x68c   :  { %2966 = vmatprep.subr.bf16.mxu1 %v8013_v30  ;;  %v6947_v30 = vld [vmem:[#allocation11 + $0x80] ss:$16 sps:$4 sm:$0xff]   ;;  %2923 = vmatprep.subr.bf16.mxu0 %v6949_v33  ;;  %v6977_v33 = vld [vmem:[#allocation12 + $0xa8] ss:$16 sps:$4 sm:$0xff]  }
 0x68e   :  { %2924 = vmatpush1.bf16.msra.mxu0 %v6947_v30  ;;  %v6982_v30 = vld [vmem:[#allocation12 + $0x84] ss:$16 sps:$4 sm:$0xff]  }
 0x68f   :  { %2967 = vmatpush1.bf16.msra.mxu1 %v8017_v13  ;;  %v6952_v13 = vld [vmem:[#allocation11 + $0x64] ss:$16 sps:$4 sm:$0xff]  }
 0x690   :  { %2968 = vmatprep.subr.bf16.mxu1 %v8020_v14  ;;  %v6950_v14 = vld [vmem:[#allocation11 + $0x60] ss:$16 sps:$4 sm:$0xff]   ;;  %2925 = vmatprep.subr.bf16.mxu0 %v6952_v13  ;;  %v6985_v13 = vld [vmem:[#allocation12 + $0x8c] ss:$16 sps:$4 sm:$0xff]  }
 0x692   :  { %2926 = vmatpush1.bf16.msra.mxu0 %v6950_v14  ;;  %v6980_v14 = vld [vmem:[#allocation12 + $0x80] ss:$16 sps:$4 sm:$0xff]  }
 0x693   :  { %2969 = vmatpush1.bf16.msra.mxu1 %v8023_v17  ;;  %v6955_v17 = vld [vmem:[#allocation11 + $0x44] ss:$16 sps:$4 sm:$0xff]  }
 0x694   :  { %2970 = vmatprep.subr.bf16.mxu1 %v8026_v18  ;;  %v6967_v18 = vld [vmem:[#allocation12 + $0xec] ss:$16 sps:$4 sm:$0xff]   ;;  %2927 = vmatprep.subr.bf16.mxu0 %v6955_v17  ;;  %v6983_v17 = vld [vmem:[#allocation12 + $0x88] ss:$16 sps:$4 sm:$0xff]  }
 0x697   :  { %2971 = vmatpush1.bf16.msra.mxu1 %v8029_v21  ;;  %v6953_v21 = vld [vmem:[#allocation11 + $0x40] ss:$16 sps:$4 sm:$0xff]  }
 0x698   :  { %2972 = vmatprep.subr.bf16.mxu1 %v8032_v22  ;;  %v6958_v22 = vld [vmem:[#allocation11 + $0x24] ss:$16 sps:$4 sm:$0xff]   ;;  %2928 = vmatpush1.bf16.msra.mxu0 %v6953_v21  ;;  %v6991_v21 = vld [vmem:[#allocation12 + $0x6c] ss:$16 sps:$4 sm:$0xff]  }
 0x699   :  { %2929 = vmatprep.subr.bf16.mxu0 %v6958_v22  ;;  %v6986_v22 = vld [vmem:[#allocation12 + $0x60] ss:$16 sps:$4 sm:$0xff]  }
 0x69b   :  { %2973 = vmatpush1.bf16.msra.mxu1 %v8035_v25  ;;  %v6956_v25 = vld [vmem:[#allocation11 + $0x20] ss:$16 sps:$4 sm:$0xff]  }
 0x69c   :  { %3331 = vmatprep.subr.bf16.mxu1 %v6967_v18  ;;  %2930 = vmatpush1.bf16.msra.mxu0 %v6956_v25  ;;  %v6988_v18 = vld [vmem:[#allocation12 + $0x64] ss:$16 sps:$4 sm:$0xff]   ;;  %v6989_v25 = vld [vmem:[#allocation12 + $0x68] ss:$16 sps:$4 sm:$0xff]  }
 0x69d   :  { %2931 = vmatprep.subr.bf16.mxu0 %v6961_v45  ;;  %v6994_v45 = vld [vmem:[#allocation12 + $0x44] ss:$16 sps:$4 sm:$0xff]  }
 0x6a0   :  { %2932 = vmatpush1.bf16.msra.mxu0 %v6959_v44  ;;  %v6997_v44 = vld [vmem:[#allocation12 + $0x4c] ss:$16 sps:$4 sm:$0xff]  }
 0x6a1   :  { %3258 = vmatprep.subr.bf16.mxu0 %v6964_v47  ;;  %v6992_v47 = vld [vmem:[#allocation12 + $0x40] ss:$16 sps:$4 sm:$0xff]  }
 0x73e   :  { %v2637_v60 = vpop.f32.mrf.mxu0  ;;  %v2678_v23 = vpop.f32.mrf.mxu1 }
 0x73f   :  { %v2685_v38 = vadd.f32 %v2637_v60, %v8840_v43  ;;  %v2687_v16 = vadd.f32 %v2678_v23, %v8843_v15  ;;  %v6995_v60 = vld [vmem:[#allocation12 + $0x48] ss:$16 sps:$4 sm:$0xff]   ;;  %v7000_v23 = vld [vmem:[#allocation12 + $0x24] ss:$16 sps:$4 sm:$0xff]   ;;  %v7003_v43 = vld [vmem:[#allocation12 + $0x2c] ss:$16 sps:$4 sm:$0xff]  }
 0x740   :  { %v2639_v1 = vpop.f32.mrf.mxu0  ;;  %v2680_v2 = vpop.f32.mrf.mxu1  ;;  %v8214_v15 = vld [vmem:[#allocation14 + $0xa0] ss:$16 sps:$4 sm:$0xff]  }
 0x741   :  { %v6384_v4 = vmul.f32 -1.442695, %v2685_v38  ;;  %v2686_v6 = vadd.f32 %v2639_v1, %v8841_v5  ;;  %v2688_v12 = vadd.f32 %v2680_v2, %v8842_v11  ;;  %v6998_v38 = vld [vmem:[#allocation12 + $0x20] ss:$16 sps:$4 sm:$0xff]   ;;  %v7001_v1 = vld [vmem:[#allocation12 + $0x28] ss:$16 sps:$4 sm:$0xff]  }
 0x742   :  { %v2641_v7 = vpop.f32.mrf.mxu0  ;;  %v2682_v8 = vpop.f32.mrf.mxu1  ;;  %v7006_v2 = vld [vmem:[#allocation12 + $0x4] ss:$16 sps:$4 sm:$0xff]   ;;  %v7004_v5 = vld [vmem:[#allocation12] ss:$16 sps:$4 sm:$0xff]  }
 0x743   :  { %7210 = vpow2.f32 %v6384_v4  ;;  %v6385_v3 = vmul.f32 -1.442695, %v2686_v6  ;;  %v6386_v48 = vmul.f32 -1.442695, %v2688_v12  ;;  %v7009_v4 = vld [vmem:[#allocation12 + $0xc] ss:$16 sps:$4 sm:$0xff]   ;;  %v3040_v7 = vpack.c.bf16 %v7891_v57, %v7850_v39 }
 0x744   :  { %v2642_v9 = vpop.f32.mrf.mxu0  ;;  %v2683_v10 = vpop.f32.mrf.mxu1  ;;  %v7007_v6 = vld [vmem:[#allocation12 + $0x8] ss:$16 sps:$4 sm:$0xff]   ;;  %v3041_v8 = vpack.c.bf16 %v8048_v32, %v7969_v20  ;;  %v8186_v39 = vld [vmem:[#allocation14 + $0xe4] ss:$16 sps:$4 sm:$0xff]   ;;  %v8188_v57 = vld [vmem:[#allocation14 + $0xec] ss:$16 sps:$4 sm:$0xff]  }
 0x745   :  { %7212 = vpow2.f32 %v6385_v3  ;;  %v3042_v3 = vpack.c.bf16 %v8139_v36, %v8094_v52  ;;  %v8190_v20 = vld [vmem:[#allocation14 + $0xe0] ss:$16 sps:$4 sm:$0xff]   ;;  %v8192_v32 = vld [vmem:[#allocation14 + $0xe8] ss:$16 sps:$4 sm:$0xff]   ;;  %v8198_v52 = vld [vmem:[#allocation14 + $0xc4] ss:$16 sps:$4 sm:$0xff]  }
 0x746   :  { %7214 = vtanh.f32 %v2687_v16  ;;  %v8200_v36 = vld [vmem:[#allocation14 + $0xcc] ss:$16 sps:$4 sm:$0xff]   ;;  %v8202_v9 = vld [vmem:[#allocation14 + $0xc0] ss:$16 sps:$4 sm:$0xff]   ;;  %v8204_v10 = vld [vmem:[#allocation14 + $0xc8] ss:$16 sps:$4 sm:$0xff]  }
 0x747   :  { %7216 = vpow2.f32 %v6386_v48  ;;  %v8210_v11 = vld [vmem:[#allocation14 + $0xa4] ss:$16 sps:$4 sm:$0xff]   ;;  %v8212_v12 = vld [vmem:[#allocation14 + $0xac] ss:$16 sps:$4 sm:$0xff]   ;;  %v8216_v16 = vld [vmem:[#allocation14 + $0xa8] ss:$16 sps:$4 sm:$0xff]  }
 0x748   :  { %v8222_v48 = vld [vmem:[#allocation14 + $0x84] ss:$16 sps:$4 sm:$0xff]  }
 0x750   :  { %v7211_v50 = vpop.eup %7210 }
 0x751   :  { %v2692_v27 = vadd.f32 1.0, %v7211_v50  ;;  %v8224_v50 = vld [vmem:[#allocation14 + $0x8c] ss:$16 sps:$4 sm:$0xff]  }
 0x752   :  { %v7213_v58 = vpop.eup %7212 }
 0x753   :  { %7218 = vrcp.f32 %v2692_v27  ;;  %v2698_v41 = vadd.f32 1.0, %v7213_v58  ;;  %v7215_v46 = vpop.eup %7214  ;;  %v8226_v27 = vld [vmem:[#allocation14 + $0x80] ss:$16 sps:$4 sm:$0xff]   ;;  %v8228_v58 = vld [vmem:[#allocation14 + $0x88] ss:$16 sps:$4 sm:$0xff]  }
 0x754   :  { %v7217_v37 = vpop.eup %7216 }
 0x755   :  { %7220 = vrcp.f32 %v2698_v41  ;;  %v2705_v51 = vadd.f32 1.0, %v7217_v37  ;;  %v8234_v41 = vld [vmem:[#allocation14 + $0x64] ss:$16 sps:$4 sm:$0xff]   ;;  %v8238_v37 = vld [vmem:[#allocation14 + $0x60] ss:$16 sps:$4 sm:$0xff]  }
 0x757   :  { %7222 = vrcp.f32 %v2705_v51  ;;  %v8250_v51 = vld [vmem:[#allocation14 + $0x40] ss:$16 sps:$4 sm:$0xff]  }
 0x760   :  { %v7219_v49 = vpop.eup %7218 }
 0x761   :  { %v2710_v40 = vmul.f32 %v7219_v49, %v7215_v46  ;;  %v8236_v46 = vld [vmem:[#allocation14 + $0x6c] ss:$16 sps:$4 sm:$0xff]   ;;  %v8240_v49 = vld [vmem:[#allocation14 + $0x68] ss:$16 sps:$4 sm:$0xff]  }
 0x762   :  { %v7221_v63 = vpop.eup %7220 }
 0x763   :  { %v2709_v61 = vmul.f32 %v7221_v63, %v8136_v35  ;;  %v6968_v35 = vld [vmem:[#allocation12 + $0xc0] ss:$16 sps:$4 sm:$0xff]   ;;  %v8248_v63 = vld [vmem:[#allocation14 + $0x4c] ss:$16 sps:$4 sm:$0xff]  }
 0x764   :  { %v7223_v31 = vpop.eup %7222 }
 0x765   :  { %v8165_v26 = vadd.f32 %v2710_v40, %v2709_v61  ;;  %v8246_v40 = vld [vmem:[#allocation14 + $0x44] ss:$16 sps:$4 sm:$0xff]   ;;  %v8252_v61 = vld [vmem:[#allocation14 + $0x48] ss:$16 sps:$4 sm:$0xff]  }
 0x767   :  { %7224 = vtanh.f32 %v8165_v26 }
 0x774   :  { %v7225_v24 = vpop.eup %7224 }
 0x775   :  { %v8168_v53 = vmul.f32 %v7225_v24, %v7223_v31  ;;  %v8258_v31 = vld [vmem:[#allocation14 + $0x24] ss:$16 sps:$4 sm:$0xff]   ;;  %v8260_v24 = vld [vmem:[#allocation14 + $0x2c] ss:$16 sps:$4 sm:$0xff]  }
 0x777   :  { %v2724_v29 = vpack.c.bf16 %v8168_v53, %v8168_v53 }
 0x779   :  { %2950 = vmatmul.mubr.bf16.vlgmr.msra.gmra.mxu0 %v2724_v29  ;;  %2991 = vmatmul.mubr.bf16.vlgmr.msra.gmra.mxu1 %v2724_v29  ;;  %v8268_v29 = vld [vmem:[#allocation14 + $0x4] ss:$16 sps:$4 sm:$0xff]  }
 0x77a   :  { %3259 = vmatpush1.bf16.msra.mxu0 %v6962_v55  ;;  %3332 = vmatpush1.bf16.msra.mxu1 %v6965_v62  ;;  %v8262_v55 = vld [vmem:[#allocation14 + $0x20] ss:$16 sps:$4 sm:$0xff]   ;;  %v8264_v62 = vld [vmem:[#allocation14 + $0x28] ss:$16 sps:$4 sm:$0xff]  }
 0x77b   :  { %3260 = vmatprep.subr.bf16.mxu0 %v6970_v59  ;;  %3333 = vmatprep.subr.bf16.mxu1 %v6973_v42  ;;  %v8270_v59 = vld [vmem:[#allocation14 + $0xc] ss:$16 sps:$4 sm:$0xff]   ;;  %v8274_v42 = vld [vmem:[#allocation14] ss:$16 sps:$4 sm:$0xff]  }
 0x77c   :  { %3290 = vmatprep.mubr.bf16.mxu0 %v8834_v54  ;;  %3363 = vmatprep.mubr.bf16.mxu1 %v8834_v54 }
 0x77e   :  { %3261 = vmatpush1.bf16.msra.mxu0 %v6968_v35  ;;  %3334 = vmatpush1.bf16.msra.mxu1 %v6971_v28  ;;  %v8276_v35 = vld [vmem:[#allocation14 + $0x8] ss:$16 sps:$4 sm:$0xff]  }
 0x77f   :  { %3262 = vmatprep.subr.bf16.mxu0 %v6976_v56  ;;  %3335 = vmatprep.subr.bf16.mxu1 %v6979_v19  ;;  %v8844_v19 = vld [vmem:[#allocation28_spill] sm:$0xff] }
 0x782   :  { %3263 = vmatpush1.bf16.msra.mxu0 %v6974_v34  ;;  %3336 = vmatpush1.bf16.msra.mxu1 %v6977_v33 }
 0x783   :  { %3264 = vmatprep.subr.bf16.mxu0 %v6982_v30  ;;  %3337 = vmatprep.subr.bf16.mxu1 %v6985_v13 }
 0x786   :  { %3265 = vmatpush1.bf16.msra.mxu0 %v6980_v14  ;;  %3338 = vmatpush1.bf16.msra.mxu1 %v6983_v17  ;;  %v8845_v14 = vld [vmem:[#allocation29_spill] sm:$0xff] }
 0x787   :  { %3266 = vmatprep.subr.bf16.mxu0 %v6988_v18  ;;  %3339 = vmatprep.subr.bf16.mxu1 %v6991_v21 }
 0x78a   :  { %3267 = vmatpush1.bf16.msra.mxu0 %v6986_v22  ;;  %3340 = vmatpush1.bf16.msra.mxu1 %v6989_v25 }
 0x78b   :  { %3268 = vmatprep.subr.bf16.mxu0 %v6994_v45  ;;  %3341 = vmatprep.subr.bf16.mxu1 %v6997_v44 }
 0x78e   :  { %3269 = vmatpush1.bf16.msra.mxu0 %v6992_v47  ;;  %3342 = vmatpush1.bf16.msra.mxu1 %v6995_v60  ;;  %v8846_v47 = vld [vmem:[#allocation35_spill] sm:$0xff] }
 0x78f   :  { %3270 = vmatprep.subr.bf16.mxu0 %v7000_v23  ;;  %3343 = vmatprep.subr.bf16.mxu1 %v7003_v43 }
 0x792   :  { %3271 = vmatpush1.bf16.msra.mxu0 %v6998_v38  ;;  %3344 = vmatpush1.bf16.msra.mxu1 %v7001_v1 }
 0x793   :  { %3272 = vmatprep.subr.bf16.mxu0 %v7006_v2  ;;  %3345 = vmatprep.subr.bf16.mxu1 %v7009_v4 }
 0x796   :  { %3273 = vmatpush1.bf16.msra.mxu0 %v7004_v5  ;;  %3346 = vmatpush1.bf16.msra.mxu1 %v7007_v6 }
 0x797   :  { %3636 = vmatprep.subr.bf16.mxu0 %v8186_v39  ;;  %3677 = vmatprep.subr.bf16.mxu1 %v8188_v57 }
 0x799   :  { %3291 = vmatmul.mubr.bf16.vlgmr.msra.gmra.mxu0 %v3040_v7  ;;  %3364 = vmatmul.mubr.bf16.vlgmr.msra.gmra.mxu1 %v3040_v7 }
 0x79a   :  { %3300 = vmatprep.mubr.bf16.mxu0 %v8834_v54  ;;  %3373 = vmatprep.mubr.bf16.mxu1 %v8834_v54 }
 0x79b   :  { %3637 = vmatpush1.bf16.msra.mxu0 %v8190_v20  ;;  %3678 = vmatpush1.bf16.msra.mxu1 %v8192_v32 }
 0x79c   :  { %3638 = vmatprep.subr.bf16.mxu0 %v8198_v52  ;;  %3679 = vmatprep.subr.bf16.mxu1 %v8200_v36 }
 0x79f   :  { %3639 = vmatpush1.bf16.msra.mxu0 %v8202_v9  ;;  %3680 = vmatpush1.bf16.msra.mxu1 %v8204_v10 }
 0x7a0   :  { %3640 = vmatprep.subr.bf16.mxu0 %v8210_v11  ;;  %3681 = vmatprep.subr.bf16.mxu1 %v8212_v12 }
 0x7a1   :  { %3301 = vmatmul.mubr.bf16.gmra.mxu0 %v3041_v8  ;;  %3374 = vmatmul.mubr.bf16.gmra.mxu1 %v3041_v8 }
 0x7a2   :  { %3310 = vmatprep.mubr.bf16.mxu0 %v8834_v54  ;;  %3383 = vmatprep.mubr.bf16.mxu1 %v8834_v54 }
 0x7a3   :  { %3641 = vmatpush1.bf16.msra.mxu0 %v8214_v15  ;;  %3682 = vmatpush1.bf16.msra.mxu1 %v8216_v16 }
 0x7a4   :  { %3642 = vmatprep.subr.bf16.mxu0 %v8222_v48  ;;  %3683 = vmatprep.subr.bf16.mxu1 %v8224_v50 }
 0x7a7   :  { %3643 = vmatpush1.bf16.msra.mxu0 %v8226_v27  ;;  %3684 = vmatpush1.bf16.msra.mxu1 %v8228_v58 }
 0x7a8   :  { %3644 = vmatprep.subr.bf16.mxu0 %v8234_v41  ;;  %3685 = vmatprep.subr.bf16.mxu1 %v8236_v46 }
 0x7a9   :  { %3311 = vmatmul.mubr.bf16.gmra.mxu0 %v3042_v3  ;;  %3384 = vmatmul.mubr.bf16.gmra.mxu1 %v3042_v3 }
 0x7aa   :  { %3320 = vmatprep.mubr.bf16.mxu0 %v8834_v54  ;;  %3393 = vmatprep.mubr.bf16.mxu1 %v8834_v54 }
 0x7ab   :  { %3645 = vmatpush1.bf16.msra.mxu0 %v8238_v37  ;;  %3686 = vmatpush1.bf16.msra.mxu1 %v8240_v49 }
 0x7ac   :  { %3646 = vmatprep.subr.bf16.mxu0 %v8246_v40  ;;  %3687 = vmatprep.subr.bf16.mxu1 %v8248_v63 }
 0x7af   :  { %3647 = vmatpush1.bf16.msra.mxu0 %v8250_v51  ;;  %3688 = vmatpush1.bf16.msra.mxu1 %v8252_v61 }
 0x7b0   :  { %3648 = vmatprep.subr.bf16.mxu0 %v8258_v31  ;;  %3689 = vmatprep.subr.bf16.mxu1 %v8260_v24 }
 0x7b3   :  { %3649 = vmatpush1.bf16.msra.mxu0 %v8262_v55  ;;  %3690 = vmatpush1.bf16.msra.mxu1 %v8264_v62 }
 0x7b4   :  { %3650 = vmatprep.subr.bf16.mxu0 %v8268_v29  ;;  %3691 = vmatprep.subr.bf16.mxu1 %v8270_v59 }
 0x7b7   :  { %3651 = vmatpush1.bf16.msra.mxu0 %v8274_v42  ;;  %3692 = vmatpush1.bf16.msra.mxu1 %v8276_v35 }
 0x7b8   :  { %3948 = vmatprep.subr.bf16.mxu0 %v8186_v39  ;;  %3989 = vmatprep.subr.bf16.mxu1 %v8188_v57 }
 0x839   :  { %v2951_v28 = vpop.f32.mrf.mxu0  ;;  %v2992_v56 = vpop.f32.mrf.mxu1 }
 0x83a   :  { %v2999_v34 = vadd.f32 %v2951_v28, %v8844_v19  ;;  %v3001_v60 = vadd.f32 %v2992_v56, %v8846_v47 }
 0x83b   :  { %v2953_v33 = vpop.f32.mrf.mxu0  ;;  %v2994_v30 = vpop.f32.mrf.mxu1 }
 0x83c   :  { %v6419_v13 = vmul.f32 -1.442695, %v2999_v34  ;;  %v3000_v17 = vadd.f32 %v2953_v33, %v8845_v14  ;;  %v3002_v44 = vadd.f32 %v2994_v30, %v7845_v0  ;;  %v8847_v30 = vmov 0.0|0.0  }
 0x83d   :  { %v2955_v18 = vpop.f32.mrf.mxu0  ;;  %v2996_v21 = vpop.f32.mrf.mxu1 }
 0x83e   :  { %7226 = vpow2.f32 %v6419_v13  ;;  %v6420_v22 = vmul.f32 -1.442695, %v3000_v17  ;;  %v6421_v23 = vmul.f32 -1.442695, %v3002_v44 }
 0x83f   :  { %v2956_v25 = vpop.f32.mrf.mxu0  ;;  %v2997_v45 = vpop.f32.mrf.mxu1 }
 0x840   :  { %7228 = vpow2.f32 %v6420_v22 }
 0x841   :  { %7230 = vtanh.f32 %v3001_v60 }
 0x842   :  { %7232 = vpow2.f32 %v6421_v23 }
 0x84b   :  { %v7227_v43 = vpop.eup %7226 }
 0x84c   :  { %v3006_v38 = vadd.f32 1.0, %v7227_v43 }
 0x84d   :  { %v7229_v1 = vpop.eup %7228 }
 0x84e   :  { %7234 = vrcp.f32 %v3006_v38  ;;  %v3012_v2 = vadd.f32 1.0, %v7229_v1  ;;  %v7231_v4 = vpop.eup %7230 }
 0x84f   :  { %v7233_v5 = vpop.eup %7232 }
 0x850   :  { %7236 = vrcp.f32 %v3012_v2  ;;  %v3019_v3 = vadd.f32 1.0, %v7233_v5 }
 0x852   :  { %7238 = vrcp.f32 %v3019_v3 }
 0x85b   :  { %v7235_v6 = vpop.eup %7234 }
 0x85c   :  { %v3024_v7 = vmul.f32 %v7235_v6, %v7231_v4 }
 0x85d   :  { %v7237_v8 = vpop.eup %7236 }
 0x85e   :  { %v3023_v28 = vmul.f32 %v7237_v8, %v8165_v26  ;;  %v3292_v26 = vpop.f32.mrf.mxu0 }
 0x85f   :  { %v7239_v56 = vpop.eup %7238 }
 0x860   :  { %v3025_v0 = vadd.f32 %v3024_v7, %v3023_v28  ;;  %v3294_v13 = vpop.f32.mrf.mxu0  ;;  %v3076_v28 = vld [vmem:[%s8807_s6] sm:$0xf] }
 0x862   :  { %7240 = vtanh.f32 %v3025_v0  ;;  %v8328_v17 = vpop.f32.mrf.mxu0 }
 0x864   :  { %v8332_v21 = vpop.f32.mrf.mxu0 }
 0x866   :  { %v8336_v25 = vpop.f32.mrf.mxu0 }
 0x868   :  { %v8340_v44 = vpop.f32.mrf.mxu0 }
 0x86a   :  { %v8344_v60 = vpop.f32.mrf.mxu0 }
 0x86b   :  { %8849 = vst [vmem:[#allocation24_spill] sm:$0xff] %v8344_v60 }
 0x86c   :  { %v8348_v43 = vpop.f32.mrf.mxu0 }
 0x86d   :  { %8851 = vst [vmem:[#allocation32_spill] sm:$0xff] %v8348_v43 }
 0x86e   :  { %v8352_v1 = vpop.f32.mrf.mxu0 }
 0x86f   :  { %v7241_v19 = vpop.eup %7240  ;;  %8853 = vst [vmem:[#allocation26_spill] sm:$0xff] %v8352_v1 }
 0x870   :  { %v3027_v34 = vmul.f32 %v7241_v19, %v7239_v56  ;;  %v8356_v4 = vpop.f32.mrf.mxu0 }
 0x871   :  { %8855 = vst [vmem:[#allocation34_spill] sm:$0xff] %v8356_v4 }
 0x872   :  { %v3043_v33 = vpack.c.bf16 %v3027_v34, %v8168_v53  ;;  %v3365_v53 = vpop.f32.mrf.mxu1  ;;  %v8360_v6 = vpop.f32.mrf.mxu0 }
 0x873   :  { %8857 = vst [vmem:[#allocation28_spill] sm:$0xff] %v8360_v6 }
 0x874   :  { %3321 = vmatmul.mubr.bf16.gmra.mxu0 %v3043_v33  ;;  %3394 = vmatmul.mubr.bf16.gmra.mxu1 %v3043_v33  ;;  %v3367_v14 = vpop.f32.mrf.mxu1  ;;  %v8364_v8 = vpop.f32.mrf.mxu0  ;;  %v8865_v33 = vld [vmem:[#allocation23_spill] sm:$0xff] }
 0x875   :  { %3668 = vmatprep.mubr.bf16.mxu0 %v8834_v54  ;;  %3709 = vmatprep.mubr.bf16.mxu1 %v8834_v54  ;;  %8859 = vst [vmem:[#allocation35_spill] sm:$0xff] %v8364_v8  ;;  %v8872_v60 = vsub.s32 3, %v8865_v33 }
 0x876   :  { %v8330_v18 = vpop.f32.mrf.mxu1 }
 0x878   :  { %v8334_v22 = vpop.f32.mrf.mxu1 }
 0x87a   :  { %v8338_v45 = vpop.f32.mrf.mxu1 }
 0x87b   :  { %8848 = vst [vmem:[#allocation30_spill] sm:$0xff] %v8338_v45 }
 0x87c   :  { %3669 = vmatmul.mubr.bf16.vlgmr.msra.gmra.mxu0 %v8847_v30  ;;  %3710 = vmatmul.mubr.bf16.vlgmr.msra.gmra.mxu1 %v8847_v30  ;;  %v8342_v47 = vpop.f32.mrf.mxu1  ;;  %v8866_v30 = vsub.s32 0, %v8865_v33 }
 0x87d   :  { %3949 = vmatpush1.bf16.msra.mxu0 %v8190_v20  ;;  %3990 = vmatpush1.bf16.msra.mxu1 %v8192_v32 }
 0x87e   :  { %3950 = vmatprep.subr.bf16.mxu0 %v8198_v52  ;;  %3991 = vmatprep.subr.bf16.mxu1 %v8200_v36  ;;  %v8346_v23 = vpop.f32.mrf.mxu1  ;;  %v8381_v6 = vrot.slane %v3076_v28, %v8866_v30 }
 0x87f   :  { %3980 = vmatprep.mubr.bf16.mxu0 %v8834_v54  ;;  %4021 = vmatprep.mubr.bf16.mxu1 %v8834_v54  ;;  %8850 = vst [vmem:[#allocation25_spill] sm:$0xff] %v8346_v23 }
 0x880   :  { %v8350_v38 = vpop.f32.mrf.mxu1 }
 0x881   :  { %3951 = vmatpush1.bf16.msra.mxu0 %v8202_v9  ;;  %3992 = vmatpush1.bf16.msra.mxu1 %v8204_v10  ;;  %8852 = vst [vmem:[#allocation31_spill] sm:$0xff] %v8350_v38 }
 0x882   :  { %3952 = vmatprep.subr.bf16.mxu0 %v8210_v11  ;;  %3993 = vmatprep.subr.bf16.mxu1 %v8212_v12  ;;  %v8354_v2 = vpop.f32.mrf.mxu1 }
 0x883   :  { %8854 = vst [vmem:[#allocation27_spill] sm:$0xff] %v8354_v2 }
 0x884   :  { %v8358_v5 = vpop.f32.mrf.mxu1 }
 0x885   :  { %3953 = vmatpush1.bf16.msra.mxu0 %v8214_v15  ;;  %3994 = vmatpush1.bf16.msra.mxu1 %v8216_v16  ;;  %8856 = vst [vmem:[#allocation33_spill] sm:$0xff] %v8358_v5 }
 0x886   :  { %3954 = vmatprep.subr.bf16.mxu0 %v8222_v48  ;;  %3995 = vmatprep.subr.bf16.mxu1 %v8224_v50  ;;  %v8362_v7 = vpop.f32.mrf.mxu1 }
 0x887   :  { %8858 = vst [vmem:[#allocation29_spill] sm:$0xff] %v8362_v7 }
 0x888   :  { %v8366_v3 = vpop.f32.mrf.mxu1 }
 0x889   :  { %3955 = vmatpush1.bf16.msra.mxu0 %v8226_v27  ;;  %3996 = vmatpush1.bf16.msra.mxu1 %v8228_v58  ;;  %8860 = vst [vmem:[#allocation36_spill] sm:$0xff] %v8366_v3  ;;  %v8869_v3 = vsub.s32 1, %v8865_v33 }
 0x88a   :  { %3956 = vmatprep.subr.bf16.mxu0 %v8234_v41  ;;  %3997 = vmatprep.subr.bf16.mxu1 %v8236_v46 }
 0x88b   :  { %v8389_v2 = vrot.slane %v3076_v28, %v8869_v3 }
 0x88d   :  { %3957 = vmatpush1.bf16.msra.mxu0 %v8238_v37  ;;  %3998 = vmatpush1.bf16.msra.mxu1 %v8240_v49  ;;  %v3295_v4 = vadd.f32 %v3294_v13, %v8389_v2  ;;  %v8873_v13 = vsub.s32 2, %v8865_v33 }
 0x88e   :  { %3958 = vmatprep.subr.bf16.mxu0 %v8246_v40  ;;  %3999 = vmatprep.subr.bf16.mxu1 %v8248_v63 }
 0x891   :  { %3959 = vmatpush1.bf16.msra.mxu0 %v8250_v51  ;;  %4000 = vmatpush1.bf16.msra.mxu1 %v8252_v61 }
 0x892   :  { %3960 = vmatprep.subr.bf16.mxu0 %v8258_v31  ;;  %4001 = vmatprep.subr.bf16.mxu1 %v8260_v24 }
 0x895   :  { %3961 = vmatpush1.bf16.msra.mxu0 %v8262_v55  ;;  %4002 = vmatpush1.bf16.msra.mxu1 %v8264_v62 }
 0x896   :  { %3962 = vmatprep.subr.bf16.mxu0 %v8268_v29  ;;  %4003 = vmatprep.subr.bf16.mxu1 %v8270_v59 }
 0x899   :  { %3963 = vmatpush1.bf16.msra.mxu0 %v8274_v42  ;;  %4004 = vmatpush1.bf16.msra.mxu1 %v8276_v35 }
 0x89a   :  { %4260 = vmatprep.subr.bf16.mxu0 %v8186_v39  ;;  %4301 = vmatprep.subr.bf16.mxu1 %v8188_v57 }
 0x934   :  { %v8371_v0 = vpop.f32.mrf.mxu0  ;;  %v8373_v56 = vpop.f32.mrf.mxu1 }
 0x935   :  { %8861 = vst [vmem:[#allocation37_spill] sm:$0xff] %v8371_v0  ;;  %8862 = vst [vmem:[#allocation38_spill] sm:$0xff] %v8373_v56  ;;  %v3293_v56 = vadd.f32 %v3292_v26, %v8381_v6 }
 0x936   :  { %v8375_v19 = vpop.f32.mrf.mxu0  ;;  %v8377_v34 = vpop.f32.mrf.mxu1 }
 0x937   :  { %8863 = vst [vmem:[#allocation39_spill] sm:$0xff] %v8375_v19  ;;  %8864 = vst [vmem:[#allocation40_spill] sm:$0xff] %v8377_v34 }
 0x938   :  { %v8383_v7 = vpop.f32.mrf.mxu0  ;;  %v8385_v8 = vpop.f32.mrf.mxu1 }
 0x939   :  { %8867 = vst [vmem:[#allocation23_spill] sm:$0xff] %v8383_v7  ;;  %8868 = vst [vmem:[#allocation41_spill] sm:$0xff] %v8385_v8 }
 0x93a   :  { %v8391_v5 = vpop.f32.mrf.mxu0  ;;  %v8393_v0 = vpop.f32.mrf.mxu1 }
 0x93b   :  { %8870 = vst [vmem:[#allocation42_spill] sm:$0xff] %v8391_v5  ;;  %8871 = vst [vmem:[#allocation43_spill] sm:$0xff] %v8393_v0  ;;  %v8399_v5 = vrot.slane %v3076_v28, %v8872_v60 }
 0x93c   :  { %v3670_v19 = vpop.f32.mrf.mxu0  ;;  %v3711_v34 = vpop.f32.mrf.mxu1 }
 0x93d   :  { %v3718_v30 = vadd.f32 %v3670_v19, %v3293_v56  ;;  %v3368_v26 = vadd.f32 %v3367_v14, %v8399_v5  ;;  %v8404_v56 = vrot.slane %v3076_v28, %v8873_v13 }
 0x93e   :  { %v3672_v1 = vpop.f32.mrf.mxu0  ;;  %v3713_v23 = vpop.f32.mrf.mxu1 }
 0x93f   :  { %v6486_v7 = vmul.f32 -1.442695, %v3718_v30  ;;  %v3719_v38 = vadd.f32 %v3672_v1, %v3295_v4  ;;  %v3721_v19 = vadd.f32 %v3713_v23, %v3368_v26  ;;  %v3366_v1 = vadd.f32 %v3365_v53, %v8404_v56 }
 0x940   :  { %v3674_v8 = vpop.f32.mrf.mxu0  ;;  %v3715_v43 = vpop.f32.mrf.mxu1 }
 0x941   :  { %7242 = vpow2.f32 %v6486_v7  ;;  %v6487_v3 = vmul.f32 -1.442695, %v3719_v38  ;;  %v6488_v4 = vmul.f32 -1.442695, %v3721_v19  ;;  %v3720_v7 = vadd.f32 %v3711_v34, %v3366_v1 }
 0x942   :  { %v3675_v0 = vpop.f32.mrf.mxu0  ;;  %v3716_v45 = vpop.f32.mrf.mxu1  ;;  %v3297_v19 = vadd.f32 %v8328_v17, %v8381_v6 }
 0x943   :  { %7244 = vpow2.f32 %v6487_v3 }
 0x944   :  { %7246 = vpow2.f32 %v6488_v4 }
 0x94e   :  { %v7243_v43 = vpop.eup %7242 }
 0x94f   :  { %v3725_v38 = vadd.f32 1.0, %v7243_v43  ;;  %v3299_v43 = vadd.f32 %v8332_v21, %v8389_v2 }
 0x950   :  { %v7245_v8 = vpop.eup %7244 }
 0x951   :  { %7248 = vrcp.f32 %v3725_v38  ;;  %v3731_v60 = vadd.f32 1.0, %v7245_v8  ;;  %v7247_v45 = vpop.eup %7246 }
 0x952   :  { %7250 = vtanh.f32 %v3720_v7  ;;  %v3738_v33 = vadd.f32 1.0, %v7247_v45 }
 0x953   :  { %7252 = vrcp.f32 %v3731_v60 }
 0x954   :  { %7254 = vrcp.f32 %v3738_v33 }
 0x95e   :  { %v7249_v0 = vpop.eup %7248 }
 0x95f   :  { %v7251_v14 = vpop.eup %7250 }
 0x960   :  { %v7253_v30 = vpop.eup %7252  ;;  %v3743_v3 = vmul.f32 %v7251_v14, %v7249_v0 }
 0x961   :  { %v3742_v28 = vmul.f32 0.0, %v7253_v30  ;;  %v7255_v53 = vpop.eup %7254 }
 0x963   :  { %v8407_v23 = vadd.f32 %v3743_v3, %v3742_v28  ;;  %v3370_v28 = vadd.f32 %v8330_v18, %v8404_v56 }
 0x965   :  { %7256 = vtanh.f32 %v8407_v23 }
 0x972   :  { %v7257_v34 = vpop.eup %7256 }
 0x973   :  { %v8410_v26 = vmul.f32 %v7257_v34, %v7255_v53 }
 0x975   :  { %v3755_v13 = vpack.c.bf16 %v8410_v26, %v8410_v26 }
 0x977   :  { %3981 = vmatmul.mubr.bf16.vlgmr.msra.gmra.mxu0 %v3755_v13  ;;  %4022 = vmatmul.mubr.bf16.vlgmr.msra.gmra.mxu1 %v3755_v13 }
 0x978   :  { %4261 = vmatpush1.bf16.msra.mxu0 %v8190_v20  ;;  %4302 = vmatpush1.bf16.msra.mxu1 %v8192_v32 }
 0x979   :  { %4262 = vmatprep.subr.bf16.mxu0 %v8198_v52  ;;  %4303 = vmatprep.subr.bf16.mxu1 %v8200_v36 }
 0x97a   :  { %4292 = vmatprep.mubr.bf16.mxu0 %v8834_v54  ;;  %4333 = vmatprep.mubr.bf16.mxu1 %v8834_v54 }
 0x97c   :  { %4263 = vmatpush1.bf16.msra.mxu0 %v8202_v9  ;;  %4304 = vmatpush1.bf16.msra.mxu1 %v8204_v10 }
 0x97d   :  { %4264 = vmatprep.subr.bf16.mxu0 %v8210_v11  ;;  %4305 = vmatprep.subr.bf16.mxu1 %v8212_v12 }
 0x980   :  { %4265 = vmatpush1.bf16.msra.mxu0 %v8214_v15  ;;  %4306 = vmatpush1.bf16.msra.mxu1 %v8216_v16 }
 0x981   :  { %4266 = vmatprep.subr.bf16.mxu0 %v8222_v48  ;;  %4307 = vmatprep.subr.bf16.mxu1 %v8224_v50 }
 0x984   :  { %4267 = vmatpush1.bf16.msra.mxu0 %v8226_v27  ;;  %4308 = vmatpush1.bf16.msra.mxu1 %v8228_v58 }
 0x985   :  { %4268 = vmatprep.subr.bf16.mxu0 %v8234_v41  ;;  %4309 = vmatprep.subr.bf16.mxu1 %v8236_v46 }
 0x988   :  { %4269 = vmatpush1.bf16.msra.mxu0 %v8238_v37  ;;  %4310 = vmatpush1.bf16.msra.mxu1 %v8240_v49 }
 0x989   :  { %4270 = vmatprep.subr.bf16.mxu0 %v8246_v40  ;;  %4311 = vmatprep.subr.bf16.mxu1 %v8248_v63 }
 0x98c   :  { %4271 = vmatpush1.bf16.msra.mxu0 %v8250_v51  ;;  %4312 = vmatpush1.bf16.msra.mxu1 %v8252_v61 }
 0x98d   :  { %4272 = vmatprep.subr.bf16.mxu0 %v8258_v31  ;;  %4313 = vmatprep.subr.bf16.mxu1 %v8260_v24 }
 0x990   :  { %4273 = vmatpush1.bf16.msra.mxu0 %v8262_v55  ;;  %4314 = vmatpush1.bf16.msra.mxu1 %v8264_v62 }
 0x991   :  { %4274 = vmatprep.subr.bf16.mxu0 %v8268_v29  ;;  %4315 = vmatprep.subr.bf16.mxu1 %v8270_v59 }
 0x994   :  { %4275 = vmatpush1.bf16.msra.mxu0 %v8274_v42  ;;  %4316 = vmatpush1.bf16.msra.mxu1 %v8276_v35 }
 0x995   :  { %4572 = vmatprep.subr.bf16.mxu0 %v8186_v39  ;;  %4613 = vmatprep.subr.bf16.mxu1 %v8188_v57  ;;  %v3372_v57 = vadd.f32 %v8334_v22, %v8399_v5 }
 0xa37   :  { %v3982_v1 = vpop.f32.mrf.mxu0  ;;  %v4023_v4 = vpop.f32.mrf.mxu1 }
 0xa38   :  { %v4030_v7 = vadd.f32 %v3982_v1, %v3297_v19  ;;  %v4032_v21 = vadd.f32 %v4023_v4, %v3370_v28  ;;  %v8520_v28 = vld [vmem:[#allocation14 + $0xe8] ss:$16 sps:$4 sm:$0xff]  }
 0xa39   :  { %v3984_v38 = vpop.f32.mrf.mxu0  ;;  %v4025_v8 = vpop.f32.mrf.mxu1 }
 0xa3a   :  { %v6521_v60 = vmul.f32 -1.442695, %v4030_v7  ;;  %v4031_v45 = vadd.f32 %v3984_v38, %v3299_v43  ;;  %v4033_v17 = vadd.f32 %v4025_v8, %v3372_v57  ;;  %v8516_v57 = vld [vmem:[#allocation14 + $0xec] ss:$16 sps:$4 sm:$0xff]  }
 0xa3b   :  { %v3986_v0 = vpop.f32.mrf.mxu0  ;;  %v4027_v14 = vpop.f32.mrf.mxu1 }
 0xa3c   :  { %7258 = vpow2.f32 %v6521_v60  ;;  %v6522_v30 = vmul.f32 -1.442695, %v4031_v45  ;;  %v6523_v3 = vmul.f32 -1.442695, %v4033_v17  ;;  %v8518_v17 = vld [vmem:[#allocation14 + $0xe0] ss:$16 sps:$4 sm:$0xff]  }
 0xa3d   :  { %v3987_v39 = vpop.f32.mrf.mxu0  ;;  %v4028_v33 = vpop.f32.mrf.mxu1 }
 0xa3e   :  { %7260 = vpow2.f32 %v6522_v30  ;;  %v8514_v33 = vld [vmem:[#allocation14 + $0xe4] ss:$16 sps:$4 sm:$0xff]  }
 0xa3f   :  { %7262 = vtanh.f32 %v4032_v21  ;;  %v8526_v21 = vld [vmem:[#allocation14 + $0xc4] ss:$16 sps:$4 sm:$0xff]  }
 0xa40   :  { %7264 = vpow2.f32 %v6523_v3  ;;  %v8528_v3 = vld [vmem:[#allocation14 + $0xcc] ss:$16 sps:$4 sm:$0xff]  }
 0xa49   :  { %v7259_v53 = vpop.eup %7258 }
 0xa4a   :  { %v4037_v34 = vadd.f32 1.0, %v7259_v53  ;;  %v8530_v53 = vld [vmem:[#allocation14 + $0xc0] ss:$16 sps:$4 sm:$0xff]  }
 0xa4b   :  { %v7261_v13 = vpop.eup %7260 }
 0xa4c   :  { %7266 = vrcp.f32 %v4037_v34  ;;  %v4043_v19 = vadd.f32 1.0, %v7261_v13  ;;  %v7263_v1 = vpop.eup %7262  ;;  %v8532_v34 = vld [vmem:[#allocation14 + $0xc8] ss:$16 sps:$4 sm:$0xff]   ;;  %v8538_v13 = vld [vmem:[#allocation14 + $0xa4] ss:$16 sps:$4 sm:$0xff]  }
 0xa4d   :  { %v7265_v43 = vpop.eup %7264 }
 0xa4e   :  { %7268 = vrcp.f32 %v4043_v19  ;;  %v4050_v22 = vadd.f32 1.0, %v7265_v43  ;;  %v8540_v19 = vld [vmem:[#allocation14 + $0xac] ss:$16 sps:$4 sm:$0xff]   ;;  %v8544_v43 = vld [vmem:[#allocation14 + $0xa8] ss:$16 sps:$4 sm:$0xff]  }
 0xa50   :  { %7270 = vrcp.f32 %v4050_v22  ;;  %v8556_v22 = vld [vmem:[#allocation14 + $0x88] ss:$16 sps:$4 sm:$0xff]  }
 0xa59   :  { %v7267_v7 = vpop.eup %7266 }
 0xa5a   :  { %v4055_v38 = vmul.f32 %v7267_v7, %v7263_v1  ;;  %v8542_v1 = vld [vmem:[#allocation14 + $0xa0] ss:$16 sps:$4 sm:$0xff]   ;;  %v8550_v7 = vld [vmem:[#allocation14 + $0x84] ss:$16 sps:$4 sm:$0xff]  }
 0xa5b   :  { %v7269_v60 = vpop.eup %7268 }
 0xa5c   :  { %v4054_v8 = vmul.f32 %v7269_v60, %v8407_v23  ;;  %v8554_v60 = vld [vmem:[#allocation14 + $0x80] ss:$16 sps:$4 sm:$0xff]  }
 0xa5d   :  { %v7271_v18 = vpop.eup %7270 }
 0xa5e   :  { %v8457_v45 = vadd.f32 %v4055_v38, %v4054_v8  ;;  %v8552_v38 = vld [vmem:[#allocation14 + $0x8c] ss:$16 sps:$4 sm:$0xff]   ;;  %v8560_v8 = vld [vmem:[#allocation14 + $0x64] ss:$16 sps:$4 sm:$0xff]  }
 0xa60   :  { %7272 = vtanh.f32 %v8457_v45 }
 0xa6d   :  { %v7273_v4 = vpop.eup %7272 }
 0xa6e   :  { %v8460_v0 = vmul.f32 %v7273_v4, %v7271_v18  ;;  %v8566_v18 = vld [vmem:[#allocation14 + $0x60] ss:$16 sps:$4 sm:$0xff]   ;;  %v8568_v4 = vld [vmem:[#allocation14 + $0x68] ss:$16 sps:$4 sm:$0xff]  }
 0xa70   :  { %v4067_v14 = vpack.c.bf16 %v8460_v0, %v8460_v0 }
 0xa72   :  { %4293 = vmatmul.mubr.bf16.vlgmr.msra.gmra.mxu0 %v4067_v14  ;;  %4334 = vmatmul.mubr.bf16.vlgmr.msra.gmra.mxu1 %v4067_v14  ;;  %v8572_v14 = vld [vmem:[#allocation14 + $0x44] ss:$16 sps:$4 sm:$0xff]  }
 0xa73   :  { %4573 = vmatpush1.bf16.msra.mxu0 %v8190_v20  ;;  %4614 = vmatpush1.bf16.msra.mxu1 %v8192_v32  ;;  %v3303_v20 = vadd.f32 %v8336_v25, %v8381_v6 }
 0xa74   :  { %4574 = vmatprep.subr.bf16.mxu0 %v8198_v52  ;;  %4615 = vmatprep.subr.bf16.mxu1 %v8200_v36  ;;  %v3305_v36 = vadd.f32 %v8340_v44, %v8389_v2 }
 0xa75   :  { %4604 = vmatprep.mubr.bf16.mxu0 %v8834_v54  ;;  %4645 = vmatprep.mubr.bf16.mxu1 %v8834_v54 }
 0xa77   :  { %4575 = vmatpush1.bf16.msra.mxu0 %v8202_v9  ;;  %4616 = vmatpush1.bf16.msra.mxu1 %v8204_v10 }
 0xa78   :  { %4576 = vmatprep.subr.bf16.mxu0 %v8210_v11  ;;  %4617 = vmatprep.subr.bf16.mxu1 %v8212_v12 }
 0xa7b   :  { %4577 = vmatpush1.bf16.msra.mxu0 %v8214_v15  ;;  %4618 = vmatpush1.bf16.msra.mxu1 %v8216_v16 }
 0xa7c   :  { %4578 = vmatprep.subr.bf16.mxu0 %v8222_v48  ;;  %4619 = vmatprep.subr.bf16.mxu1 %v8224_v50 }
 0xa7f   :  { %4579 = vmatpush1.bf16.msra.mxu0 %v8226_v27  ;;  %4620 = vmatpush1.bf16.msra.mxu1 %v8228_v58 }
 0xa80   :  { %4580 = vmatprep.subr.bf16.mxu0 %v8234_v41  ;;  %4621 = vmatprep.subr.bf16.mxu1 %v8236_v46  ;;  %v3378_v41 = vadd.f32 %v8342_v47, %v8399_v5 }
 0xa83   :  { %4581 = vmatpush1.bf16.msra.mxu0 %v8238_v37  ;;  %4622 = vmatpush1.bf16.msra.mxu1 %v8240_v49  ;;  %v8874_v37 = vld [vmem:[#allocation30_spill] sm:$0xff] }
 0xa84   :  { %4582 = vmatprep.subr.bf16.mxu0 %v8246_v40  ;;  %4623 = vmatprep.subr.bf16.mxu1 %v8248_v63  ;;  %v3376_v49 = vadd.f32 %v8874_v37, %v8404_v56 }
 0xa87   :  { %4583 = vmatpush1.bf16.msra.mxu0 %v8250_v51  ;;  %4624 = vmatpush1.bf16.msra.mxu1 %v8252_v61 }
 0xa88   :  { %4584 = vmatprep.subr.bf16.mxu0 %v8258_v31  ;;  %4625 = vmatprep.subr.bf16.mxu1 %v8260_v24 }
 0xa8b   :  { %4585 = vmatpush1.bf16.msra.mxu0 %v8262_v55  ;;  %4626 = vmatpush1.bf16.msra.mxu1 %v8264_v62 }
 0xa8c   :  { %4586 = vmatprep.subr.bf16.mxu0 %v8268_v29  ;;  %4627 = vmatprep.subr.bf16.mxu1 %v8270_v59 }
 0xa8f   :  { %4587 = vmatpush1.bf16.msra.mxu0 %v8274_v42  ;;  %4628 = vmatpush1.bf16.msra.mxu1 %v8276_v35 }
 0xa90   :  { %4884 = vmatprep.subr.bf16.mxu0 %v8514_v33  ;;  %4925 = vmatprep.subr.bf16.mxu1 %v8516_v57 }
 0xb32   :  { %v4294_v32 = vpop.f32.mrf.mxu0  ;;  %v4335_v52 = vpop.f32.mrf.mxu1 }
 0xb33   :  { %v4342_v9 = vadd.f32 %v4294_v32, %v3303_v20  ;;  %v4344_v40 = vadd.f32 %v4335_v52, %v3376_v49  ;;  %v8574_v20 = vld [vmem:[#allocation14 + $0x4c] ss:$16 sps:$4 sm:$0xff]   ;;  %v8578_v32 = vld [vmem:[#allocation14 + $0x40] ss:$16 sps:$4 sm:$0xff]   ;;  %v8580_v52 = vld [vmem:[#allocation14 + $0x48] ss:$16 sps:$4 sm:$0xff]  }
 0xb34   :  { %v4296_v10 = vpop.f32.mrf.mxu0  ;;  %v4337_v11 = vpop.f32.mrf.mxu1 }
 0xb35   :  { %v6556_v12 = vmul.f32 -1.442695, %v4342_v9  ;;  %v4343_v15 = vadd.f32 %v4296_v10, %v3305_v36  ;;  %v4345_v46 = vadd.f32 %v4337_v11, %v3378_v41  ;;  %v8584_v36 = vld [vmem:[#allocation14 + $0x24] ss:$16 sps:$4 sm:$0xff]   ;;  %v8586_v9 = vld [vmem:[#allocation14 + $0x2c] ss:$16 sps:$4 sm:$0xff]  }
 0xb36   :  { %v4298_v16 = vpop.f32.mrf.mxu0  ;;  %v4339_v48 = vpop.f32.mrf.mxu1  ;;  %v8590_v10 = vld [vmem:[#allocation14 + $0x20] ss:$16 sps:$4 sm:$0xff]   ;;  %v8592_v11 = vld [vmem:[#allocation14 + $0x28] ss:$16 sps:$4 sm:$0xff]  }
 0xb37   :  { %7274 = vpow2.f32 %v6556_v12  ;;  %v6557_v50 = vmul.f32 -1.442695, %v4343_v15  ;;  %v6558_v63 = vmul.f32 -1.442695, %v4345_v46  ;;  %v8596_v12 = vld [vmem:[#allocation14 + $0x4] ss:$16 sps:$4 sm:$0xff]  }
 0xb38   :  { %v4299_v27 = vpop.f32.mrf.mxu0  ;;  %v4340_v58 = vpop.f32.mrf.mxu1  ;;  %v8598_v15 = vld [vmem:[#allocation14 + $0xc] ss:$16 sps:$4 sm:$0xff]   ;;  %v8602_v16 = vld [vmem:[#allocation14] ss:$16 sps:$4 sm:$0xff]   ;;  %v8604_v48 = vld [vmem:[#allocation14 + $0x8] ss:$16 sps:$4 sm:$0xff]  }
 0xb39   :  { %7276 = vpow2.f32 %v6557_v50  ;;  %v8875_v50 = vld [vmem:[#allocation24_spill] sm:$0xff] }
 0xb3a   :  { %7278 = vtanh.f32 %v4344_v40  ;;  %v3307_v27 = vadd.f32 %v8875_v50, %v8381_v6  ;;  %v8876_v46 = vld [vmem:[#allocation32_spill] sm:$0xff] }
 0xb3b   :  { %7280 = vpow2.f32 %v6558_v63  ;;  %v3309_v37 = vadd.f32 %v8876_v46, %v8389_v2 }
 0xb44   :  { %v7275_v51 = vpop.eup %7274 }
 0xb45   :  { %v4349_v61 = vadd.f32 1.0, %v7275_v51 }
 0xb46   :  { %v7277_v31 = vpop.eup %7276 }
 0xb47   :  { %7282 = vrcp.f32 %v4349_v61  ;;  %v4355_v24 = vadd.f32 1.0, %v7277_v31  ;;  %v7279_v55 = vpop.eup %7278 }
 0xb48   :  { %v7281_v62 = vpop.eup %7280 }
 0xb49   :  { %7284 = vrcp.f32 %v4355_v24  ;;  %v4362_v35 = vadd.f32 1.0, %v7281_v62 }
 0xb4b   :  { %7286 = vrcp.f32 %v4362_v35 }
 0xb54   :  { %v7283_v29 = vpop.eup %7282 }
 0xb55   :  { %v4367_v59 = vmul.f32 %v7283_v29, %v7279_v55 }
 0xb56   :  { %v7285_v42 = vpop.eup %7284 }
 0xb57   :  { %v4366_v25 = vmul.f32 %v7285_v42, %v8457_v45  ;;  %v8562_v45 = vld [vmem:[#allocation14 + $0x6c] ss:$16 sps:$4 sm:$0xff]  }
 0xb58   :  { %v7287_v47 = vpop.eup %7286 }
 0xb59   :  { %v8505_v44 = vadd.f32 %v4367_v59, %v4366_v25  ;;  %v8877_v59 = vld [vmem:[#allocation31_spill] sm:$0xff]  ;;  %v8878_v25 = vld [vmem:[#allocation25_spill] sm:$0xff] }
 0xb5a   :  { %v3382_v42 = vadd.f32 %v8877_v59, %v8399_v5 }
 0xb5b   :  { %7288 = vtanh.f32 %v8505_v44 }
 0xb68   :  { %v7289_v23 = vpop.eup %7288 }
 0xb69   :  { %v8508_v30 = vmul.f32 %v7289_v23, %v7287_v47  ;;  %v3380_v47 = vadd.f32 %v8878_v25, %v8404_v56  ;;  %v8880_v25 = vld [vmem:[#allocation34_spill] sm:$0xff] }
 0xb6b   :  { %v4379_v39 = vpack.c.bf16 %v8508_v30, %v8508_v30 }
 0xb6d   :  { %4605 = vmatmul.mubr.bf16.vlgmr.msra.gmra.mxu0 %v4379_v39  ;;  %4646 = vmatmul.mubr.bf16.vlgmr.msra.gmra.mxu1 %v4379_v39 }
 0xb6e   :  { %4916 = vmatprep.mubr.bf16.mxu0 %v8834_v54  ;;  %4957 = vmatprep.mubr.bf16.mxu1 %v8834_v54 }
 0xb6f   :  { %4885 = vmatpush1.bf16.msra.mxu0 %v8518_v17  ;;  %4926 = vmatpush1.bf16.msra.mxu1 %v8520_v28 }
 0xb70   :  { %4886 = vmatprep.subr.bf16.mxu0 %v8526_v21  ;;  %4927 = vmatprep.subr.bf16.mxu1 %v8528_v3 }
 0xb73   :  { %4887 = vmatpush1.bf16.msra.mxu0 %v8530_v53  ;;  %4928 = vmatpush1.bf16.msra.mxu1 %v8532_v34 }
 0xb74   :  { %4888 = vmatprep.subr.bf16.mxu0 %v8538_v13  ;;  %4929 = vmatprep.subr.bf16.mxu1 %v8540_v19 }
 0xb77   :  { %4889 = vmatpush1.bf16.msra.mxu0 %v8542_v1  ;;  %4930 = vmatpush1.bf16.msra.mxu1 %v8544_v43 }
 0xb78   :  { %4890 = vmatprep.subr.bf16.mxu0 %v8550_v7  ;;  %4931 = vmatprep.subr.bf16.mxu1 %v8552_v38 }
 0xb7b   :  { %4891 = vmatpush1.bf16.msra.mxu0 %v8554_v60  ;;  %4932 = vmatpush1.bf16.msra.mxu1 %v8556_v22 }
 0xb7c   :  { %4892 = vmatprep.subr.bf16.mxu0 %v8560_v8  ;;  %4933 = vmatprep.subr.bf16.mxu1 %v8562_v45 }
 0xb7f   :  { %4893 = vmatpush1.bf16.msra.mxu0 %v8566_v18  ;;  %4934 = vmatpush1.bf16.msra.mxu1 %v8568_v4 }
 0xb80   :  { %4894 = vmatprep.subr.bf16.mxu0 %v8572_v14  ;;  %4935 = vmatprep.subr.bf16.mxu1 %v8574_v20 }
 0xb83   :  { %4895 = vmatpush1.bf16.msra.mxu0 %v8578_v32  ;;  %4936 = vmatpush1.bf16.msra.mxu1 %v8580_v52 }
 0xb84   :  { %4896 = vmatprep.subr.bf16.mxu0 %v8584_v36  ;;  %4937 = vmatprep.subr.bf16.mxu1 %v8586_v9 }
 0xb87   :  { %4897 = vmatpush1.bf16.msra.mxu0 %v8590_v10  ;;  %4938 = vmatpush1.bf16.msra.mxu1 %v8592_v11 }
 0xb88   :  { %4898 = vmatprep.subr.bf16.mxu0 %v8596_v12  ;;  %4939 = vmatprep.subr.bf16.mxu1 %v8598_v15 }
 0xb8b   :  { %4899 = vmatpush1.bf16.msra.mxu0 %v8602_v16  ;;  %4940 = vmatpush1.bf16.msra.mxu1 %v8604_v48 }
 0xb8c   :  { %5196 = vmatprep.subr.bf16.mxu0 %v8514_v33  ;;  %5237 = vmatprep.subr.bf16.mxu1 %v8516_v57 }
 0xc2d   :  { %v4606_v58 = vpop.f32.mrf.mxu0  ;;  %v4647_v41 = vpop.f32.mrf.mxu1 }
 0xc2e   :  { %v4654_v49 = vadd.f32 %v4606_v58, %v3307_v27  ;;  %v4656_v23 = vadd.f32 %v4647_v41, %v3380_v47  ;;  %v3315_v47 = vadd.f32 %v8880_v25, %v8389_v2 }
 0xc2f   :  { %v4608_v40 = vpop.f32.mrf.mxu0  ;;  %v4649_v63 = vpop.f32.mrf.mxu1 }
 0xc30   :  { %v6591_v51 = vmul.f32 -1.442695, %v4654_v49  ;;  %v4655_v61 = vadd.f32 %v4608_v40, %v3309_v37  ;;  %v4657_v35 = vadd.f32 %v4649_v63, %v3382_v42 }
 0xc31   :  { %v4610_v31 = vpop.f32.mrf.mxu0  ;;  %v4651_v24 = vpop.f32.mrf.mxu1 }
 0xc32   :  { %7290 = vpow2.f32 %v6591_v51  ;;  %v6592_v55 = vmul.f32 -1.442695, %v4655_v61  ;;  %v6593_v39 = vmul.f32 -1.442695, %v4657_v35 }
 0xc33   :  { %v4611_v62 = vpop.f32.mrf.mxu0  ;;  %v4652_v29 = vpop.f32.mrf.mxu1 }
 0xc34   :  { %7292 = vpow2.f32 %v6592_v55 }
 0xc35   :  { %7294 = vtanh.f32 %v4656_v23 }
 0xc36   :  { %7296 = vpow2.f32 %v6593_v39 }
 0xc3f   :  { %v7291_v50 = vpop.eup %7290 }
 0xc40   :  { %v4661_v27 = vadd.f32 1.0, %v7291_v50 }
 0xc41   :  { %v7293_v58 = vpop.eup %7292 }
 0xc42   :  { %7298 = vrcp.f32 %v4661_v27  ;;  %v4667_v46 = vadd.f32 1.0, %v7293_v58  ;;  %v7295_v37 = vpop.eup %7294 }
 0xc43   :  { %v7297_v49 = vpop.eup %7296 }
 0xc44   :  { %7300 = vrcp.f32 %v4667_v46  ;;  %v4674_v31 = vadd.f32 1.0, %v7297_v49 }
 0xc46   :  { %7302 = vrcp.f32 %v4674_v31 }
 0xc4f   :  { %v7299_v40 = vpop.eup %7298 }
 0xc50   :  { %v4679_v51 = vmul.f32 %v7299_v40, %v7295_v37 }
 0xc51   :  { %v7301_v61 = vpop.eup %7300 }
 0xc52   :  { %v4678_v63 = vmul.f32 %v7301_v61, %v8505_v44  ;;  %v8879_v44 = vld [vmem:[#allocation26_spill] sm:$0xff]  ;;  %v8881_v61 = vld [vmem:[#allocation33_spill] sm:$0xff] }
 0xc53   :  { %v7303_v41 = vpop.eup %7302  ;;  %v3313_v59 = vadd.f32 %v8879_v44, %v8381_v6  ;;  %v3388_v31 = vadd.f32 %v8881_v61, %v8399_v5 }
 0xc54   :  { %v8621_v24 = vadd.f32 %v4679_v51, %v4678_v63 }
 0xc56   :  { %7304 = vtanh.f32 %v8621_v24 }
 0xc63   :  { %v7305_v55 = vpop.eup %7304 }
 0xc64   :  { %v8624_v62 = vmul.f32 %v7305_v55, %v7303_v41  ;;  %v8882_v41 = vld [vmem:[#allocation27_spill] sm:$0xff] }
 0xc65   :  { %v3386_v55 = vadd.f32 %v8882_v41, %v8404_v56 }
 0xc66   :  { %v4691_v29 = vpack.c.bf16 %v8624_v62, %v8624_v62 }
 0xc68   :  { %4917 = vmatmul.mubr.bf16.vlgmr.msra.gmra.mxu0 %v4691_v29  ;;  %4958 = vmatmul.mubr.bf16.vlgmr.msra.gmra.mxu1 %v4691_v29 }
 0xc69   :  { %5197 = vmatpush1.bf16.msra.mxu0 %v8518_v17  ;;  %5238 = vmatpush1.bf16.msra.mxu1 %v8520_v28 }
 0xc6a   :  { %5198 = vmatprep.subr.bf16.mxu0 %v8526_v21  ;;  %5239 = vmatprep.subr.bf16.mxu1 %v8528_v3 }
 0xc6b   :  { %5228 = vmatprep.mubr.bf16.mxu0 %v8834_v54  ;;  %5269 = vmatprep.mubr.bf16.mxu1 %v8834_v54 }
 0xc6d   :  { %5199 = vmatpush1.bf16.msra.mxu0 %v8530_v53  ;;  %5240 = vmatpush1.bf16.msra.mxu1 %v8532_v34 }
 0xc6e   :  { %5200 = vmatprep.subr.bf16.mxu0 %v8538_v13  ;;  %5241 = vmatprep.subr.bf16.mxu1 %v8540_v19 }
 0xc71   :  { %5201 = vmatpush1.bf16.msra.mxu0 %v8542_v1  ;;  %5242 = vmatpush1.bf16.msra.mxu1 %v8544_v43 }
 0xc72   :  { %5202 = vmatprep.subr.bf16.mxu0 %v8550_v7  ;;  %5243 = vmatprep.subr.bf16.mxu1 %v8552_v38 }
 0xc75   :  { %5203 = vmatpush1.bf16.msra.mxu0 %v8554_v60  ;;  %5244 = vmatpush1.bf16.msra.mxu1 %v8556_v22 }
 0xc76   :  { %5204 = vmatprep.subr.bf16.mxu0 %v8560_v8  ;;  %5245 = vmatprep.subr.bf16.mxu1 %v8562_v45 }
 0xc79   :  { %5205 = vmatpush1.bf16.msra.mxu0 %v8566_v18  ;;  %5246 = vmatpush1.bf16.msra.mxu1 %v8568_v4 }
 0xc7a   :  { %5206 = vmatprep.subr.bf16.mxu0 %v8572_v14  ;;  %5247 = vmatprep.subr.bf16.mxu1 %v8574_v20 }
 0xc7d   :  { %5207 = vmatpush1.bf16.msra.mxu0 %v8578_v32  ;;  %5248 = vmatpush1.bf16.msra.mxu1 %v8580_v52 }
 0xc7e   :  { %5208 = vmatprep.subr.bf16.mxu0 %v8584_v36  ;;  %5249 = vmatprep.subr.bf16.mxu1 %v8586_v9 }
 0xc81   :  { %5209 = vmatpush1.bf16.msra.mxu0 %v8590_v10  ;;  %5250 = vmatpush1.bf16.msra.mxu1 %v8592_v11 }
 0xc82   :  { %5210 = vmatprep.subr.bf16.mxu0 %v8596_v12  ;;  %5251 = vmatprep.subr.bf16.mxu1 %v8598_v15 }
 0xc85   :  { %5211 = vmatpush1.bf16.msra.mxu0 %v8602_v16  ;;  %5252 = vmatpush1.bf16.msra.mxu1 %v8604_v48 }
 0xc86   :  { %5508 = vmatprep.subr.bf16.mxu0 %v8514_v33  ;;  %5549 = vmatprep.subr.bf16.mxu1 %v8516_v57 }
 0xd28   :  { %v4918_v42 = vpop.f32.mrf.mxu0  ;;  %v4959_v35 = vpop.f32.mrf.mxu1 }
 0xd29   :  { %v4966_v23 = vadd.f32 %v4918_v42, %v3313_v59  ;;  %v4968_v29 = vadd.f32 %v4959_v35, %v3386_v55  ;;  %v8884_v55 = vld [vmem:[#allocation35_spill] sm:$0xff] }
 0xd2a   :  { %v4920_v39 = vpop.f32.mrf.mxu0  ;;  %v4961_v50 = vpop.f32.mrf.mxu1 }
 0xd2b   :  { %v6626_v27 = vmul.f32 -1.442695, %v4966_v23  ;;  %v4967_v58 = vadd.f32 %v4920_v39, %v3315_v47  ;;  %v4969_v63 = vadd.f32 %v4961_v50, %v3388_v31 }
 0xd2c   :  { %v4922_v46 = vpop.f32.mrf.mxu0  ;;  %v4963_v37 = vpop.f32.mrf.mxu1 }
 0xd2d   :  { %7306 = vpow2.f32 %v6626_v27  ;;  %v6627_v49 = vmul.f32 -1.442695, %v4967_v58  ;;  %v6628_v44 = vmul.f32 -1.442695, %v4969_v63 }
 0xd2e   :  { %v4923_v40 = vpop.f32.mrf.mxu0  ;;  %v4964_v51 = vpop.f32.mrf.mxu1 }
 0xd2f   :  { %7308 = vpow2.f32 %v6627_v49 }
 0xd30   :  { %7310 = vtanh.f32 %v4968_v29  ;;  %v3319_v29 = vadd.f32 %v8884_v55, %v8389_v2 }
 0xd31   :  { %7312 = vpow2.f32 %v6628_v44 }
 0xd3a   :  { %v7307_v59 = vpop.eup %7306 }
 0xd3b   :  { %v4973_v42 = vadd.f32 1.0, %v7307_v59 }
 0xd3c   :  { %v7309_v25 = vpop.eup %7308 }
 0xd3d   :  { %7314 = vrcp.f32 %v4973_v42  ;;  %v4979_v47 = vadd.f32 1.0, %v7309_v25  ;;  %v7311_v23 = vpop.eup %7310 }
 0xd3e   :  { %v7313_v39 = vpop.eup %7312 }
 0xd3f   :  { %7316 = vrcp.f32 %v4979_v47  ;;  %v4986_v37 = vadd.f32 1.0, %v7313_v39 }
 0xd41   :  { %7318 = vrcp.f32 %v4986_v37 }
 0xd4a   :  { %v7315_v27 = vpop.eup %7314 }
 0xd4b   :  { %v4991_v58 = vmul.f32 %v7315_v27, %v7311_v23 }
 0xd4c   :  { %v7317_v46 = vpop.eup %7316 }
 0xd4d   :  { %v4990_v50 = vmul.f32 %v7317_v46, %v8621_v24  ;;  %v8883_v24 = vld [vmem:[#allocation28_spill] sm:$0xff] }
 0xd4e   :  { %v7319_v35 = vpop.eup %7318  ;;  %v3317_v31 = vadd.f32 %v8883_v24, %v8381_v6 }
 0xd4f   :  { %v8671_v49 = vadd.f32 %v4991_v58, %v4990_v50  ;;  %v8886_v50 = vld [vmem:[#allocation29_spill] sm:$0xff] }
 0xd51   :  { %7320 = vtanh.f32 %v8671_v49 }
 0xd5e   :  { %v7321_v40 = vpop.eup %7320 }
 0xd5f   :  { %v8674_v51 = vmul.f32 %v7321_v40, %v7319_v35  ;;  %v3390_v35 = vadd.f32 %v8886_v50, %v8404_v56 }
 0xd61   :  { %v5003_v61 = vpack.c.bf16 %v8674_v51, %v8674_v51 }
 0xd63   :  { %5229 = vmatmul.mubr.bf16.vlgmr.msra.gmra.mxu0 %v5003_v61  ;;  %5270 = vmatmul.mubr.bf16.vlgmr.msra.gmra.mxu1 %v5003_v61 }
 0xd64   :  { %5509 = vmatpush1.bf16.msra.mxu0 %v8518_v17  ;;  %5550 = vmatpush1.bf16.msra.mxu1 %v8520_v28 }
 0xd65   :  { %5510 = vmatprep.subr.bf16.mxu0 %v8526_v21  ;;  %5551 = vmatprep.subr.bf16.mxu1 %v8528_v3 }
 0xd66   :  { %5540 = vmatprep.mubr.bf16.mxu0 %v8834_v54  ;;  %5581 = vmatprep.mubr.bf16.mxu1 %v8834_v54 }
 0xd68   :  { %5511 = vmatpush1.bf16.msra.mxu0 %v8530_v53  ;;  %5552 = vmatpush1.bf16.msra.mxu1 %v8532_v34 }
 0xd69   :  { %5512 = vmatprep.subr.bf16.mxu0 %v8538_v13  ;;  %5553 = vmatprep.subr.bf16.mxu1 %v8540_v19 }
 0xd6c   :  { %5513 = vmatpush1.bf16.msra.mxu0 %v8542_v1  ;;  %5554 = vmatpush1.bf16.msra.mxu1 %v8544_v43 }
 0xd6d   :  { %5514 = vmatprep.subr.bf16.mxu0 %v8550_v7  ;;  %5555 = vmatprep.subr.bf16.mxu1 %v8552_v38 }
 0xd70   :  { %5515 = vmatpush1.bf16.msra.mxu0 %v8554_v60  ;;  %5556 = vmatpush1.bf16.msra.mxu1 %v8556_v22 }
 0xd71   :  { %5516 = vmatprep.subr.bf16.mxu0 %v8560_v8  ;;  %5557 = vmatprep.subr.bf16.mxu1 %v8562_v45 }
 0xd74   :  { %5517 = vmatpush1.bf16.msra.mxu0 %v8566_v18  ;;  %5558 = vmatpush1.bf16.msra.mxu1 %v8568_v4 }
 0xd75   :  { %5518 = vmatprep.subr.bf16.mxu0 %v8572_v14  ;;  %5559 = vmatprep.subr.bf16.mxu1 %v8574_v20 }
 0xd78   :  { %5519 = vmatpush1.bf16.msra.mxu0 %v8578_v32  ;;  %5560 = vmatpush1.bf16.msra.mxu1 %v8580_v52 }
 0xd79   :  { %5520 = vmatprep.subr.bf16.mxu0 %v8584_v36  ;;  %5561 = vmatprep.subr.bf16.mxu1 %v8586_v9 }
 0xd7c   :  { %5521 = vmatpush1.bf16.msra.mxu0 %v8590_v10  ;;  %5562 = vmatpush1.bf16.msra.mxu1 %v8592_v11 }
 0xd7d   :  { %5522 = vmatprep.subr.bf16.mxu0 %v8596_v12  ;;  %5563 = vmatprep.subr.bf16.mxu1 %v8598_v15 }
 0xd80   :  { %5523 = vmatpush1.bf16.msra.mxu0 %v8602_v16  ;;  %5564 = vmatpush1.bf16.msra.mxu1 %v8604_v48 }
 0xd81   :  { %5820 = vmatprep.subr.bf16.mxu0 %v8514_v33  ;;  %5861 = vmatprep.subr.bf16.mxu1 %v8516_v57  ;;  %v8885_v57 = vld [vmem:[#allocation36_spill] sm:$0xff] }
 0xd82   :  { %v3392_v46 = vadd.f32 %v8885_v57, %v8399_v5 }
 0xe23   :  { %v5230_v63 = vpop.f32.mrf.mxu0  ;;  %v5271_v41 = vpop.f32.mrf.mxu1 }
 0xe24   :  { %v5278_v44 = vadd.f32 %v5230_v63, %v3317_v31  ;;  %v5280_v40 = vadd.f32 %v5271_v41, %v3390_v35 }
 0xe25   :  { %v5232_v59 = vpop.f32.mrf.mxu0  ;;  %v5273_v42 = vpop.f32.mrf.mxu1 }
 0xe26   :  { %v6661_v25 = vmul.f32 -1.442695, %v5278_v44  ;;  %v5279_v47 = vadd.f32 %v5232_v59, %v3319_v29  ;;  %v5281_v37 = vadd.f32 %v5273_v42, %v3392_v46 }
 0xe27   :  { %v5234_v23 = vpop.f32.mrf.mxu0  ;;  %v5275_v39 = vpop.f32.mrf.mxu1 }
 0xe28   :  { %7322 = vpow2.f32 %v6661_v25  ;;  %v6662_v27 = vmul.f32 -1.442695, %v5279_v47  ;;  %v6663_v61 = vmul.f32 -1.442695, %v5281_v37 }
 0xe29   :  { %v5235_v33 = vpop.f32.mrf.mxu0  ;;  %v5276_v58 = vpop.f32.mrf.mxu1 }
 0xe2a   :  { %7324 = vpow2.f32 %v6662_v27 }
 0xe2b   :  { %7326 = vtanh.f32 %v5280_v40 }
 0xe2c   :  { %7328 = vpow2.f32 %v6663_v61 }
 0xe35   :  { %v7323_v24 = vpop.eup %7322 }
 0xe36   :  { %v5285_v31 = vadd.f32 1.0, %v7323_v24 }
 0xe37   :  { %v7325_v63 = vpop.eup %7324 }
 0xe38   :  { %7330 = vrcp.f32 %v5285_v31  ;;  %v5291_v55 = vadd.f32 1.0, %v7325_v63  ;;  %v7327_v29 = vpop.eup %7326  ;;  %v7107_v31 = vld [vmem:[#allocation15 + $0x30] sm:$0xff]   ;;  %v5942_v63 = vpack.c.bf16 %v8460_v0, %v8410_v26  ;;  %v7113_v26 = vld [vmem:[#allocation15] sm:$0xff]   ;;  %v5943_v0 = vpack.c.bf16 %v8624_v62, %v8508_v30 }
 0xe39   :  { %v7329_v44 = vpop.eup %7328 }
 0xe3a   :  { %7332 = vrcp.f32 %v5291_v55  ;;  %v5298_v23 = vadd.f32 1.0, %v7329_v44  ;;  %v7108_v55 = vld [vmem:[#allocation15 + $0x28] sm:$0xff]   ;;  %v7110_v44 = vld [vmem:[#allocation15 + $0x18] sm:$0xff]  }
 0xe3c   :  { %7334 = vrcp.f32 %v5298_v23  ;;  %v8891_v23 = vld [vmem:[#allocation23_spill] sm:$0xff] }
 0xe45   :  { %v7331_v59 = vpop.eup %7330 }
 0xe46   :  { %v5303_v25 = vmul.f32 %v7331_v59, %v7327_v29  ;;  %v7109_v29 = vld [vmem:[#allocation15 + $0x20] sm:$0xff]   ;;  %v7111_v59 = vld [vmem:[#allocation15 + $0x10] sm:$0xff]  }
 0xe47   :  { %v7333_v47 = vpop.eup %7332 }
 0xe48   :  { %v5302_v42 = vmul.f32 %v7333_v47, %v8671_v49 }
 0xe49   :  { %v7335_v41 = vpop.eup %7334 }
 0xe4a   :  { %v8721_v39 = vadd.f32 %v5303_v25, %v5302_v42  ;;  %v7112_v25 = vld [vmem:[#allocation15 + $0x8] sm:$0xff]   ;;  %v3327_v42 = vadd.f32 %v8891_v23, %v8381_v6 }
 0xe4c   :  { %7336 = vtanh.f32 %v8721_v39 }
 0xe59   :  { %v7337_v27 = vpop.eup %7336 }
 0xe5a   :  { %v8724_v33 = vmul.f32 %v7337_v27, %v7335_v41  ;;  %v8892_v27 = vld [vmem:[#allocation42_spill] sm:$0xff] }
 0xe5c   :  { %v5315_v58 = vpack.c.bf16 %v8724_v33, %v8724_v33  ;;  %v5944_v47 = vpack.c.bf16 %v8724_v33, %v8674_v51 }
 0xe5e   :  { %5541 = vmatmul.mubr.bf16.vlgmr.msra.gmra.mxu0 %v5315_v58  ;;  %5582 = vmatmul.mubr.bf16.vlgmr.msra.gmra.mxu1 %v5315_v58  ;;  %v3329_v58 = vadd.f32 %v8892_v27, %v8389_v2 }
 0xe5f   :  { %5821 = vmatpush1.bf16.msra.mxu0 %v8518_v17  ;;  %5862 = vmatpush1.bf16.msra.mxu1 %v8520_v28  ;;  %v8887_v17 = vld [vmem:[#allocation37_spill] sm:$0xff] }
 0xe60   :  { %5822 = vmatprep.subr.bf16.mxu0 %v8526_v21  ;;  %5863 = vmatprep.subr.bf16.mxu1 %v8528_v3  ;;  %v3323_v28 = vadd.f32 %v8887_v17, %v8381_v6 }
 0xe61   :  { %5852 = vmatprep.mubr.bf16.mxu0 %v8834_v54  ;;  %5893 = vmatprep.mubr.bf16.mxu1 %v8834_v54  ;;  %v7106_v54 = vld [vmem:[#allocation15 + $0x38] sm:$0xff]  }
 0xe63   :  { %5823 = vmatpush1.bf16.msra.mxu0 %v8530_v53  ;;  %5864 = vmatpush1.bf16.msra.mxu1 %v8532_v34  ;;  %v8888_v53 = vld [vmem:[#allocation39_spill] sm:$0xff] }
 0xe64   :  { %5824 = vmatprep.subr.bf16.mxu0 %v8538_v13  ;;  %5865 = vmatprep.subr.bf16.mxu1 %v8540_v19  ;;  %v3325_v34 = vadd.f32 %v8888_v53, %v8389_v2 }
 0xe67   :  { %5825 = vmatpush1.bf16.msra.mxu0 %v8542_v1  ;;  %5866 = vmatpush1.bf16.msra.mxu1 %v8544_v43 }
 0xe68   :  { %5826 = vmatprep.subr.bf16.mxu0 %v8550_v7  ;;  %5867 = vmatprep.subr.bf16.mxu1 %v8552_v38 }
 0xe6b   :  { %5827 = vmatpush1.bf16.msra.mxu0 %v8554_v60  ;;  %5868 = vmatpush1.bf16.msra.mxu1 %v8556_v22 }
 0xe6c   :  { %5828 = vmatprep.subr.bf16.mxu0 %v8560_v8  ;;  %5869 = vmatprep.subr.bf16.mxu1 %v8562_v45 }
 0xe6f   :  { %5829 = vmatpush1.bf16.msra.mxu0 %v8566_v18  ;;  %5870 = vmatpush1.bf16.msra.mxu1 %v8568_v4  ;;  %v8889_v18 = vld [vmem:[#allocation40_spill] sm:$0xff] }
 0xe70   :  { %5830 = vmatprep.subr.bf16.mxu0 %v8572_v14  ;;  %5871 = vmatprep.subr.bf16.mxu1 %v8574_v20  ;;  %v3398_v4 = vadd.f32 %v8889_v18, %v8399_v5  ;;  %v8890_v20 = vld [vmem:[#allocation38_spill] sm:$0xff] }
 0xe73   :  { %5831 = vmatpush1.bf16.msra.mxu0 %v8578_v32  ;;  %5872 = vmatpush1.bf16.msra.mxu1 %v8580_v52  ;;  %v3396_v32 = vadd.f32 %v8890_v20, %v8404_v56 }
 0xe74   :  { %5832 = vmatprep.subr.bf16.mxu0 %v8584_v36  ;;  %5873 = vmatprep.subr.bf16.mxu1 %v8586_v9 }
 0xe77   :  { %5833 = vmatpush1.bf16.msra.mxu0 %v8590_v10  ;;  %5874 = vmatpush1.bf16.msra.mxu1 %v8592_v11 }
 0xe78   :  { %5834 = vmatprep.subr.bf16.mxu0 %v8596_v12  ;;  %5875 = vmatprep.subr.bf16.mxu1 %v8598_v15 }
 0xe7b   :  { %5835 = vmatpush1.bf16.msra.mxu0 %v8602_v16  ;;  %5876 = vmatpush1.bf16.msra.mxu1 %v8604_v48 }
 0xe7c   :  { %6755 = vmatprep.subr.bf16.mxu0 %v7106_v54 }
 0xf1e   :  { %v5542_v21 = vpop.f32.mrf.mxu0  ;;  %v5583_v3 = vpop.f32.mrf.mxu1 }
 0xf1f   :  { %v5590_v13 = vadd.f32 %v5542_v21, %v3323_v28  ;;  %v5592_v52 = vadd.f32 %v5583_v3, %v3396_v32 }
 0xf20   :  { %v5544_v19 = vpop.f32.mrf.mxu0  ;;  %v5585_v1 = vpop.f32.mrf.mxu1 }
 0xf21   :  { %v6696_v43 = vmul.f32 -1.442695, %v5590_v13  ;;  %v5591_v7 = vadd.f32 %v5544_v19, %v3325_v34  ;;  %v5593_v14 = vadd.f32 %v5585_v1, %v3398_v4  ;;  %v8893_v34 = vld [vmem:[#allocation43_spill] sm:$0xff]  ;;  %v8894_v19 = vld [vmem:[#allocation41_spill] sm:$0xff] }
 0xf22   :  { %v5546_v38 = vpop.f32.mrf.mxu0  ;;  %v5587_v60 = vpop.f32.mrf.mxu1  ;;  %v3402_v6 = vadd.f32 %v8893_v34, %v8399_v5  ;;  %v3400_v1 = vadd.f32 %v8894_v19, %v8404_v56 }
 0xf23   :  { %7338 = vpow2.f32 %v6696_v43  ;;  %v6697_v22 = vmul.f32 -1.442695, %v5591_v7  ;;  %v6698_v36 = vmul.f32 -1.442695, %v5593_v14 }
 0xf24   :  { %v5547_v8 = vpop.f32.mrf.mxu0  ;;  %v5588_v45 = vpop.f32.mrf.mxu1 }
 0xf25   :  { %7340 = vpow2.f32 %v6697_v22  ;;  %v6734_v8 = vld [vmem:[%s8809_s8] ss:$0 sm:$0xff]  ;;  %s7538_s8 = smov [#allocation17]  }
 0xf26   :  { %7342 = vtanh.f32 %v5592_v52  ;;  %s6095_s22 = sshll.u32 %s7538_s8, 4  ;;  %s6096_s22 = int_to_ptr.vmem [resolvable:$true] %s6095_s22 }
 0xf27   :  { %7344 = vpow2.f32 %v6698_v36  ;;  %s7494_s1 = scalar_lea.vmem %s6096_s22, 1024  ;;  %p7499_p3 = scmp.lt.s32.totalorder %s6096_s22, %s6096_s22 }
 0xf28   :  { %p7495_p2 = scmp.ne.s32.totalorder %s6096_s22, %s7494_s1  ;;  %p7500_p4 = scmp.lt.s32.totalorder %s7494_s1, %s7494_s1 }
 0xf2a   :  { %p7501_p5 = por %p7500_p4, %p7499_p3 }
 0xf2c   :  { %p7502_p6 = pnand %p7501_p5, %p7495_p2 }
 0xf30   :  { %v7339_v9 = vpop.eup %7338 }
 0xf31   :  { %v5597_v10 = vadd.f32 1.0, %v7339_v9 }
 0xf32   :  { %v7341_v11 = vpop.eup %7340 }
 0xf33   :  { %7346 = vrcp.f32 %v5597_v10  ;;  %v5603_v12 = vadd.f32 1.0, %v7341_v11  ;;  %v7343_v15 = vpop.eup %7342 }
 0xf34   :  { %v7345_v16 = vpop.eup %7344 }
 0xf35   :  { %7348 = vrcp.f32 %v5603_v12  ;;  %v5610_v46 = vadd.f32 1.0, %v7345_v16 }
 0xf37   :  { %7350 = vrcp.f32 %v5610_v46 }
 0xf40   :  { %v7347_v48 = vpop.eup %7346 }
 0xf41   :  { %v5615_v49 = vmul.f32 %v7347_v48, %v7343_v15 }
 0xf42   :  { %v7349_v57 = vpop.eup %7348 }
 0xf43   :  { %v5614_v37 = vmul.f32 %v7349_v57, %v8721_v39 }
 0xf44   :  { %v7351_v35 = vpop.eup %7350 }
 0xf45   :  { %v8769_v50 = vadd.f32 %v5615_v49, %v5614_v37 }
 0xf47   :  { %7352 = vtanh.f32 %v8769_v50 }
 0xf54   :  { %v7353_v40 = vpop.eup %7352 }
 0xf55   :  { %v8772_v61 = vmul.f32 %v7353_v40, %v7351_v35 }
 0xf57   :  { %v5627_v24 = vpack.c.bf16 %v8772_v61, %v8772_v61 }
 0xf59   :  { %5853 = vmatmul.mubr.bf16.vlgmr.msra.gmra.mxu0 %v5627_v24  ;;  %5894 = vmatmul.mubr.bf16.vlgmr.msra.gmra.mxu1 %v5627_v24 }
 0xf5a   :  { %6756 = vmatpush3.bf16.msra.mxu0 %v7106_v54  ;;  %6771 = vmatprep.mubr.bf16.mxu0 %v5942_v63 }
 0xf5b   :  { %6757 = vmatprep.subr.bf16.mxu0 %v7107_v31 }
 0xf5e   :  { %6758 = vmatpush3.bf16.msra.mxu0 %v7107_v31 }
 0xf5f   :  { %6759 = vmatprep.subr.bf16.mxu0 %v7108_v55 }
 0xf62   :  { %6760 = vmatpush3.bf16.msra.mxu0 %v7108_v55 }
 0xf63   :  { %6761 = vmatprep.subr.bf16.mxu0 %v7109_v29 }
 0xf66   :  { %6762 = vmatpush3.bf16.msra.mxu0 %v7109_v29 }
 0xf67   :  { %6763 = vmatprep.subr.bf16.mxu0 %v7110_v44 }
 0xf6a   :  { %6764 = vmatpush3.bf16.msra.mxu0 %v7110_v44 }
 0xf6b   :  { %6765 = vmatprep.subr.bf16.mxu0 %v7111_v59 }
 0xf6e   :  { %6766 = vmatpush3.bf16.msra.mxu0 %v7111_v59 }
 0xf6f   :  { %6767 = vmatprep.subr.bf16.mxu0 %v7112_v25 }
 0xf72   :  { %6768 = vmatpush3.bf16.msra.mxu0 %v7112_v25 }
 0xf73   :  { %6769 = vmatprep.subr.bf16.mxu0 %v7113_v26 }
 0xf76   :  { %6770 = vmatpush3.bf16.msra.mxu0 %v7113_v26 }
 0xf79   :  { %6772 = vmatmul.mubr.bf16.vlgmr.msra.gmra.mxu0 %v5943_v0 }
 0xf7a   :  { %6775 = vmatprep.mubr.bf16.mxu0 %v5944_v47 }
0x1019   :  { %v5854_v39 = vpop.f32.mrf.mxu0  ;;  %v5895_v41 = vpop.f32.mrf.mxu1 }
0x101a   :  { %v5902_v54 = vadd.f32 %v5854_v39, %v3327_v42  ;;  %v5904_v2 = vadd.f32 %v5895_v41, %v3400_v1 }
0x101b   :  { %v5856_v17 = vpop.f32.mrf.mxu0  ;;  %v5897_v28 = vpop.f32.mrf.mxu1 }
0x101c   :  { %v6731_v21 = vmul.f32 -1.442695, %v5902_v54  ;;  %v5903_v3 = vadd.f32 %v5856_v17, %v3329_v58  ;;  %v5905_v13 = vadd.f32 %v5897_v28, %v3402_v6 }
0x101d   :  { %v5858_v53 = vpop.f32.mrf.mxu0  ;;  %v5899_v30 = vpop.f32.mrf.mxu1 }
0x101e   :  { %7354 = vpow2.f32 %v6731_v21  ;;  %v6732_v62 = vmul.f32 -1.442695, %v5903_v3  ;;  %v6733_v43 = vmul.f32 -1.442695, %v5905_v13 }
0x101f   :  { %v5859_v51 = vpop.f32.mrf.mxu0  ;;  %v5900_v33 = vpop.f32.mrf.mxu1 }
0x1020   :  { %7356 = vpow2.f32 %v6732_v62 }
0x1021   :  { %7358 = vtanh.f32 %v5904_v2 }
0x1022   :  { %7360 = vpow2.f32 %v6733_v43 }
0x102b   :  { %v7355_v7 = vpop.eup %7354 }
0x102c   :  { %v5909_v38 = vadd.f32 1.0, %v7355_v7 }
0x102d   :  { %v7357_v60 = vpop.eup %7356 }
0x102e   :  { %7362 = vrcp.f32 %v5909_v38  ;;  %v5915_v22 = vadd.f32 1.0, %v7357_v60  ;;  %v7359_v45 = vpop.eup %7358 }
0x102f   :  { %v7361_v18 = vpop.eup %7360 }
0x1030   :  { %7364 = vrcp.f32 %v5915_v22  ;;  %v5922_v36 = vadd.f32 1.0, %v7361_v18 }
0x1032   :  { %7366 = vrcp.f32 %v5922_v36 }
0x1039   :  { %v6773_v5 = vpop.f32.mrf.mxu0 }
0x103a   :  { %v6060_v4 = vadd.f32 %v6773_v5, %v6734_v8 }
0x103b   :  { %v7363_v14 = vpop.eup %7362  ;;  %v6051_v56 = vpop.f32.mrf.mxu0 }
0x103c   :  { %v5927_v20 = vmul.f32 %v7363_v14, %v7359_v45  ;;  %6084 = vst [vmem:[#allocation17 + $0x10] sm:$0xff] %v6060_v4  ;;  %v6052_v32 = vadd.f32 %v6734_v8, %v6051_v56 }
0x103d   :  { %v7365_v52 = vpop.eup %7364  ;;  %v6774_v9 = vpop.f32.mrf.mxu0 }
0x103e   :  { %v5926_v10 = vmul.f32 %v7365_v52, %v8769_v50  ;;  %6082 = vst [vmem:[#allocation17] sm:$0xff] %v6052_v32  ;;  %v6063_v11 = vadd.f32 %v6774_v9, %v6734_v8 }
0x103f   :  { %v6054_v12 = vpop.f32.mrf.mxu0  ;;  %v7367_v48 = vpop.eup %7366 }
0x1040   :  { %6085 = vst [vmem:[#allocation17 + $0x18] sm:$0xff] %v6063_v11  ;;  %v6055_v15 = vadd.f32 %v6734_v8, %v6054_v12  ;;  %v5928_v16 = vadd.f32 %v5927_v20, %v5926_v10 }
0x1042   :  { %6083 = vst [vmem:[#allocation17 + $0x8] sm:$0xff] %v6055_v15  ;;  %7368 = vtanh.f32 %v5928_v16 }
0x104f   :  { %v7369_v49 = vpop.eup %7368 }
0x1050   :  { %v5930_v57 = vmul.f32 %v7369_v49, %v7367_v48 }
0x1052   :  { %v5945_v46 = vpack.c.bf16 %v5930_v57, %v8772_v61 }
0x1054   :  { %6776 = vmatmul.mubr.bf16.gmra.mxu0 %v5945_v46 }
0x1114   :  { %v6777_v37 = vpop.f32.mrf.mxu0 }
0x1115   :  { %v6076_v35 = vadd.f32 %v6777_v37, %v6734_v8 }
0x1116   :  { %v6067_v40 = vpop.f32.mrf.mxu0 }
0x1117   :  { %6088 = vst [vmem:[#allocation17 + $0x30] sm:$0xff] %v6076_v35  ;;  %v6068_v50 = vadd.f32 %v6734_v8, %v6067_v40 }
0x1118   :  { %v6778_v24 = vpop.f32.mrf.mxu0 }
0x1119   :  { %6086 = vst [vmem:[#allocation17 + $0x20] sm:$0xff] %v6068_v50  ;;  %v6079_v31 = vadd.f32 %v6778_v24, %v6734_v8 }
0x111a   :  { %v6070_v63 = vpop.f32.mrf.mxu0 }
0x111b   :  { %6089 = vst [vmem:[#allocation17 + $0x38] sm:$0xff] %v6079_v31  ;;  %v6071_v55 = vadd.f32 %v6734_v8, %v6070_v63 }
0x111d   :  { %6087 = vst [vmem:[#allocation17 + $0x28] sm:$0xff] %v6071_v55 }
0x111e   :  { %7505 = shalt.err (!%p7502_p6)
}
0x111f   :  { %6101 = dma.vmem_to_hbm [thread:$0]  %s6096_s22, 1024, %s8810_s9, [#allocation8], %s7529_s23, %s7529_s23, %s7530_s24  }
0x1120   :  { %7522 = dma.done.wait [#allocation8], 1024  }
0x1121   :  { %7523 = vsyncadd [#allocation8], 4294966272 }
0x1122   :  { %6105 = vsyncpa [#allocation7], 1 }
0x1123   :  { %6106 = vsyncpa [#allocation10], 1 }
0x1124   :  { %6107 = vsyncpa [#allocation13], 1 }
0x1125   :  { %6108 = vsyncpa [#allocation16], 1 }
0x1126   :  { %6109 = vsyncpa [#allocation8], 1 }

</bundles_post_ra>
